<compile_context>
chip_gen: v6e
topology: v6e:2x2x1
jax: 0.10.0
libtpu: 0.0.40
codegen_flags: <defaults>
</compile_context>

<pallas_src>
import functools

import jax
import jax.numpy as jnp
import numpy as np
from jax import lax
from jax.experimental import pallas as pl
from jax.experimental.pallas import tpu as pltpu

BN_EPS = 1e-5


# ----------------------------------------------------------------------------
# helpers
# ----------------------------------------------------------------------------
def _choose_row_tile(H, W, target=256):
    """Smallest row-tile TH dividing H with TH*W >= target and TH*W % 8 == 0.
    Falls back to the full image (block == full dim is always legal)."""
    for th in range(1, H + 1):
        if H % th == 0 and (th * W) % 8 == 0 and th * W >= target:
            return th
    return H


def _per_tap_block_diag(gw, gscale):
    """gw: (K, K, G, gs_in, gs_out) -> (K*K, Cin, Cin) per-tap block-diagonal weights
    with the BatchNorm scale folded into the output columns (f32 fold, bf16 result).

    Entries are nonzero only when cin and cout fall in the same group, so a dense
    (TM,Cin)@(Cin,Cin) matmul per tap reproduces the grouped convolution exactly."""
    K, _, G, gs, _ = gw.shape
    C = G * gs
    eye = jnp.eye(G, dtype=jnp.float32)
    bd = jnp.einsum('xygij,gh->xygihj', gw.astype(jnp.float32), eye)   # (K,K,G,gs,G,gs)
    bd = bd.reshape(K * K, C, C) * gscale.reshape(1, 1, C)             # fold BN scale
    return bd.astype(jnp.bfloat16)


def _bn_fold(key, c, conv_bias):
    """Fold conv bias + BatchNorm (running stats) into per-channel scale/shift."""
    k1, k2, k3, k4 = jax.random.split(key, 4)
    gamma = 1.0 + 0.1 * jax.random.normal(k1, (c,), jnp.float32)
    beta = 0.1 * jax.random.normal(k2, (c,), jnp.float32)
    r_mean = 0.05 * jax.random.normal(k3, (c,), jnp.float32)
    r_var = 1.0 + 0.1 * jax.random.uniform(k4, (c,), jnp.float32)
    s = gamma / jnp.sqrt(r_var + BN_EPS)
    t = (conv_bias - r_mean) * s + beta
    return s, t


# ----------------------------------------------------------------------------
# fused BasicBlock kernel
# ----------------------------------------------------------------------------
def _basic_block_kernel(xp_ref, wg_ref, gt_ref, wp_ref, pt_ref, o_ref,
                        *, ksize, th, W, Cin):
    """One (th*W)-row tile of: grouped kxk conv -> BN -> ReLU -> 1x1 conv -> BN -> ReLU.

    Grouped conv = K*K accumulated MXU dots with per-tap block-diagonal (Cin,Cin)
    weights (BN scale already folded into the weight columns)."""
    r = pl.program_id(1)
    row0 = pl.multiple_of(r * th, th)     # first output row of this tile (padded coords)
    TM = th * W

    acc = None
    t = 0
    for kh in range(ksize):
        for kw in range(ksize):
            # (th, W, Cin) bf16 tap straight from the resident padded slab; the reshape
            # only merges the leading dims (lane dim unchanged) -> no lane shuffles.
            tap = xp_ref[0, pl.ds(row0 + kh, th), pl.ds(kw, W), :].reshape(TM, Cin)
            d = jnp.dot(tap, wg_ref[t], preferred_element_type=jnp.float32)
            acc = d if acc is None else acc + d
            t += 1

    # grouped conv (scale pre-folded) + shift + ReLU
    y = jnp.maximum(acc + gt_ref[...], 0.0)                              # (TM, Cin) f32

    # 1x1 conv (scale pre-folded) + shift + ReLU; intermediate never leaves VMEM/vregs.
    z = jnp.dot(y.astype(wp_ref.dtype), wp_ref[...],
                preferred_element_type=jnp.float32)                      # (TM, Cout) f32
    z = jnp.maximum(z + pt_ref[...], 0.0)

    o_ref[0] = z.astype(o_ref.dtype)                                     # lane-dense bf16 store


def basic_block_forward(x_nchw, params, *, ksize=3):
    """Fused BasicBlock forward. Input is NCHW (like the PyTorch module); output is
    NCHW bf16 (kept narrow so the post-kernel transpose moves half the bytes)."""
    # cast first (halves bytes), then transpose (XLA fuses convert+transpose), then pad.
    x = jnp.transpose(x_nchw.astype(jnp.bfloat16), (0, 2, 3, 1))         # NHWC bf16
    N, H, W, Cin = x.shape
    Cout = params['pw'].shape[-1]
    pad = ksize // 2
    K2 = ksize * ksize

    xp = jnp.pad(x, ((0, 0), (pad, pad), (pad, pad), (0, 0)))
    Hp, Wp_ = H + 2 * pad, W + 2 * pad

    th = _choose_row_tile(H, W, target=256)
    TM = th * W
    nr = H // th

    # weights with BN scale folded in (f32 fold -> bf16); only shifts stay in-kernel
    wg = _per_tap_block_diag(params['gw'], params['gscale'])             # (K2, Cin, Cin)
    wp = (params['pw'].reshape(Cin, Cout).astype(jnp.float32)
          * params['pscale'].reshape(1, Cout)).astype(jnp.bfloat16)      # (Cin, Cout)
    gt = params['gshift'].reshape(1, Cin).astype(jnp.float32)
    pt = params['pshift'].reshape(1, Cout).astype(jnp.float32)

    kernel = functools.partial(_basic_block_kernel, ksize=ksize, th=th, W=W, Cin=Cin)

    # rough double-buffered VMEM estimate; only raise the scoped limit when needed
    # (keeps behavior identical to the compiler default at small shapes).
    est_bytes = 2 * (Hp * Wp_ * Cin * 2 + K2 * Cin * Cin * 2
                     + Cin * Cout * 2 + TM * Cout * 2) + 8 * (Cin + Cout)
    cp_kwargs = dict(dimension_semantics=("parallel", "arbitrary"))
    if est_bytes > 12 * (1 << 20):
        cp_kwargs["vmem_limit_bytes"] = int(1.5 * est_bytes)

    out = pl.pallas_call(
        kernel,
        out_shape=jax.ShapeDtypeStruct((N, H * W, Cout), jnp.bfloat16),
        grid=(N, nr),
        in_specs=[
            # Padded activation slab: index map ignores the row axis, so the same VMEM
            # block stays resident across row tiles (DMA'd once per batch element).
            pl.BlockSpec((1, Hp, Wp_, Cin), lambda n, r: (n, 0, 0, 0)),
            pl.BlockSpec((K2, Cin, Cin), lambda n, r: (0, 0, 0)),        # per-tap grouped W (scale folded)
            pl.BlockSpec((1, Cin), lambda n, r: (0, 0)),                 # grouped-conv BN shift
            pl.BlockSpec((Cin, Cout), lambda n, r: (0, 0)),              # 1x1 conv weight (scale folded)
            pl.BlockSpec((1, Cout), lambda n, r: (0, 0)),                # 1x1 BN shift
        ],
        out_specs=pl.BlockSpec((1, TM, Cout), lambda n, r: (n, r, 0)),
        compiler_params=pltpu.CompilerParams(**cp_kwargs),
    )(xp, wg, gt, wp, pt)

    return jnp.transpose(out.reshape(N, H, W, Cout), (0, 3, 1, 2))       # NCHW, bf16


# ----------------------------------------------------------------------------
# deterministic synthetic parameters
# ----------------------------------------------------------------------------
def init_params(key, in_c, out_c, group_size, ksize=3):
    assert in_c % group_size == 0, "in_channels must be divisible by group_size"
    G = in_c // group_size
    k1, k2, k3, k4, k5, k6 = jax.random.split(key, 6)

    gw = jax.random.normal(k1, (ksize, ksize, G, group_size, group_size), jnp.float32)
    gw = gw * float(np.sqrt(2.0 / (ksize * ksize * group_size)))
    gb = 0.01 * jax.random.normal(k2, (in_c,), jnp.float32)
    gscale, gshift = _bn_fold(k3, in_c, gb)

    pw = jax.random.normal(k4, (1, 1, in_c, out_c), jnp.float32)
    pw = pw * float(np.sqrt(2.0 / in_c))
    pb = 0.01 * jax.random.normal(k5, (out_c,), jnp.float32)
    pscale, pshift = _bn_fold(k6, out_c, pb)

    # Weights stored in bf16 (the kernel's MXU dtype); BN scale/shift kept f32.
    return dict(gw=gw.astype(jnp.bfloat16), gscale=gscale, gshift=gshift,
                pw=pw.astype(jnp.bfloat16), pscale=pscale, pshift=pshift)


# ----------------------------------------------------------------------------
# pure-JAX reference (f32 math on the same bf16-stored operands, BN applied separately)
# ----------------------------------------------------------------------------
def reference_forward(x_nchw, params, *, group_size, ksize=3):
    x = jnp.transpose(x_nchw, (0, 2, 3, 1)).astype(jnp.bfloat16).astype(jnp.float32)
    N, H, W, C = x.shape
    G = C // group_size
    dn = ('NHWC', 'HWIO', 'NHWC')

    gw = params['gw'].astype(jnp.float32)
    gw = jnp.transpose(gw, (0, 1, 3, 2, 4)).reshape(ksize, ksize, group_size, C)
    y = lax.conv_general_dilated(x, gw, (1, 1), 'SAME', dimension_numbers=dn,
                                 feature_group_count=G,
                                 precision=lax.Precision.HIGHEST)
    y = jnp.maximum(y * params['gscale'] + params['gshift'], 0.0)

    pw = params['pw'].astype(jnp.float32)
    z = lax.conv_general_dilated(y, pw, (1, 1), 'VALID', dimension_numbers=dn,
                                 precision=lax.Precision.HIGHEST)
    z = jnp.maximum(z * params['pscale'] + params['pshift'], 0.0)
    return jnp.transpose(z, (0, 3, 1, 2))


# ----------------------------------------------------------------------------
if __name__ == "__main__":
    # Small shapes consistent with the module: grouped conv needs C % group_size == 0.
    N, CIN, H, W = 2, 64, 16, 16
    COUT, GROUP_SIZE, KSIZE = 128, 32, 3

    x = jax.random.normal(jax.random.PRNGKey(0), (N, CIN, H, W), jnp.float32)
    params = init_params(jax.random.PRNGKey(1), CIN, COUT, GROUP_SIZE, KSIZE)

    out = jax.block_until_ready(basic_block_forward(x, params, ksize=KSIZE))
    assert out.shape == (N, COUT, H, W)

    ref = jax.block_until_ready(reference_forward(x, params, group_size=GROUP_SIZE, ksize=KSIZE))
    # bf16 MXU inputs, bf16 scale-folded weights, bf16 intermediate and bf16 output vs
    # the f32 reference path -> tolerances reflect bf16 inference-level parity.
    np.testing.assert_allclose(np.asarray(out.astype(jnp.float32)), np.asarray(ref),
                               rtol=2e-2, atol=3e-2)

    print("KERNEL_OK")
</pallas_src>

<mosaic_0001>
module attributes {stable_mosaic.version = 11 : i64} {
  func.func @_basic_block_kernel(%arg0: i32, %arg1: i32, %arg2: memref<1x18x18x64xbf16, #tpu.memory_space<vmem>>, %arg3: memref<9x64x64xbf16, #tpu.memory_space<vmem>>, %arg4: memref<1x64xf32, #tpu.memory_space<vmem>>, %arg5: memref<64x128xbf16, #tpu.memory_space<vmem>>, %arg6: memref<1x128xf32, #tpu.memory_space<vmem>>, %arg7: memref<1x256x128xbf16, #tpu.memory_space<vmem>>) attributes {dimension_semantics = [#tpu.dimension_semantics<parallel>, #tpu.dimension_semantics<arbitrary>], iteration_bounds = array<i64: 2, 1>, scalar_prefetch = 0 : i64, scratch_operands = 0 : i64, tpu.core_type = #tpu.core_type<tc>, window_params = [{transform_indices = @transform_0, window_bounds = array<i64: 1, 18, 18, 64>}, {pipeline_mode = #tpu.pipeline_mode<synchronous>, transform_indices = @transform_1, window_bounds = array<i64: 9, 64, 64>}, {pipeline_mode = #tpu.pipeline_mode<synchronous>, transform_indices = @transform_2, window_bounds = array<i64: 1, 64>}, {pipeline_mode = #tpu.pipeline_mode<synchronous>, transform_indices = @transform_3, window_bounds = array<i64: 64, 128>}, {pipeline_mode = #tpu.pipeline_mode<synchronous>, transform_indices = @transform_4, window_bounds = array<i64: 1, 128>}, {transform_indices = @transform_5, window_bounds = array<i64: 1, 256, 128>}]} {
    %c16_i32 = arith.constant 16 : i32
    %0 = arith.muli %arg1, %c16_i32 : i32
    %1 = tpu.assume_multiple %0, 16 : i32
    %c0_i32 = arith.constant 0 : i32
    %2 = arith.addi %1, %c0_i32 : i32
    %c0 = arith.constant 0 : index
    %3 = arith.index_cast %2 : i32 to index
    %c0_0 = arith.constant 0 : index
    %c0_1 = arith.constant 0 : index
    %4 = vector.load %arg2[%c0, %3, %c0_0, %c0_1] : memref<1x18x18x64xbf16, #tpu.memory_space<vmem>>, vector<1x16x16x64xbf16>
    %5 = vector.shape_cast %4 : vector<1x16x16x64xbf16> to vector<16x16x64xbf16>
    %6 = vector.shape_cast %5 : vector<16x16x64xbf16> to vector<256x64xbf16>
    %c0_2 = arith.constant 0 : index
    %c0_3 = arith.constant 0 : index
    %c0_4 = arith.constant 0 : index
    %7 = vector.load %arg3[%c0_2, %c0_3, %c0_4] : memref<9x64x64xbf16, #tpu.memory_space<vmem>>, vector<1x64x64xbf16>
    %8 = vector.shape_cast %7 : vector<1x64x64xbf16> to vector<64x64xbf16>
    %cst = arith.constant dense<0.000000e+00> : vector<256x64xf32>
    %9 = tpu.matmul %6, %8, %cst {dimension_numbers = #tpu.dot_dimension_numbers<[1], [0], [0], [1], [0, 0, 1, 1], [], []>} : vector<256x64xbf16>, vector<64x64xbf16>, vector<256x64xf32> -> vector<256x64xf32>
    %c0_i32_5 = arith.constant 0 : i32
    %10 = arith.addi %1, %c0_i32_5 : i32
    %c0_6 = arith.constant 0 : index
    %11 = arith.index_cast %10 : i32 to index
    %c1 = arith.constant 1 : index
    %c0_7 = arith.constant 0 : index
    %12 = vector.load %arg2[%c0_6, %11, %c1, %c0_7] : memref<1x18x18x64xbf16, #tpu.memory_space<vmem>>, vector<1x16x16x64xbf16>
    %13 = vector.shape_cast %12 : vector<1x16x16x64xbf16> to vector<16x16x64xbf16>
    %14 = vector.shape_cast %13 : vector<16x16x64xbf16> to vector<256x64xbf16>
    %c1_8 = arith.constant 1 : index
    %c0_9 = arith.constant 0 : index
    %c0_10 = arith.constant 0 : index
    %15 = vector.load %arg3[%c1_8, %c0_9, %c0_10] : memref<9x64x64xbf16, #tpu.memory_space<vmem>>, vector<1x64x64xbf16>
    %16 = vector.shape_cast %15 : vector<1x64x64xbf16> to vector<64x64xbf16>
    %cst_11 = arith.constant dense<0.000000e+00> : vector<256x64xf32>
    %17 = tpu.matmul %14, %16, %cst_11 {dimension_numbers = #tpu.dot_dimension_numbers<[1], [0], [0], [1], [0, 0, 1, 1], [], []>} : vector<256x64xbf16>, vector<64x64xbf16>, vector<256x64xf32> -> vector<256x64xf32>
    %18 = arith.addf %9, %17 : vector<256x64xf32>
    %c0_i32_12 = arith.constant 0 : i32
    %19 = arith.addi %1, %c0_i32_12 : i32
    %c0_13 = arith.constant 0 : index
    %20 = arith.index_cast %19 : i32 to index
    %c2 = arith.constant 2 : index
    %c0_14 = arith.constant 0 : index
    %21 = vector.load %arg2[%c0_13, %20, %c2, %c0_14] : memref<1x18x18x64xbf16, #tpu.memory_space<vmem>>, vector<1x16x16x64xbf16>
    %22 = vector.shape_cast %21 : vector<1x16x16x64xbf16> to vector<16x16x64xbf16>
    %23 = vector.shape_cast %22 : vector<16x16x64xbf16> to vector<256x64xbf16>
    %c2_15 = arith.constant 2 : index
    %c0_16 = arith.constant 0 : index
    %c0_17 = arith.constant 0 : index
    %24 = vector.load %arg3[%c2_15, %c0_16, %c0_17] : memref<9x64x64xbf16, #tpu.memory_space<vmem>>, vector<1x64x64xbf16>
    %25 = vector.shape_cast %24 : vector<1x64x64xbf16> to vector<64x64xbf16>
    %cst_18 = arith.constant dense<0.000000e+00> : vector<256x64xf32>
    %26 = tpu.matmul %23, %25, %cst_18 {dimension_numbers = #tpu.dot_dimension_numbers<[1], [0], [0], [1], [0, 0, 1, 1], [], []>} : vector<256x64xbf16>, vector<64x64xbf16>, vector<256x64xf32> -> vector<256x64xf32>
    %27 = arith.addf %18, %26 : vector<256x64xf32>
    %c1_i32 = arith.constant 1 : i32
    %28 = arith.addi %1, %c1_i32 : i32
    %c0_19 = arith.constant 0 : index
    %29 = arith.index_cast %28 : i32 to index
    %c0_20 = arith.constant 0 : index
    %c0_21 = arith.constant 0 : index
    %30 = vector.load %arg2[%c0_19, %29, %c0_20, %c0_21] : memref<1x18x18x64xbf16, #tpu.memory_space<vmem>>, vector<1x16x16x64xbf16>
    %31 = vector.shape_cast %30 : vector<1x16x16x64xbf16> to vector<16x16x64xbf16>
    %32 = vector.shape_cast %31 : vector<16x16x64xbf16> to vector<256x64xbf16>
    %c3 = arith.constant 3 : index
    %c0_22 = arith.constant 0 : index
    %c0_23 = arith.constant 0 : index
    %33 = vector.load %arg3[%c3, %c0_22, %c0_23] : memref<9x64x64xbf16, #tpu.memory_space<vmem>>, vector<1x64x64xbf16>
    %34 = vector.shape_cast %33 : vector<1x64x64xbf16> to vector<64x64xbf16>
    %cst_24 = arith.constant dense<0.000000e+00> : vector<256x64xf32>
    %35 = tpu.matmul %32, %34, %cst_24 {dimension_numbers = #tpu.dot_dimension_numbers<[1], [0], [0], [1], [0, 0, 1, 1], [], []>} : vector<256x64xbf16>, vector<64x64xbf16>, vector<256x64xf32> -> vector<256x64xf32>
    %36 = arith.addf %27, %35 : vector<256x64xf32>
    %c1_i32_25 = arith.constant 1 : i32
    %37 = arith.addi %1, %c1_i32_25 : i32
    %c0_26 = arith.constant 0 : index
    %38 = arith.index_cast %37 : i32 to index
    %c1_27 = arith.constant 1 : index
    %c0_28 = arith.constant 0 : index
    %39 = vector.load %arg2[%c0_26, %38, %c1_27, %c0_28] : memref<1x18x18x64xbf16, #tpu.memory_space<vmem>>, vector<1x16x16x64xbf16>
    %40 = vector.shape_cast %39 : vector<1x16x16x64xbf16> to vector<16x16x64xbf16>
    %41 = vector.shape_cast %40 : vector<16x16x64xbf16> to vector<256x64xbf16>
    %c4 = arith.constant 4 : index
    %c0_29 = arith.constant 0 : index
    %c0_30 = arith.constant 0 : index
    %42 = vector.load %arg3[%c4, %c0_29, %c0_30] : memref<9x64x64xbf16, #tpu.memory_space<vmem>>, vector<1x64x64xbf16>
    %43 = vector.shape_cast %42 : vector<1x64x64xbf16> to vector<64x64xbf16>
    %cst_31 = arith.constant dense<0.000000e+00> : vector<256x64xf32>
    %44 = tpu.matmul %41, %43, %cst_31 {dimension_numbers = #tpu.dot_dimension_numbers<[1], [0], [0], [1], [0, 0, 1, 1], [], []>} : vector<256x64xbf16>, vector<64x64xbf16>, vector<256x64xf32> -> vector<256x64xf32>
    %45 = arith.addf %36, %44 : vector<256x64xf32>
    %c1_i32_32 = arith.constant 1 : i32
    %46 = arith.addi %1, %c1_i32_32 : i32
    %c0_33 = arith.constant 0 : index
    %47 = arith.index_cast %46 : i32 to index
    %c2_34 = arith.constant 2 : index
    %c0_35 = arith.constant 0 : index
    %48 = vector.load %arg2[%c0_33, %47, %c2_34, %c0_35] : memref<1x18x18x64xbf16, #tpu.memory_space<vmem>>, vector<1x16x16x64xbf16>
    %49 = vector.shape_cast %48 : vector<1x16x16x64xbf16> to vector<16x16x64xbf16>
    %50 = vector.shape_cast %49 : vector<16x16x64xbf16> to vector<256x64xbf16>
    %c5 = arith.constant 5 : index
    %c0_36 = arith.constant 0 : index
    %c0_37 = arith.constant 0 : index
    %51 = vector.load %arg3[%c5, %c0_36, %c0_37] : memref<9x64x64xbf16, #tpu.memory_space<vmem>>, vector<1x64x64xbf16>
    %52 = vector.shape_cast %51 : vector<1x64x64xbf16> to vector<64x64xbf16>
    %cst_38 = arith.constant dense<0.000000e+00> : vector<256x64xf32>
    %53 = tpu.matmul %50, %52, %cst_38 {dimension_numbers = #tpu.dot_dimension_numbers<[1], [0], [0], [1], [0, 0, 1, 1], [], []>} : vector<256x64xbf16>, vector<64x64xbf16>, vector<256x64xf32> -> vector<256x64xf32>
    %54 = arith.addf %45, %53 : vector<256x64xf32>
    %c2_i32 = arith.constant 2 : i32
    %55 = arith.addi %1, %c2_i32 : i32
    %c0_39 = arith.constant 0 : index
    %56 = arith.index_cast %55 : i32 to index
    %c0_40 = arith.constant 0 : index
    %c0_41 = arith.constant 0 : index
    %57 = vector.load %arg2[%c0_39, %56, %c0_40, %c0_41] : memref<1x18x18x64xbf16, #tpu.memory_space<vmem>>, vector<1x16x16x64xbf16>
    %58 = vector.shape_cast %57 : vector<1x16x16x64xbf16> to vector<16x16x64xbf16>
    %59 = vector.shape_cast %58 : vector<16x16x64xbf16> to vector<256x64xbf16>
    %c6 = arith.constant 6 : index
    %c0_42 = arith.constant 0 : index
    %c0_43 = arith.constant 0 : index
    %60 = vector.load %arg3[%c6, %c0_42, %c0_43] : memref<9x64x64xbf16, #tpu.memory_space<vmem>>, vector<1x64x64xbf16>
    %61 = vector.shape_cast %60 : vector<1x64x64xbf16> to vector<64x64xbf16>
    %cst_44 = arith.constant dense<0.000000e+00> : vector<256x64xf32>
    %62 = tpu.matmul %59, %61, %cst_44 {dimension_numbers = #tpu.dot_dimension_numbers<[1], [0], [0], [1], [0, 0, 1, 1], [], []>} : vector<256x64xbf16>, vector<64x64xbf16>, vector<256x64xf32> -> vector<256x64xf32>
    %63 = arith.addf %54, %62 : vector<256x64xf32>
    %c2_i32_45 = arith.constant 2 : i32
    %64 = arith.addi %1, %c2_i32_45 : i32
    %c0_46 = arith.constant 0 : index
    %65 = arith.index_cast %64 : i32 to index
    %c1_47 = arith.constant 1 : index
    %c0_48 = arith.constant 0 : index
    %66 = vector.load %arg2[%c0_46, %65, %c1_47, %c0_48] : memref<1x18x18x64xbf16, #tpu.memory_space<vmem>>, vector<1x16x16x64xbf16>
    %67 = vector.shape_cast %66 : vector<1x16x16x64xbf16> to vector<16x16x64xbf16>
    %68 = vector.shape_cast %67 : vector<16x16x64xbf16> to vector<256x64xbf16>
    %c7 = arith.constant 7 : index
    %c0_49 = arith.constant 0 : index
    %c0_50 = arith.constant 0 : index
    %69 = vector.load %arg3[%c7, %c0_49, %c0_50] : memref<9x64x64xbf16, #tpu.memory_space<vmem>>, vector<1x64x64xbf16>
    %70 = vector.shape_cast %69 : vector<1x64x64xbf16> to vector<64x64xbf16>
    %cst_51 = arith.constant dense<0.000000e+00> : vector<256x64xf32>
    %71 = tpu.matmul %68, %70, %cst_51 {dimension_numbers = #tpu.dot_dimension_numbers<[1], [0], [0], [1], [0, 0, 1, 1], [], []>} : vector<256x64xbf16>, vector<64x64xbf16>, vector<256x64xf32> -> vector<256x64xf32>
    %72 = arith.addf %63, %71 : vector<256x64xf32>
    %c2_i32_52 = arith.constant 2 : i32
    %73 = arith.addi %1, %c2_i32_52 : i32
    %c0_53 = arith.constant 0 : index
    %74 = arith.index_cast %73 : i32 to index
    %c2_54 = arith.constant 2 : index
    %c0_55 = arith.constant 0 : index
    %75 = vector.load %arg2[%c0_53, %74, %c2_54, %c0_55] : memref<1x18x18x64xbf16, #tpu.memory_space<vmem>>, vector<1x16x16x64xbf16>
    %76 = vector.shape_cast %75 : vector<1x16x16x64xbf16> to vector<16x16x64xbf16>
    %77 = vector.shape_cast %76 : vector<16x16x64xbf16> to vector<256x64xbf16>
    %c8 = arith.constant 8 : index
    %c0_56 = arith.constant 0 : index
    %c0_57 = arith.constant 0 : index
    %78 = vector.load %arg3[%c8, %c0_56, %c0_57] : memref<9x64x64xbf16, #tpu.memory_space<vmem>>, vector<1x64x64xbf16>
    %79 = vector.shape_cast %78 : vector<1x64x64xbf16> to vector<64x64xbf16>
    %cst_58 = arith.constant dense<0.000000e+00> : vector<256x64xf32>
    %80 = tpu.matmul %77, %79, %cst_58 {dimension_numbers = #tpu.dot_dimension_numbers<[1], [0], [0], [1], [0, 0, 1, 1], [], []>} : vector<256x64xbf16>, vector<64x64xbf16>, vector<256x64xf32> -> vector<256x64xf32>
    %81 = arith.addf %72, %80 : vector<256x64xf32>
    %c0_59 = arith.constant 0 : index
    %c0_60 = arith.constant 0 : index
    %82 = vector.load %arg4[%c0_59, %c0_60] : memref<1x64xf32, #tpu.memory_space<vmem>>, vector<1x64xf32>
    %83 = vector.broadcast %82 : vector<1x64xf32> to vector<256x64xf32>
    %84 = arith.addf %81, %83 : vector<256x64xf32>
    %cst_61 = arith.constant 0.000000e+00 : f32
    %85 = vector.broadcast %cst_61 : f32 to vector<256x64xf32>
    %86 = arith.maximumf %84, %85 : vector<256x64xf32>
    %87 = arith.truncf %86 : vector<256x64xf32> to vector<256x64xbf16>
    %c0_62 = arith.constant 0 : index
    %c0_63 = arith.constant 0 : index
    %88 = vector.load %arg5[%c0_62, %c0_63] : memref<64x128xbf16, #tpu.memory_space<vmem>>, vector<64x128xbf16>
    %cst_64 = arith.constant dense<0.000000e+00> : vector<256x128xf32>
    %89 = tpu.matmul %87, %88, %cst_64 {dimension_numbers = #tpu.dot_dimension_numbers<[1], [0], [0], [1], [0, 0, 1, 1], [], []>} : vector<256x64xbf16>, vector<64x128xbf16>, vector<256x128xf32> -> vector<256x128xf32>
    %c0_65 = arith.constant 0 : index
    %c0_66 = arith.constant 0 : index
    %90 = vector.load %arg6[%c0_65, %c0_66] : memref<1x128xf32, #tpu.memory_space<vmem>>, vector<1x128xf32>
    %91 = vector.broadcast %90 : vector<1x128xf32> to vector<256x128xf32>
    %92 = arith.addf %89, %91 : vector<256x128xf32>
    %cst_67 = arith.constant 0.000000e+00 : f32
    %93 = vector.broadcast %cst_67 : f32 to vector<256x128xf32>
    %94 = arith.maximumf %92, %93 : vector<256x128xf32>
    %95 = arith.truncf %94 : vector<256x128xf32> to vector<256x128xbf16>
    %c0_68 = arith.constant 0 : index
    %c0_69 = arith.constant 0 : index
    %c0_70 = arith.constant 0 : index
    %96 = vector.load %arg7[%c0_68, %c0_69, %c0_70] : memref<1x256x128xbf16, #tpu.memory_space<vmem>>, vector<1x256x128xbf16>
    %97 = vector.shape_cast %96 : vector<1x256x128xbf16> to vector<256x128xbf16>
    %98 = vector.shape_cast %95 : vector<256x128xbf16> to vector<1x256x128xbf16>
    tpu.vector_store %arg7[%c0_68, %c0_69, %c0_70], %98 {strides = array<i32>} : memref<1x256x128xbf16, #tpu.memory_space<vmem>>, vector<1x256x128xbf16>,
    return
  }
  func.func @transform_0(%arg0: i32, %arg1: i32) -> (i32, i32, i32, i32) {
    %c0_i32 = arith.constant 0 : i32
    %c0_i32_0 = arith.constant 0 : i32
    %c0_i32_1 = arith.constant 0 : i32
    %c0_i32_2 = arith.constant 0 : i32
    return %arg0, %c0_i32, %c0_i32_0, %c0_i32_1 : i32, i32, i32, i32
  }
  func.func @transform_1(%arg0: i32, %arg1: i32) -> (i32, i32, i32) {
    %c0_i32 = arith.constant 0 : i32
    %c0_i32_0 = arith.constant 0 : i32
    %c0_i32_1 = arith.constant 0 : i32
    %c0_i32_2 = arith.constant 0 : i32
    return %c0_i32, %c0_i32_0, %c0_i32_1 : i32, i32, i32
  }
  func.func @transform_2(%arg0: i32, %arg1: i32) -> (i32, i32) {
    %c0_i32 = arith.constant 0 : i32
    %c0_i32_0 = arith.constant 0 : i32
    %c0_i32_1 = arith.constant 0 : i32
    return %c0_i32, %c0_i32_0 : i32, i32
  }
  func.func @transform_3(%arg0: i32, %arg1: i32) -> (i32, i32) {
    %c0_i32 = arith.constant 0 : i32
    %c0_i32_0 = arith.constant 0 : i32
    %c0_i32_1 = arith.constant 0 : i32
    return %c0_i32, %c0_i32_0 : i32, i32
  }
  func.func @transform_4(%arg0: i32, %arg1: i32) -> (i32, i32) {
    %c0_i32 = arith.constant 0 : i32
    %c0_i32_0 = arith.constant 0 : i32
    %c0_i32_1 = arith.constant 0 : i32
    return %c0_i32, %c0_i32_0 : i32, i32
  }
  func.func @transform_5(%arg0: i32, %arg1: i32) -> (i32, i32, i32) {
    %c0_i32 = arith.constant 0 : i32
    %c0_i32_0 = arith.constant 0 : i32
    return %arg0, %arg1, %c0_i32 : i32, i32, i32
  }
}

</mosaic_0001>

<bundles_post_ra>
// kernel: tpu_custom_call.1
= control target key start
LH: loop header
LB: loop body
LE: loop exit
PB: predicated region body
PF: predicated region fallthrough
CT: control target
= control target key end

     0   :  { %10 = vsyncpa [#allocation3], 0  ;;  %s9730_s0 = inlined_call_operand.vmem [shape: bf16[2,18,18,64], index: 0, kind: input, shape index: {}]   ;;  %s9731_s1 = inlined_call_operand.vmem [shape: bf16[9,64,64], index: 1, kind: input, shape index: {}]   ;;  %s9732_s2 = inlined_call_operand.vmem [shape: f32[1,64], index: 2, kind: input, shape index: {}]   ;;  %s9733_s3 = inlined_call_operand.vmem [shape: bf16[64,128], index: 3, kind: input, shape index: {}]   ;;  %s9734_s4 = inlined_call_operand.vmem [shape: f32[1,128], index: 4, kind: input, shape index: {}]   ;;  %s9735_s5 = inlined_call_operand.hbm [shape: bf16[2,256,128], index: 5, kind: output, shape index: {}]  }
   0x1   :  { %12 = vsyncpa [#allocation3 + $0x1], 0  ;;  %s7364_s18 = smov 0   ;;  %s7366_s19 = smov 0  }
   0x2   :  { %s7368_s20 = smov 0   ;;  %s7370_s21 = smov 0  }
   0x3   :  { %s7372_s22 = smov 0   ;;  %s7374_s23 = smov 0  }
   0x4 LB: > { %s5685_s24 = sadd.s32 4294967295, %s7329_s23   ;;  %s5686_s25 = sadd.s32 4294967294, %s7329_s23   ;;  %s7329_s23 = sphi %s7374_s23, %s18_s23   ;;  %s7325_s22 = sphi %s7372_s22, %s9866_s22   ;;  %s7321_s21 = sphi %s7370_s21, %s9865_s21   ;;  %s7317_s20 = sphi %s7368_s20, %s9864_s20   ;;  %s7313_s19 = sphi %s7366_s19, %s9863_s19   ;;  %s7309_s18 = sphi %s7364_s18, %s9862_s18  }
   0x5   : > { %s30_s26 = sadd.s32 1, %s7325_s22  ;;  %s149_s27 = sadd.s32 1, %s7317_s20 }
   0x6   : > { %p32_p0 = scmp.ge.s32.totalorder %s30_s26, 2  ;;  %p159_p1 = scmp.ne.s32.totalorder %s7317_s20, %s7313_s19 }
   0x7   : > { %p160_p2 = scmp.eq.s32.totalorder %s5685_s24, 1  ;;  %p165_p3 = scmp.ne.s32.totalorder %s7313_s19, %s7309_s18 }
   0x8   : > { %s9868_s26 = smov (%p32_p0, %s30_s26), 0  ;;  %p166_p5 = scmp.eq.s32.totalorder %s5686_s25, 1 }
   0x9   : > { %p7404_p4 = por %p160_p2, %p159_p1  ;;  %s144_s29 = ssub.s32 %s7325_s22, %s9868_s26 }
   0xa   : > { %p5689_p6 = scmp.ge.s32.totalorder %s7329_s23, 1  ;;  %p147_p7 = scmp.eq.s32.totalorder %s144_s29, 0 }
   0xb   : > { %p7411_p8 = por %p166_p5, %p165_p3  ;;  %p204_p9 = scmp.lt.s32.totalorder %s7329_s23, 3 }
   0xc   : > { %s7417_s6 = scalar_select %p147_p7, %s7317_s20, %s149_s27  }
   0xd   : > { %p205_p10 = pnand %p5689_p6, %p204_p9 }
   0xf   : > { %208 = sbr.rel (%p205_p10) target bundleno = 789 (0x315), region = 40 }
  0x14   : > { %v7165_v0 = vld [vmem:[%s9731_s1 + $0x38] sm:$0xff]   ;;  %p232_p11 = scmp.lt.s32.totalorder %s7321_s21, 1  ;;  %v7167_v2 = vld [vmem:[%s9731_s1 + $0x30] sm:$0xff]   ;;  %v7169_v4 = vld [vmem:[%s9731_s1 + $0x28] sm:$0xff]   ;;  %vm299_vm0 = vsmask.f32 3328 }
  0x15   : > { %v7166_v1 = vld [vmem:[%s9731_s1 + $0x18] sm:$0xff]   ;;  %6707 = vmatprep.subr.bf16.mxu0 %v7165_v0  ;;  %v7168_v3 = vld [vmem:[%s9731_s1 + $0x10] sm:$0xff]   ;;  %v7170_v5 = vld [vmem:[%s9731_s1 + $0x8] sm:$0xff]   ;;  %vm300_vm1 = vsmask.f32 7440  ;;  %vm767_vm2 = vcmask 523264  }
  0x16   : > { %s233_s13 = scalar_select %p232_p11, %s7321_s21, 1  ;;  %6708 = vmatpush3.bf16.msra.mxu0 %v7165_v0  ;;  %6747 = vmatprep.subr.bf16.mxu1 %v7166_v1  ;;  %v7171_v6 = vld [vmem:[%s9731_s1 + $0x20] sm:$0xff]   ;;  %v7465_v23 = vld [vmem:[%s9731_s1 + $0x58] sm:$0xff]   ;;  %vm7477_vm3 = vmor %vm299_vm0, %vm300_vm1  ;;  %vm1338_vm4 = vcmask 1042432   ;;  %vm1339_vm5 = vcmask 1046532  }
  0x17   : > { %6748 = vmatpush3.bf16.msra.mxu1 %v7166_v1  ;;  %6709 = vmatprep.subr.bf16.mxu0 %v7167_v2  ;;  %v7172_v7 = vld [vmem:[%s9731_s1] sm:$0xff]   ;;  %v7191_v50 = vld [vmem:[%s9731_s1 + $0x78] sm:$0xff]   ;;  %v7192_v61 = vld [vmem:[%s9731_s1 + $0x70] sm:$0xff]   ;;  %s229_s9 = sand.u32 1, %s7313_s19  }
  0x18   : > { %s7107_s24 = smul.u32 216, %s233_s13  ;;  %6749 = vmatprep.subr.bf16.mxu1 %v7168_v3  ;;  %vm7768_vm6 = vmor %vm1338_vm4, %vm1339_vm5  ;;  %s5690_s11 = sshll.u32 %s229_s9, 7 }
  0x19   : > { %s9628_s12 = scalar_lea.vmem [#allocation2], %s5690_s11  ;;  %s6411_s13 = sshll.u32 %s7321_s21, 11 }
  0x1a   : > { %s7445_s10 = scalar_lea.vmem %s9730_s0, %s7107_s24  ;;  %6710 = vmatpush3.bf16.msra.mxu0 %v7167_v2  ;;  %s5602_s14 = sshll.u32 %s9628_s12, 4  ;;  %s9679_s14 = int_to_ptr.vmem [resolvable:$true] %s5602_s14 }
  0x1b   : > { %6750 = vmatpush3.bf16.msra.mxu1 %v7168_v3  ;;  %6711 = vmatprep.subr.bf16.mxu0 %v7169_v4  ;;  %v243_v8 = vld [vmem:[%s7445_s10] sm:$0xf]  ;;  %v7452_v9 = vld [vmem:[%s7445_s10 + $0x4] sm:$0xf]  ;;  %v7455_v10 = vld [vmem:[%s7445_s10 + $0x8] sm:$0x1] }
  0x1c   : > { %6751 = vmatprep.subr.bf16.mxu1 %v7170_v5  ;;  %v303_v11 = vshrl.u32 %v243_v8, 16  ;;  %v306_v12 = vshll.u32 %v243_v8, 16  ;;  %v312_v13 = vshll.u32 %v7452_v9, 16  ;;  %v316_v14 = vshrl.u32 %v7452_v9, 16  ;;  %v245_v24 = vld [vmem:[%s7445_s10 + $0xc] sm:$0xf] }
  0x1d   : > { %v322_v15 = vshll.u32 %v7455_v10, 16  ;;  %v1346_v18 = vrot.slane %v7455_v10, 5  ;;  %v5736_v19 = vcombine.low %v243_v8, %v7452_v9  ;;  %v7470_v26 = vld [vmem:[%s7445_s10 + $0x10] sm:$0xf]  ;;  %v7473_v27 = vld [vmem:[%s7445_s10 + $0x14] sm:$0x1] }
  0x1e   : > { %6712 = vmatpush3.bf16.msra.mxu0 %v7169_v4  ;;  %v305_v16 = vrot.slane %v303_v11, 4  ;;  %v308_v17 = vrot.slane %v306_v12, 5  ;;  %v314_v20 = vrot.slane %v312_v13, 5  ;;  %v318_v21 = vrot.slane %v316_v14, 4  ;;  %v247_v39 = vld [vmem:[%s7445_s10 + $0x18] sm:$0xf] }
  0x1f   : > { %6752 = vmatpush3.bf16.msra.mxu1 %v7170_v5  ;;  %6713 = vmatprep.subr.bf16.mxu0 %v7171_v6  ;;  %v324_v22 = vrot.slane %v322_v15, 5  ;;  %v327_v28 = vshrl.u32 %v245_v24, 16  ;;  %v330_v29 = vshll.u32 %v245_v24, 16  ;;  %v336_v32 = vshll.u32 %v7470_v26, 16  ;;  %v7488_v44 = vld [vmem:[%s7445_s10 + $0x1c] sm:$0xf] }
  0x20   : > { %6753 = vmatprep.subr.bf16.mxu1 %v7172_v7  ;;  %v309_v25 = vor.u32 %v308_v17, %v305_v16  ;;  %6755 = vmatprep.mubr.msk.bf16.mxu1 %vm767_vm2, %v5736_v19  ;;  %v319_v31 = vor.u32 %v318_v21, %v314_v20  ;;  %v340_v33 = vshrl.u32 %v7470_v26, 16  ;;  %v346_v34 = vshll.u32 %v7473_v27, 16  ;;  %v7495_v49 = vld [vmem:[%s7445_s10 + $0x20] sm:$0x1]  ;;  %v249_v55 = vld [vmem:[%s7445_s10 + $0x24] sm:$0xf] }
  0x21   : > { %v329_v36 = vrot.slane %v327_v28, 4  ;;  %v332_v37 = vrot.slane %v330_v29, 5  ;;  %v1350_v38 = vrot.slane %v7470_v26, 5  ;;  %v338_v41 = vrot.slane %v336_v32, 5  ;;  %v7507_v60 = vld [vmem:[%s7445_s10 + $0x28] sm:$0xf] }
  0x22   : > { %6714 = vmatpush3.bf16.msra.mxu0 %v7171_v6  ;;  %v310_v35 = vrot.slane %v309_v25, 4  ;;  %v320_v40 = vrot.slane %v319_v31, 4  ;;  %v342_v42 = vrot.slane %v340_v33, 4  ;;  %v348_v43 = vrot.slane %v346_v34, 5  ;;  %v7514_v2 = vld [vmem:[%s7445_s10 + $0x2c] sm:$0x1] }
  0x23   : > { %6754 = vmatpush3.bf16.msra.mxu1 %v7172_v7  ;;  %6787 = vmatprep.subr.bf16.mxu0 %v7465_v23  ;;  %v333_v46 = vor.u32 %v332_v37, %v329_v36  ;;  %v1353_v47 = vrot.slane %v7473_v27, 5  ;;  %v5737_v48 = vcombine.low %v245_v24, %v7470_v26  ;;  %v351_v53 = vshrl.u32 %v247_v39, 16  ;;  %v251_v17 = vld [vmem:[%s7445_s10 + $0x30] sm:$0xf]  ;;  %v7531_v25 = vld [vmem:[%s7445_s10 + $0x34] sm:$0xf] }
  0x24   : > { %v315_v45 = vsel %vm7477_vm3, %v310_v35, %v314_v20  ;;  %v325_v51 = vsel %vm7477_vm3, %v320_v40, %v324_v22  ;;  %v343_v52 = vor.u32 %v342_v42, %v338_v41  ;;  %v354_v54 = vshll.u32 %v247_v39, 16  ;;  %6827 = vmatprep.subr.bf16.mxu1 %v7191_v50  ;;  %v7179_v19 = vld [vmem:[%s9731_s1 + $0x50] sm:$0xff]   ;;  %v7195_v33 = vld [vmem:[%s9731_s1 + $0x68] sm:$0xff]   ;;  %v7542_v37 = vld [vmem:[%s7445_s10 + $0x38] sm:$0x1]  ;;  %s9685_s17 = scalar_lea.sflag [#allocation3], %s229_s9 }
  0x25   : > { %v5700_v56 = vcombine.low %v315_v45, %v325_v51  ;;  %v334_v57 = vrot.slane %v333_v46, 4  ;;  %v360_v58 = vshll.u32 %v7488_v44, 16  ;;  %v364_v59 = vshrl.u32 %v7488_v44, 16  ;;  %v7184_v45 = vld [vmem:[%s9731_s1 + $0x48] sm:$0xff]   ;;  %v7196_v46 = vld [vmem:[%s9731_s1 + $0x60] sm:$0xff]   ;;  %v7216_v10 = vld [vmem:[%s9731_s1 + $0xb0] sm:$0xff]  }
  0x26   : > { %6756 = vmatmul.mubr.msk.bf16.vlgmr.msra.gmra.mxu1 %vm767_vm2, %v5737_v48  ;;  %v344_v62 = vrot.slane %v343_v52, 4  ;;  %v353_v63 = vrot.slane %v351_v53, 4  ;;  %v356_v0 = vrot.slane %v354_v54, 5  ;;  %v370_v1 = vshll.u32 %v7495_v49, 16  ;;  %s7253_s21 = scalar_lea.vmem %s9679_s14, 2048  ;;  %s7331_s24 = smov [#allocation2]  }
  0x27   : > { %6828 = vmatpush3.bf16.msra.mxu1 %v7191_v50  ;;  %6715 = vmatprep.mubr.msk.bf16.mxu0 %vm767_vm2, %v5700_v56  ;;  %v339_v3 = vsel %vm7477_vm3, %v334_v57, %v338_v41  ;;  %v362_v4 = vrot.slane %v360_v58, 5  ;;  %v366_v5 = vrot.slane %v364_v59, 4  ;;  %v5738_v6 = vcombine.low %v247_v39, %v7488_v44  ;;  %v7558_v57 = vld [vmem:[%s7445_s10 + $0x40] sm:$0xf]  ;;  %p7254_p12 = scmp.ne.s32.totalorder %s9679_s14, %s7253_s21  ;;  %s7257_s25 = sshll.u32 %s7331_s24, 4  ;;  %s7258_s25 = int_to_ptr.vmem [resolvable:$false] %s7257_s25 }
  0x28   : > { %6829 = vmatprep.subr.bf16.mxu1 %v7192_v61  ;;  %v349_v7 = vsel %vm7477_vm3, %v344_v62, %v348_v43  ;;  %v357_v8 = vor.u32 %v356_v0, %v353_v63  ;;  %v372_v11 = vrot.slane %v370_v1, 5  ;;  %v375_v12 = vshrl.u32 %v249_v55, 16  ;;  %v7189_v63 = vld [vmem:[%s9731_s1 + $0x40] sm:$0xff]   ;;  %s7259_s27 = scalar_lea.vmem %s7258_s25, 4096  ;;  %p7260_p1 = scmp.lt.s32.totalorder %s9679_s14, %s7258_s25 }
  0x29   : > { %v5701_v13 = vcombine.low %v339_v3, %v349_v7  ;;  %v367_v14 = vor.u32 %v366_v5, %v362_v4  ;;  %6759 = vmatprep.mubr.msk.bf16.mxu1 %vm767_vm2, %v5738_v6  ;;  %v378_v15 = vshll.u32 %v249_v55, 16  ;;  %v384_v16 = vshll.u32 %v7507_v60, 16  ;;  %p7255_p13 = pnand %p7254_p12, %p7404_p4  ;;  %p7261_p2 = scmp.lt.s32.totalorder %s7259_s27, %s7253_s21 }
  0x2a   : > { %v358_v20 = vrot.slane %v357_v8, 4  ;;  %v377_v21 = vrot.slane %v375_v12, 4  ;;  %v388_v22 = vshrl.u32 %v7507_v60, 16  ;;  %v394_v24 = vshll.u32 %v7514_v2, 16  ;;  %v255_v12 = vld [vmem:[%s7445_s10 + $0x48] sm:$0xf] }
  0x2b   : > { %6830 = vmatpush3.bf16.msra.mxu1 %v7192_v61  ;;  %6716 = vmatmul.mubr.msk.bf16.vlgmr.msra.gmra.mxu0 %vm767_vm2, %v5701_v13  ;;  %v368_v28 = vrot.slane %v367_v14, 4  ;;  %v380_v29 = vrot.slane %v378_v15, 5  ;;  %v386_v31 = vrot.slane %v384_v16, 5  ;;  %v5739_v32 = vcombine.low %v249_v55, %v7507_v60  ;;  %p7256_p0 = pneg %p7255_p13  ;;  %p7262_p3 = por %p7261_p2, %p7260_p1 }
  0x2c   : > { %6788 = vmatpush3.bf16.msra.mxu0 %v7465_v23  ;;  %v363_v34 = vsel %vm7477_vm3, %v358_v20, %v362_v4  ;;  %v390_v35 = vrot.slane %v388_v22, 4  ;;  %v396_v36 = vrot.slane %v394_v24, 5  ;;  %v399_v39 = vshrl.u32 %v251_v17, 16  ;;  %v253_v23 = vld [vmem:[%s7445_s10 + $0x3c] sm:$0xf]  ;;  %6831 = vmatprep.subr.bf16.mxu1 %v7195_v33 }
  0x2d   : > { %v373_v40 = vsel %vm7477_vm3, %v368_v28, %v372_v11  ;;  %v381_v41 = vor.u32 %v380_v29, %v377_v21  ;;  %v402_v42 = vshll.u32 %v251_v17, 16  ;;  %v408_v43 = vshll.u32 %v7531_v25, 16  ;;  %6789 = vmatprep.subr.bf16.mxu0 %v7179_v19  ;;  %v7568_v4 = vld [vmem:[%s7445_s10 + $0x44] sm:$0x1]  ;;  %p7263_p5 = pnand %p7262_p3, %p7256_p0 }
  0x2e   : > { %6760 = vmatmul.mubr.msk.bf16.gmra.mxu1 %vm767_vm2, %v5739_v32  ;;  %v5702_v48 = vcombine.low %v363_v34, %v373_v40  ;;  %v391_v50 = vor.u32 %v390_v35, %v386_v31  ;;  %v401_v51 = vrot.slane %v399_v39, 4  ;;  %v412_v52 = vshrl.u32 %v7531_v25, 16  ;;  %v257_v40 = vld [vmem:[%s7445_s10 + $0x54] sm:$0xf] }
  0x2f   : > { %v382_v53 = vrot.slane %v381_v41, 4  ;;  %v404_v54 = vrot.slane %v402_v42, 5  ;;  %v410_v55 = vrot.slane %v408_v43, 5  ;;  %v418_v56 = vshll.u32 %v7542_v37, 16  ;;  %6832 = vmatpush3.bf16.msra.mxu1 %v7195_v33  ;;  %v7590_v33 = vld [vmem:[%s9731_s1 + $0x98] sm:$0xff]  }
  0x30   : > { %6719 = vmatprep.mubr.msk.bf16.mxu0 %vm767_vm2, %v5702_v48  ;;  %v392_v58 = vrot.slane %v391_v50, 4  ;;  %v414_v59 = vrot.slane %v412_v52, 4  ;;  %v5740_v61 = vcombine.low %v251_v17, %v7531_v25  ;;  %v423_v62 = vshrl.u32 %v253_v23, 16  ;;  %6790 = vmatpush3.bf16.msra.mxu0 %v7179_v19  ;;  %v7577_v17 = vld [vmem:[%s7445_s10 + $0x4c] sm:$0xf] }
  0x31   : > { %v387_v0 = vsel %vm7477_vm3, %v382_v53, %v386_v31  ;;  %v405_v1 = vor.u32 %v404_v54, %v401_v51  ;;  %v420_v3 = vrot.slane %v418_v56, 5  ;;  %v426_v5 = vshll.u32 %v253_v23, 16  ;;  %6791 = vmatprep.subr.bf16.mxu0 %v7184_v45  ;;  %6833 = vmatprep.subr.bf16.mxu1 %v7196_v46  ;;  %v7585_v31 = vld [vmem:[%s7445_s10 + $0x50] sm:$0x1]  ;;  %v7600_v51 = vld [vmem:[%s7445_s10 + $0x58] sm:$0xf] }
  0x32   : > { %v397_v6 = vsel %vm7477_vm3, %v392_v58, %v396_v36  ;;  %v415_v7 = vor.u32 %v414_v59, %v410_v55  ;;  %6763 = vmatprep.mubr.msk.bf16.mxu1 %vm767_vm2, %v5740_v61  ;;  %v425_v8 = vrot.slane %v423_v62, 4  ;;  %v432_v11 = vshll.u32 %v7558_v57, 16 }
  0x33   : > { %v5703_v13 = vcombine.low %v387_v0, %v397_v6  ;;  %v406_v14 = vrot.slane %v405_v1, 4  ;;  %v428_v15 = vrot.slane %v426_v5, 5  ;;  %v436_v16 = vshrl.u32 %v7558_v57, 16  ;;  %6834 = vmatpush3.bf16.msra.mxu1 %v7196_v46  ;;  %v259_v5 = vld [vmem:[%s7445_s10 + $0x60] sm:$0xf] }
  0x34   : > { %v416_v19 = vrot.slane %v415_v7, 4  ;;  %v434_v20 = vrot.slane %v432_v11, 5  ;;  %v442_v21 = vshll.u32 %v7568_v4, 16  ;;  %v5741_v22 = vcombine.low %v253_v23, %v7558_v57  ;;  %6792 = vmatpush3.bf16.msra.mxu0 %v7184_v45 }
  0x35   : > { %6720 = vmatmul.mubr.msk.bf16.gmra.mxu0 %vm767_vm2, %v5703_v13  ;;  %v411_v24 = vsel %vm7477_vm3, %v406_v14, %v410_v55  ;;  %v429_v28 = vor.u32 %v428_v15, %v425_v8  ;;  %v438_v29 = vrot.slane %v436_v16, 4  ;;  %v447_v32 = vshrl.u32 %v255_v12, 16  ;;  %6793 = vmatprep.subr.bf16.mxu0 %v7189_v63  ;;  %v7607_v55 = vld [vmem:[%s7445_s10 + $0x5c] sm:$0x1] }
  0x36   : > { %v421_v34 = vsel %vm7477_vm3, %v416_v19, %v420_v3  ;;  %v444_v35 = vrot.slane %v442_v21, 5  ;;  %6764 = vmatmul.mubr.msk.bf16.gmra.mxu1 %vm767_vm2, %v5741_v22  ;;  %v450_v36 = vshll.u32 %v255_v12, 16  ;;  %v456_v39 = vshll.u32 %v7577_v17, 16  ;;  %v7622_v19 = vld [vmem:[%s7445_s10 + $0x68] sm:$0x1] }
  0x37   : > { %v5704_v41 = vcombine.low %v411_v24, %v421_v34  ;;  %v430_v42 = vrot.slane %v429_v28, 4  ;;  %v439_v43 = vor.u32 %v438_v29, %v434_v20  ;;  %v449_v23 = vrot.slane %v447_v32, 4 }
  0x38   : > { %v452_v45 = vrot.slane %v450_v36, 5  ;;  %v458_v46 = vrot.slane %v456_v39, 5  ;;  %v460_v48 = vshrl.u32 %v7577_v17, 16  ;;  %v466_v50 = vshll.u32 %v7585_v31, 16  ;;  %6794 = vmatpush3.bf16.msra.mxu0 %v7189_v63 }
  0x39   : > { %6723 = vmatprep.mubr.msk.bf16.mxu0 %vm767_vm2, %v5704_v41  ;;  %v435_v52 = vsel %vm7477_vm3, %v430_v42, %v434_v20  ;;  %v440_v53 = vrot.slane %v439_v43, 4  ;;  %v5742_v54 = vcombine.low %v255_v12, %v7577_v17  ;;  %v471_v56 = vshrl.u32 %v257_v40, 16  ;;  %6867 = vmatprep.subr.bf16.mxu0 %v7590_v33  ;;  %v7617_v12 = vld [vmem:[%s7445_s10 + $0x64] sm:$0xf]  ;;  %v261_v41 = vld [vmem:[%s7445_s10 + $0x6c] sm:$0xf] }
  0x3a   : > { %v453_v58 = vor.u32 %v452_v45, %v449_v23  ;;  %v462_v59 = vrot.slane %v460_v48, 4  ;;  %v468_v61 = vrot.slane %v466_v50, 5  ;;  %v474_v62 = vshll.u32 %v257_v40, 16 }
  0x3b   : > { %v445_v63 = vsel %vm7477_vm3, %v440_v53, %v444_v35  ;;  %6767 = vmatprep.mubr.msk.bf16.mxu1 %vm767_vm2, %v5742_v54  ;;  %v473_v0 = vrot.slane %v471_v56, 4  ;;  %v480_v1 = vshll.u32 %v7600_v51, 16  ;;  %v484_v3 = vshrl.u32 %v7600_v51, 16  ;;  %v7641_v54 = vld [vmem:[%s7445_s10 + $0x74] sm:$0x1] }
  0x3c   : > { %v5705_v6 = vcombine.low %v435_v52, %v445_v63  ;;  %v454_v7 = vrot.slane %v453_v58, 4  ;;  %v463_v8 = vor.u32 %v462_v59, %v458_v46  ;;  %v476_v11 = vrot.slane %v474_v62, 5  ;;  %v263_v62 = vld [vmem:[%s7445_s10 + $0x78] sm:$0xf]  ;;  %v7648_v63 = vld [vmem:[%s7445_s10 + $0x7c] sm:$0xf] }
  0x3d   : > { %v482_v13 = vrot.slane %v480_v1, 5  ;;  %v486_v14 = vrot.slane %v484_v3, 4  ;;  %v490_v15 = vshll.u32 %v7607_v55, 16  ;;  %v5743_v16 = vcombine.low %v257_v40, %v7600_v51 }
  0x3e   : > { %6724 = vmatmul.mubr.msk.bf16.gmra.mxu0 %vm767_vm2, %v5705_v6  ;;  %v459_v20 = vsel %vm7477_vm3, %v454_v7, %v458_v46  ;;  %v464_v21 = vrot.slane %v463_v8, 4  ;;  %v477_v22 = vor.u32 %v476_v11, %v473_v0  ;;  %v495_v24 = vshrl.u32 %v259_v5, 16  ;;  %v7634_v46 = vld [vmem:[%s7445_s10 + $0x70] sm:$0xf] }
  0x3f   : > { %v487_v28 = vor.u32 %v486_v14, %v482_v13  ;;  %v492_v29 = vrot.slane %v490_v15, 5  ;;  %6768 = vmatmul.mubr.msk.bf16.gmra.mxu1 %vm767_vm2, %v5743_v16  ;;  %v498_v32 = vshll.u32 %v259_v5, 16  ;;  %v504_v34 = vshll.u32 %v7617_v12, 16 }
  0x40   : > { %v469_v35 = vsel %vm7477_vm3, %v464_v21, %v468_v61  ;;  %v478_v36 = vrot.slane %v477_v22, 4  ;;  %v497_v39 = vrot.slane %v495_v24, 4  ;;  %v508_v40 = vshrl.u32 %v7617_v12, 16 }
  0x41   : > { %v5706_v42 = vcombine.low %v459_v20, %v469_v35  ;;  %v488_v43 = vrot.slane %v487_v28, 4  ;;  %v500_v23 = vrot.slane %v498_v32, 5  ;;  %v506_v45 = vrot.slane %v504_v34, 5 }
  0x42   : > { %v483_v48 = vsel %vm7477_vm3, %v478_v36, %v482_v13  ;;  %v510_v50 = vrot.slane %v508_v40, 4  ;;  %v514_v52 = vshll.u32 %v7622_v19, 16  ;;  %v5744_v53 = vcombine.low %v259_v5, %v7617_v12  ;;  %v7654_v13 = vld [vmem:[%s7445_s10 + $0x80] sm:$0x1] }
  0x43   : > { %6727 = vmatprep.mubr.msk.bf16.mxu0 %vm767_vm2, %v5706_v42  ;;  %v493_v56 = vsel %vm7477_vm3, %v488_v43, %v492_v29  ;;  %v501_v58 = vor.u32 %v500_v23, %v497_v39  ;;  %v519_v59 = vshrl.u32 %v261_v41, 16  ;;  %v522_v61 = vshll.u32 %v261_v41, 16  ;;  %v265_v29 = vld [vmem:[%s7445_s10 + $0x84] sm:$0xf]  ;;  %v7667_v43 = vld [vmem:[%s7445_s10 + $0x88] sm:$0xf] }
  0x44   : > { %v5707_v0 = vcombine.low %v483_v48, %v493_v56  ;;  %v511_v1 = vor.u32 %v510_v50, %v506_v45  ;;  %v516_v3 = vrot.slane %v514_v52, 5  ;;  %6771 = vmatprep.mubr.msk.bf16.mxu1 %vm767_vm2, %v5744_v53  ;;  %v528_v5 = vshll.u32 %v7634_v46, 16  ;;  %v7672_v52 = vld [vmem:[%s7445_s10 + $0x8c] sm:$0x1] }
  0x45   : > { %v502_v6 = vrot.slane %v501_v58, 4  ;;  %v521_v7 = vrot.slane %v519_v59, 4  ;;  %v524_v8 = vrot.slane %v522_v61, 5  ;;  %v532_v11 = vshrl.u32 %v7634_v46, 16 }
  0x46   : > { %6728 = vmatmul.mubr.msk.bf16.gmra.mxu0 %vm767_vm2, %v5707_v0  ;;  %v512_v14 = vrot.slane %v511_v1, 4  ;;  %v530_v15 = vrot.slane %v528_v5, 5  ;;  %v538_v16 = vshll.u32 %v7641_v54, 16  ;;  %v5745_v20 = vcombine.low %v261_v41, %v7634_v46  ;;  %v267_v5 = vld [vmem:[%s7445_s10 + $0x90] sm:$0xf] }
  0x47   : > { %v507_v21 = vsel %vm7477_vm3, %v502_v6, %v506_v45  ;;  %v525_v22 = vor.u32 %v524_v8, %v521_v7  ;;  %v534_v24 = vrot.slane %v532_v11, 4  ;;  %v543_v28 = vshrl.u32 %v263_v62, 16 }
  0x48   : > { %v517_v32 = vsel %vm7477_vm3, %v512_v14, %v516_v3  ;;  %v540_v34 = vrot.slane %v538_v16, 5  ;;  %6772 = vmatmul.mubr.msk.bf16.gmra.mxu1 %vm767_vm2, %v5745_v20  ;;  %v546_v35 = vshll.u32 %v263_v62, 16  ;;  %v552_v36 = vshll.u32 %v7648_v63, 16  ;;  %v7685_v14 = vld [vmem:[%s7445_s10 + $0x94] sm:$0xf] }
  0x49   : > { %v5708_v39 = vcombine.low %v507_v21, %v517_v32  ;;  %v526_v40 = vrot.slane %v525_v22, 4  ;;  %v535_v41 = vor.u32 %v534_v24, %v530_v15  ;;  %v545_v42 = vrot.slane %v543_v28, 4  ;;  %v7690_v32 = vld [vmem:[%s7445_s10 + $0x98] sm:$0x1] }
  0x4a   : > { %v548_v23 = vrot.slane %v546_v35, 5  ;;  %v554_v45 = vrot.slane %v552_v36, 5  ;;  %v556_v48 = vshrl.u32 %v7648_v63, 16  ;;  %v562_v50 = vshll.u32 %v7654_v13, 16 }
  0x4b   : > { %6731 = vmatprep.mubr.msk.bf16.mxu0 %vm767_vm2, %v5708_v39  ;;  %v531_v53 = vsel %vm7477_vm3, %v526_v40, %v530_v15  ;;  %v536_v56 = vrot.slane %v535_v41, 4  ;;  %v5746_v58 = vcombine.low %v263_v62, %v7648_v63  ;;  %v567_v59 = vshrl.u32 %v265_v29, 16  ;;  %v269_v40 = vld [vmem:[%s7445_s10 + $0x9c] sm:$0xf] }
  0x4c   : > { %v549_v61 = vor.u32 %v548_v23, %v545_v42  ;;  %v558_v0 = vrot.slane %v556_v48, 4  ;;  %v564_v1 = vrot.slane %v562_v50, 5  ;;  %v570_v3 = vshll.u32 %v265_v29, 16 }
  0x4d   : > { %v541_v6 = vsel %vm7477_vm3, %v536_v56, %v540_v34  ;;  %6775 = vmatprep.mubr.msk.bf16.mxu1 %vm767_vm2, %v5746_v58  ;;  %v569_v7 = vrot.slane %v567_v59, 4  ;;  %v576_v8 = vshll.u32 %v7667_v43, 16  ;;  %v580_v11 = vshrl.u32 %v7667_v43, 16 }
  0x4e   : > { %v5709_v62 = vcombine.low %v531_v53, %v541_v6  ;;  %v550_v15 = vrot.slane %v549_v61, 4  ;;  %v559_v16 = vor.u32 %v558_v0, %v554_v45  ;;  %v572_v20 = vrot.slane %v570_v3, 5  ;;  %v7705_v3 = vld [vmem:[%s7445_s10 + $0xa4] sm:$0x1] }
  0x4f   : > { %v578_v21 = vrot.slane %v576_v8, 5  ;;  %v582_v22 = vrot.slane %v580_v11, 4  ;;  %v586_v24 = vshll.u32 %v7672_v52, 16  ;;  %v5747_v28 = vcombine.low %v265_v29, %v7667_v43  ;;  %v7699_v29 = vld [vmem:[%s7445_s10 + $0xa0] sm:$0xf] }
  0x50   : > { %6732 = vmatmul.mubr.msk.bf16.gmra.mxu0 %vm767_vm2, %v5709_v62  ;;  %v555_v34 = vsel %vm7477_vm3, %v550_v15, %v554_v45  ;;  %v560_v35 = vrot.slane %v559_v16, 4  ;;  %v573_v36 = vor.u32 %v572_v20, %v569_v7  ;;  %v591_v39 = vshrl.u32 %v267_v5, 16 }
  0x51   : > { %v583_v41 = vor.u32 %v582_v22, %v578_v21  ;;  %v588_v42 = vrot.slane %v586_v24, 5  ;;  %6776 = vmatmul.mubr.msk.bf16.gmra.mxu1 %vm767_vm2, %v5747_v28  ;;  %v594_v23 = vshll.u32 %v267_v5, 16  ;;  %v600_v48 = vshll.u32 %v7685_v14, 16  ;;  %v271_v28 = vld [vmem:[%s7445_s10 + $0xa8] sm:$0xf] }
  0x52   : > { %v565_v50 = vsel %vm7477_vm3, %v560_v35, %v564_v1  ;;  %v574_v53 = vrot.slane %v573_v36, 4  ;;  %v593_v56 = vrot.slane %v591_v39, 4  ;;  %v604_v45 = vshrl.u32 %v7685_v14, 16 }
  0x53   : > { %v5710_v58 = vcombine.low %v555_v34, %v565_v50  ;;  %v584_v59 = vrot.slane %v583_v41, 4  ;;  %v596_v61 = vrot.slane %v594_v23, 5  ;;  %v602_v0 = vrot.slane %v600_v48, 5  ;;  %v7718_v34 = vld [vmem:[%s7445_s10 + $0xac] sm:$0xf] }
  0x54   : > { %v579_v6 = vsel %vm7477_vm3, %v574_v53, %v578_v21  ;;  %v606_v7 = vrot.slane %v604_v45, 4  ;;  %v610_v8 = vshll.u32 %v7690_v32, 16  ;;  %v5748_v1 = vcombine.low %v267_v5, %v7685_v14  ;;  %v7722_v41 = vld [vmem:[%s7445_s10 + $0xb0] sm:$0x1]  ;;  %v273_v53 = vld [vmem:[%s7445_s10 + $0xb4] sm:$0xf] }
  0x55   : > { %6735 = vmatprep.mubr.msk.bf16.mxu0 %vm767_vm2, %v5710_v58  ;;  %v589_v11 = vsel %vm7477_vm3, %v584_v59, %v588_v42  ;;  %v597_v62 = vor.u32 %v596_v61, %v593_v56  ;;  %v615_v15 = vshrl.u32 %v269_v40, 16  ;;  %v618_v16 = vshll.u32 %v269_v40, 16  ;;  %v7731_v56 = vld [vmem:[%s9731_s1 + $0xb8] sm:$0xff]  }
  0x56   : > { %v5711_v20 = vcombine.low %v579_v6, %v589_v11  ;;  %v607_v22 = vor.u32 %v606_v7, %v602_v0  ;;  %v612_v24 = vrot.slane %v610_v8, 5  ;;  %6779 = vmatprep.mubr.msk.bf16.mxu1 %vm767_vm2, %v5748_v1  ;;  %v624_v21 = vshll.u32 %v7699_v29, 16  ;;  %v7740_v1 = vld [vmem:[%s7445_s10 + $0xb8] sm:$0xf]  ;;  %6907 = vmatprep.subr.bf16.mxu1 %v7731_v56 }
  0x57   : > { %v598_v5 = vrot.slane %v597_v62, 4  ;;  %v617_v35 = vrot.slane %v615_v15, 4  ;;  %v620_v36 = vrot.slane %v618_v16, 5  ;;  %v628_v39 = vshrl.u32 %v7699_v29, 16 }
  0x58   : > { %6736 = vmatmul.mubr.msk.bf16.gmra.mxu0 %vm767_vm2, %v5711_v20  ;;  %v608_v42 = vrot.slane %v607_v22, 4  ;;  %v626_v23 = vrot.slane %v624_v21, 5  ;;  %v634_v48 = vshll.u32 %v7705_v3, 16  ;;  %v5749_v50 = vcombine.low %v269_v40, %v7699_v29  ;;  %v7746_v21 = vld [vmem:[%s7445_s10 + $0xbc] sm:$0x1] }
  0x59   : > { %v603_v45 = vsel %vm7477_vm3, %v598_v5, %v602_v0  ;;  %v621_v58 = vor.u32 %v620_v36, %v617_v35  ;;  %v630_v59 = vrot.slane %v628_v39, 4  ;;  %v639_v61 = vshrl.u32 %v271_v28, 16 }
  0x5a   : > { %v613_v6 = vsel %vm7477_vm3, %v608_v42, %v612_v24  ;;  %v636_v7 = vrot.slane %v634_v48, 5  ;;  %6780 = vmatmul.mubr.msk.bf16.gmra.mxu1 %vm767_vm2, %v5749_v50  ;;  %v642_v40 = vshll.u32 %v271_v28, 16  ;;  %v648_v8 = vshll.u32 %v7718_v34, 16  ;;  %v1290_v42 = vld [vmem:[%s7445_s10] sm:$0xe] }
  0x5b   : > { %v5712_v11 = vcombine.low %v603_v45, %v613_v6  ;;  %v622_v0 = vrot.slane %v621_v58, 4  ;;  %v631_v62 = vor.u32 %v630_v59, %v626_v23  ;;  %v641_v15 = vrot.slane %v639_v61, 4 }
  0x5c   : > { %v644_v16 = vrot.slane %v642_v40, 5  ;;  %v650_v20 = vrot.slane %v648_v8, 5  ;;  %v652_v22 = vshrl.u32 %v7718_v34, 16  ;;  %v658_v24 = vshll.u32 %v7722_v41, 16  ;;  %v7198_v40 = vld [vmem:[%s7445_s10 + $0xc] sm:$0xff]  }
  0x5d   : > { %6739 = vmatprep.mubr.msk.bf16.mxu0 %vm767_vm2, %v5712_v11  ;;  %v627_v5 = vsel %vm7477_vm3, %v622_v0, %v626_v23  ;;  %v632_v35 = vrot.slane %v631_v62, 4  ;;  %v5750_v36 = vcombine.low %v271_v28, %v7718_v34  ;;  %v663_v39 = vshrl.u32 %v273_v53, 16  ;;  %v1291_v62 = vld [vmem:[%s7445_s10 + $0xc] sm:$0xe] }
  0x5e   : > { %v645_v48 = vor.u32 %v644_v16, %v641_v15  ;;  %v654_v50 = vrot.slane %v652_v22, 4  ;;  %v660_v45 = vrot.slane %v658_v24, 5  ;;  %v666_v58 = vshll.u32 %v273_v53, 16  ;;  %v1292_v15 = vld [vmem:[%s7445_s10 + $0x18] sm:$0xe] }
  0x5f   : > { %v637_v59 = vsel %vm7477_vm3, %v632_v35, %v636_v7  ;;  %6783 = vmatprep.mubr.msk.bf16.mxu1 %vm767_vm2, %v5750_v36  ;;  %v665_v61 = vrot.slane %v663_v39, 4  ;;  %v672_v6 = vshll.u32 %v7740_v1, 16  ;;  %v676_v23 = vshrl.u32 %v7740_v1, 16 }
  0x60   : > { %v5713_v28 = vcombine.low %v627_v5, %v637_v59  ;;  %v646_v8 = vrot.slane %v645_v48, 4  ;;  %v655_v11 = vor.u32 %v654_v50, %v650_v20  ;;  %v668_v0 = vrot.slane %v666_v58, 5 }
  0x61   : > { %v674_v16 = vrot.slane %v672_v6, 5  ;;  %v678_v22 = vrot.slane %v676_v23, 4  ;;  %v682_v24 = vshll.u32 %v7746_v21, 16  ;;  %v5751_v7 = vcombine.low %v273_v53, %v7740_v1 }
  0x62   : > { %6740 = vmatmul.mubr.msk.bf16.gmra.mxu0 %vm767_vm2, %v5713_v28  ;;  %v651_v35 = vsel %vm7477_vm3, %v646_v8, %v650_v20  ;;  %v656_v36 = vrot.slane %v655_v11, 4  ;;  %v669_v5 = vor.u32 %v668_v0, %v665_v61  ;;  %v5772_v48 = vrot.slane %v1290_v42, 9  ;;  %v1293_v42 = vld [vmem:[%s7445_s10 + $0x24] sm:$0xe]  ;;  %v1294_v28 = vld [vmem:[%s7445_s10 + $0x30] sm:$0xe] }
  0x63   : > { %v679_v50 = vor.u32 %v678_v22, %v674_v16  ;;  %v684_v58 = vrot.slane %v682_v24, 5  ;;  %6784 = vmatmul.mubr.msk.bf16.gmra.mxu1 %vm767_vm2, %v5751_v7  ;;  %v1343_v53 = vrot.slane %v7452_v9, 5  ;;  %v5773_v59 = vrot.slane %v1291_v62, 9  ;;  %v1295_v24 = vld [vmem:[%s7445_s10 + $0x3c] sm:$0xe] }
  0x64   : > { %v661_v20 = vsel %vm7477_vm3, %v656_v36, %v660_v45  ;;  %v670_v61 = vrot.slane %v669_v5, 4  ;;  %v1352_v6 = vrot.slane %v1350_v38, 4  ;;  %6835 = vmatprep.mubr.msk.bf16.mxu1 %vm767_vm2, %v7198_v40  ;;  %v5774_v23 = vrot.slane %v1292_v15, 9  ;;  %v7199_v15 = vld [vmem:[%s7445_s10 + $0x18] sm:$0xff]   ;;  %v1296_v7 = vld [vmem:[%s7445_s10 + $0x48] sm:$0xe] }
  0x65   : > { %v5714_v8 = vcombine.low %v651_v35, %v661_v20  ;;  %v680_v11 = vrot.slane %v679_v50, 4  ;;  %v1344_v9 = vsel %vm7768_vm6, %v5772_v48, %v1343_v53  ;;  %v1345_v0 = vrot.slane %v1343_v53, 4 }
  0x66   : > { %v675_v45 = vsel %vm7477_vm3, %v670_v61, %v674_v16  ;;  %v7789_v62 = vsel %vm7768_vm6, %v5773_v59, %v1350_v38  ;;  %v7795_v40 = vsel %vm7768_vm6, %v1352_v6, %v1353_v47  ;;  %v1357_v22 = vrot.slane %v7488_v44, 5  ;;  %v7200_v16 = vld [vmem:[%s7445_s10 + $0x24] sm:$0xff]  }
  0x67   : > { %6743 = vmatprep.mubr.msk.bf16.mxu0 %vm767_vm2, %v5714_v8  ;;  %v685_v26 = vsel %vm7477_vm3, %v680_v11, %v684_v58  ;;  %v1347_v38 = vsel %vm7768_vm6, %v1345_v0, %v1346_v18  ;;  %v5797_v27 = vcombine.low %v7789_v62, %v7795_v40  ;;  %v1360_v47 = vrot.slane %v7495_v49, 5  ;;  %v1297_v58 = vld [vmem:[%s7445_s10 + $0x54] sm:$0xe]  ;;  %v1299_v11 = vld [vmem:[%s7445_s10 + $0x6c] sm:$0xe] }
  0x68   : > { %v5715_v44 = vcombine.low %v675_v45, %v685_v26  ;;  %v5796_v35 = vcombine.low %v1344_v9, %v1347_v38  ;;  %v7814_v36 = vsel %vm7768_vm6, %v5774_v23, %v1357_v22  ;;  %v1359_v5 = vrot.slane %v1357_v22, 4  ;;  %v1300_v22 = vld [vmem:[%s7445_s10 + $0x78] sm:$0xe] }
  0x69   : > { %v5775_v48 = vrot.slane %v1293_v42, 9  ;;  %v1364_v18 = vrot.slane %v7507_v60, 5  ;;  %v1367_v50 = vrot.slane %v7514_v2, 5  ;;  %v5776_v49 = vrot.slane %v1294_v28, 9  ;;  %v1298_v42 = vld [vmem:[%s7445_s10 + $0x60] sm:$0xe] }
  0x6a   : > { %6744 = vmatmul.mubr.msk.bf16.gmra.mxu0 %vm767_vm2, %v5715_v44  ;;  %v1361_v53 = vsel %vm7768_vm6, %v1359_v5, %v1360_v47  ;;  %v1371_v59 = vrot.slane %v7531_v25, 5  ;;  %v1374_v20 = vrot.slane %v7542_v37, 5  ;;  %v5777_v61 = vrot.slane %v1295_v24, 9  ;;  %v7201_v24 = vld [vmem:[%s7445_s10 + $0x30] sm:$0xff]  }
  0x6b   : > { %6795 = vmatprep.mubr.msk.bf16.mxu0 %vm767_vm2, %v5796_v35  ;;  %6836 = vmatmul.mubr.msk.bf16.vlgmr.msra.gmra.mxu1 %vm767_vm2, %v7199_v15  ;;  %v5798_v60 = vcombine.low %v7814_v36, %v1361_v53  ;;  %v7832_v2 = vsel %vm7768_vm6, %v5775_v48, %v1364_v18  ;;  %v1366_v6 = vrot.slane %v1364_v18, 4  ;;  %v1378_v23 = vrot.slane %v7558_v57, 5  ;;  %v7219_v57 = vld [vmem:[%s9731_s1 + $0xa8] sm:$0xff]   ;;  %v7203_v36 = vld [vmem:[%s7445_s10 + $0x3c] sm:$0xff]  }
  0x6c   : > { %6839 = vmatprep.mubr.msk.bf16.mxu1 %vm767_vm2, %v7200_v16  ;;  %v7839_v25 = vsel %vm7768_vm6, %v5776_v49, %v1371_v59  ;;  %v1373_v37 = vrot.slane %v1371_v59, 4  ;;  %v1381_v28 = vrot.slane %v7568_v4, 5  ;;  %v5778_v8 = vrot.slane %v1296_v7, 9  ;;  %6908 = vmatpush3.bf16.msra.mxu1 %v7731_v56  ;;  %v7202_v16 = vld [vmem:[%s9731_s1 + $0x90] sm:$0xff]   ;;  %v7207_v53 = vld [vmem:[%s9731_s1 + $0x88] sm:$0xff]  }
  0x6d   : > { %v7849_v9 = vsel %vm7768_vm6, %v1366_v6, %v1367_v50  ;;  %v7853_v0 = vsel %vm7768_vm6, %v5777_v61, %v1378_v23  ;;  %v1380_v45 = vrot.slane %v1378_v23, 4  ;;  %v1385_v62 = vrot.slane %v7577_v17, 5  ;;  %6909 = vmatprep.subr.bf16.mxu1 %v7216_v10 }
  0x6e   : > { %v5799_v4 = vcombine.low %v7832_v2, %v7849_v9  ;;  %v7860_v56 = vsel %vm7768_vm6, %v1373_v37, %v1374_v20  ;;  %v1388_v40 = vrot.slane %v7585_v31, 5  ;;  %v5779_v15 = vrot.slane %v1297_v58, 9  ;;  %v1301_v58 = vld [vmem:[%s7445_s10 + $0x84] sm:$0xe]  ;;  %v1302_v20 = vld [vmem:[%s7445_s10 + $0x90] sm:$0xe] }
  0x6f   : > { %v5800_v26 = vcombine.low %v7839_v25, %v7860_v56  ;;  %v7869_v17 = vsel %vm7768_vm6, %v1380_v45, %v1381_v28  ;;  %v7873_v38 = vsel %vm7768_vm6, %v5778_v8, %v1385_v62  ;;  %v1387_v47 = vrot.slane %v1385_v62, 4  ;;  %v1303_v28 = vld [vmem:[%s7445_s10 + $0x9c] sm:$0xe] }
  0x70   : > { %v5801_v31 = vcombine.low %v7853_v0, %v7869_v17  ;;  %v1392_v7 = vrot.slane %v7600_v51, 5  ;;  %v1395_v44 = vrot.slane %v7607_v55, 5  ;;  %v5780_v35 = vrot.slane %v1298_v42, 9  ;;  %6910 = vmatpush3.bf16.msra.mxu1 %v7216_v10 }
  0x71   : > { %v7885_v5 = vsel %vm7768_vm6, %v1387_v47, %v1388_v40  ;;  %v1399_v48 = vrot.slane %v7617_v12, 5  ;;  %v1402_v18 = vrot.slane %v7622_v19, 5  ;;  %v5781_v50 = vrot.slane %v1299_v11, 9  ;;  %6911 = vmatprep.subr.bf16.mxu1 %v7219_v57  ;;  %v7220_v12 = vld [vmem:[%s9731_s1 + $0xa0] sm:$0xff]  }
  0x72   : > { %6796 = vmatmul.mubr.msk.bf16.vlgmr.msra.gmra.mxu0 %vm767_vm2, %v5797_v27  ;;  %v5802_v51 = vcombine.low %v7873_v38, %v7885_v5  ;;  %v7894_v55 = vsel %vm7768_vm6, %v5779_v15, %v1392_v7  ;;  %v1394_v10 = vrot.slane %v1392_v7, 4  ;;  %v1406_v49 = vrot.slane %v7634_v46, 5 }
  0x73   : > { %6868 = vmatpush3.bf16.msra.mxu0 %v7590_v33  ;;  %6799 = vmatprep.mubr.msk.bf16.mxu0 %vm767_vm2, %v5798_v60  ;;  %v7905_v19 = vsel %vm7768_vm6, %v5780_v35, %v1399_v48  ;;  %v1401_v27 = vrot.slane %v1399_v48, 4  ;;  %v1409_v46 = vrot.slane %v7641_v54, 5  ;;  %v5782_v59 = vrot.slane %v1300_v22, 9  ;;  %v1304_v22 = vld [vmem:[%s7445_s10 + $0xa8] sm:$0xe]  ;;  %v7205_v35 = vld [vmem:[%s7445_s10 + $0x54] sm:$0xff]  }
  0x74   : > { %6840 = vmatmul.mubr.msk.bf16.gmra.mxu1 %vm767_vm2, %v7201_v24  ;;  %6869 = vmatprep.subr.bf16.mxu0 %v7202_v16  ;;  %v7915_v33 = vsel %vm7768_vm6, %v1394_v10, %v1395_v44  ;;  %v7919_v61 = vsel %vm7768_vm6, %v5781_v50, %v1406_v49  ;;  %v1408_v60 = vrot.slane %v1406_v49, 4  ;;  %v1413_v6 = vrot.slane %v7648_v63, 5  ;;  %v7204_v24 = vld [vmem:[%s7445_s10 + $0x48] sm:$0xff]   ;;  %v7212_v44 = vld [vmem:[%s9731_s1 + $0x80] sm:$0xff]  }
  0x75   : > { %6843 = vmatprep.mubr.msk.bf16.mxu1 %vm767_vm2, %v7203_v36  ;;  %v5803_v54 = vcombine.low %v7894_v55, %v7915_v33  ;;  %v7927_v23 = vsel %vm7768_vm6, %v1401_v27, %v1402_v18  ;;  %v1416_v42 = vrot.slane %v7654_v13, 5  ;;  %v5783_v37 = vrot.slane %v1301_v58, 9  ;;  %6912 = vmatpush3.bf16.msra.mxu1 %v7219_v57  ;;  %v7944_v13 = vld [vmem:[%s9731_s1 + $0xf8] sm:$0xff]  }
  0x76   : > { %v5804_v8 = vcombine.low %v7905_v19, %v7927_v23  ;;  %v7935_v63 = vsel %vm7768_vm6, %v1408_v60, %v1409_v46  ;;  %v7939_v11 = vsel %vm7768_vm6, %v5782_v59, %v1413_v6  ;;  %v1415_v45 = vrot.slane %v1413_v6, 4  ;;  %6913 = vmatprep.subr.bf16.mxu1 %v7220_v12  ;;  %v8018_v46 = vld [vmem:[%s7445_s10 + $0x14] sm:$0x1]  ;;  %v5911_v59 = vld [vmem:[%s7445_s10 + $0x18] sm:$0xf] }
  0x77   : > { %6870 = vmatpush3.bf16.msra.mxu0 %v7202_v16  ;;  %v5805_v57 = vcombine.low %v7919_v61, %v7935_v63  ;;  %v1420_v62 = vrot.slane %v7667_v43, 5  ;;  %v1423_v40 = vrot.slane %v7672_v52, 5  ;;  %v5784_v15 = vrot.slane %v1302_v20, 9 }
  0x78   : > { %6871 = vmatprep.subr.bf16.mxu0 %v7207_v53  ;;  %v7954_v47 = vsel %vm7768_vm6, %v1415_v45, %v1416_v42  ;;  %v1427_v7 = vrot.slane %v7685_v14, 5  ;;  %v1430_v16 = vrot.slane %v7690_v32, 5  ;;  %v5785_v43 = vrot.slane %v1303_v28, 9  ;;  %v1305_v14 = vld [vmem:[%s7445_s10 + $0xb4] sm:$0xe] }
  0x79   : > { %v5806_v52 = vcombine.low %v7939_v11, %v7954_v47  ;;  %v7966_v36 = vsel %vm7768_vm6, %v5783_v37, %v1420_v62  ;;  %v1422_v48 = vrot.slane %v1420_v62, 4  ;;  %v1434_v18 = vrot.slane %v7699_v29, 5  ;;  %6914 = vmatpush3.bf16.msra.mxu1 %v7220_v12  ;;  %v8003_v12 = vld [vmem:[%s7445_s10 + $0x10] sm:$0xf]  ;;  %v8026_v37 = vld [vmem:[%s7445_s10 + $0x1c] sm:$0xf] }
  0x7a   : > { %6800 = vmatmul.mubr.msk.bf16.gmra.mxu0 %vm767_vm2, %v5799_v4  ;;  %v7976_v32 = vsel %vm7768_vm6, %v5784_v15, %v1427_v7  ;;  %v1429_v50 = vrot.slane %v1427_v7, 4  ;;  %v1437_v10 = vrot.slane %v7705_v3, 5  ;;  %v5786_v49 = vrot.slane %v1304_v22, 9  ;;  %6987 = vmatprep.subr.bf16.mxu1 %v7944_v13  ;;  %v5908_v4 = vld [vmem:[%s7445_s10 + $0xc] sm:$0xf]  ;;  %v7206_v15 = vld [vmem:[%s7445_s10 + $0x60] sm:$0xff]  }
  0x7b   : > { %6803 = vmatprep.mubr.msk.bf16.mxu0 %vm767_vm2, %v5800_v26  ;;  %6872 = vmatpush3.bf16.msra.mxu0 %v7207_v53  ;;  %v7986_v29 = vsel %vm7768_vm6, %v1422_v48, %v1423_v40  ;;  %v7990_v2 = vsel %vm7768_vm6, %v5785_v43, %v1434_v18  ;;  %v1436_v3 = vrot.slane %v1434_v18, 4  ;;  %v1441_v9 = vrot.slane %v7718_v34, 5  ;;  %v8008_v34 = vld [vmem:[%s9731_s1 + $0xd8] sm:$0xff]   ;;  %v7208_v22 = vld [vmem:[%s7445_s10 + $0x6c] sm:$0xff]   ;;  %v8047_v48 = vld [vmem:[%s7445_s10 + $0x20] sm:$0x1] }
  0x7c   : > { %6844 = vmatmul.mubr.msk.bf16.gmra.mxu1 %vm767_vm2, %v7204_v24  ;;  %v5807_v25 = vcombine.low %v7966_v36, %v7986_v29  ;;  %v7999_v56 = vsel %vm7768_vm6, %v1429_v50, %v1430_v16  ;;  %6873 = vmatprep.subr.bf16.mxu0 %v7212_v44  ;;  %v1444_v26 = vrot.slane %v7722_v41, 5  ;;  %v5787_v58 = vrot.slane %v1305_v14, 9 }
  0x7d   : > { %6847 = vmatprep.mubr.msk.bf16.mxu1 %vm767_vm2, %v7205_v35  ;;  %v5808_v27 = vcombine.low %v7976_v32, %v7999_v56  ;;  %v8015_v53 = vsel %vm7768_vm6, %v1436_v3, %v1437_v10  ;;  %v1443_v41 = vrot.slane %v1441_v9, 4  ;;  %v1448_v60 = vrot.slane %v7740_v1, 5 }
  0x7e   : > { %v5809_v20 = vcombine.low %v7990_v2, %v8015_v53  ;;  %v1451_v6 = vrot.slane %v7746_v21, 5  ;;  %v2214_v42 = vshrl.u32 %v5908_v4, 16  ;;  %v8030_v28 = vsel %vm7768_vm6, %v5786_v49, %v1441_v9  ;;  %v6000_v49 = vld [vmem:[%s7445_s10 + $0xc] sm:$0xe] }
  0x7f   : > { %6874 = vmatpush3.bf16.msra.mxu0 %v7212_v44  ;;  %v2217_v45 = vshll.u32 %v5908_v4, 16  ;;  %v2223_v62 = vshll.u32 %v8003_v12, 16  ;;  %v2227_v40 = vshrl.u32 %v8003_v12, 16  ;;  %v8038_v1 = vsel %vm7768_vm6, %v1443_v41, %v1444_v26 }
  0x80   : > { %v8042_v21 = vsel %vm7768_vm6, %v5787_v58, %v1448_v60  ;;  %v1450_v24 = vrot.slane %v1448_v60, 4  ;;  %v2216_v7 = vrot.slane %v2214_v42, 4  ;;  %6947 = vmatprep.subr.bf16.mxu0 %v8008_v34  ;;  %v2233_v35 = vshll.u32 %v8018_v46, 16 }
  0x81   : > { %v2219_v16 = vrot.slane %v2217_v45, 5  ;;  %v2225_v44 = vrot.slane %v2223_v62, 5  ;;  %v2229_v43 = vrot.slane %v2227_v40, 4  ;;  %v2238_v14 = vshrl.u32 %v5911_v59, 16  ;;  %v5914_v62 = vld [vmem:[%s7445_s10 + $0x24] sm:$0xf] }
  0x82   : > { %6804 = vmatmul.mubr.msk.bf16.gmra.mxu0 %vm767_vm2, %v5801_v31  ;;  %v8055_v18 = vsel %vm7768_vm6, %v1450_v24, %v1451_v6  ;;  %v2241_v50 = vshll.u32 %v5911_v59, 16  ;;  %v2247_v10 = vshll.u32 %v8026_v37, 16  ;;  %v2235_v3 = vrot.slane %v2233_v35, 5  ;;  %v6001_v59 = vld [vmem:[%s7445_s10 + $0x18] sm:$0xe] }
  0x83   : > { %6807 = vmatprep.mubr.msk.bf16.mxu0 %vm767_vm2, %v5802_v51  ;;  %v5811_v0 = vcombine.low %v8042_v21, %v8055_v18  ;;  %v2220_v17 = vor.u32 %v2219_v16, %v2216_v7  ;;  %v2230_v31 = vor.u32 %v2229_v43, %v2225_v44  ;;  %v2240_v9 = vrot.slane %v2238_v14, 4  ;;  %v8080_v7 = vld [vmem:[%s7445_s10 + $0x28] sm:$0xf]  ;;  %v7209_v16 = vld [vmem:[%s7445_s10 + $0x78] sm:$0xff]  }
  0x84   : > { %6848 = vmatmul.mubr.msk.bf16.gmra.mxu1 %vm767_vm2, %v7206_v15  ;;  %v2243_v4 = vrot.slane %v2241_v50, 5  ;;  %v2249_v26 = vrot.slane %v2247_v10, 5  ;;  %v2251_v58 = vshrl.u32 %v8026_v37, 16  ;;  %v2257_v51 = vshll.u32 %v8047_v48, 16  ;;  %v7210_v50 = vld [vmem:[%s7445_s10 + $0x84] sm:$0xff]  }
  0x85   : > { %6851 = vmatprep.mubr.msk.bf16.mxu1 %vm767_vm2, %v7208_v22  ;;  %v2221_v38 = vrot.slane %v2220_v17, 4  ;;  %v2231_v5 = vrot.slane %v2230_v31, 4  ;;  %v6016_v41 = vrot.slane %v6000_v49, 9  ;;  %v5810_v60 = vcombine.low %v8030_v28, %v8038_v1 }
  0x86   : > { %v2244_v6 = vor.u32 %v2243_v4, %v2240_v9  ;;  %v2253_v42 = vrot.slane %v2251_v58, 4  ;;  %v2985_v45 = vrot.slane %v8003_v12, 5  ;;  %v2259_v22 = vrot.slane %v2257_v51, 5 }
  0x87   : > { %v2226_v40 = vsel %vm7477_vm3, %v2221_v38, %v2225_v44  ;;  %v2236_v15 = vsel %vm7477_vm3, %v2231_v5, %v2235_v3  ;;  %v2988_v24 = vrot.slane %v8018_v46, 5  ;;  %v6017_v12 = vrot.slane %v6001_v59, 9  ;;  %v8097_v3 = vld [vmem:[%s7445_s10 + $0x2c] sm:$0x1]  ;;  %v8129_v59 = vld [vmem:[%s7445_s10 + $0x38] sm:$0x1] }
  0x88   : > { %v2245_v43 = vrot.slane %v2244_v6, 4  ;;  %v2254_v35 = vor.u32 %v2253_v42, %v2249_v26  ;;  %v8085_v14 = vsel %vm7768_vm6, %v6016_v41, %v2985_v45  ;;  %v2987_v44 = vrot.slane %v2985_v45, 4 }
  0x89   : > { %v2992_v10 = vrot.slane %v8026_v37, 5  ;;  %v2995_v49 = vrot.slane %v8047_v48, 5  ;;  %v2262_v17 = vshrl.u32 %v5914_v62, 16  ;;  %v2265_v9 = vshll.u32 %v5914_v62, 16  ;;  %v5917_v48 = vld [vmem:[%s7445_s10 + $0x30] sm:$0xf] }
  0x8a   : > { %6808 = vmatmul.mubr.msk.bf16.gmra.mxu0 %vm767_vm2, %v5803_v54  ;;  %v2250_v46 = vsel %vm7477_vm3, %v2245_v43, %v2249_v26  ;;  %v2255_v31 = vrot.slane %v2254_v35, 4  ;;  %v2271_v4 = vshll.u32 %v8080_v7, 16  ;;  %v8104_v37 = vcombine.low %v2226_v40, %v2236_v15  ;;  %v8112_v26 = vld [vmem:[%s7445_s10 + $0x34] sm:$0xf]  ;;  %v6002_v40 = vld [vmem:[%s7445_s10 + $0x24] sm:$0xe] }
  0x8b   : > { %6811 = vmatprep.mubr.msk.bf16.mxu0 %vm767_vm2, %v5804_v8  ;;  %v8108_v55 = vsel %vm7768_vm6, %v2987_v44, %v2988_v24  ;;  %v2994_v33 = vrot.slane %v2992_v10, 4  ;;  %v2264_v54 = vrot.slane %v2262_v17, 4  ;;  %v8121_v8 = vsel %vm7768_vm6, %v6017_v12, %v2992_v10  ;;  %v7211_v15 = vld [vmem:[%s7445_s10 + $0x90] sm:$0xff]  }
  0x8c   : > { %6852 = vmatmul.mubr.msk.bf16.gmra.mxu1 %vm767_vm2, %v7209_v16  ;;  %v2260_v19 = vsel %vm7477_vm3, %v2255_v31, %v2259_v22  ;;  %v6040_v23 = vcombine.low %v8085_v14, %v8108_v55  ;;  %v2267_v58 = vrot.slane %v2265_v9, 5  ;;  %v2273_v5 = vrot.slane %v2271_v4, 5  ;;  %v6003_v10 = vld [vmem:[%s7445_s10 + $0x30] sm:$0xe]  ;;  %v6007_v55 = vld [vmem:[%s7445_s10 + $0x60] sm:$0xe] }
  0x8d   : > { %6855 = vmatprep.mubr.msk.bf16.mxu1 %vm767_vm2, %v7210_v50  ;;  %v8124_v38 = vcombine.low %v2250_v46, %v2260_v19  ;;  %v2275_v51 = vshrl.u32 %v8080_v7, 16  ;;  %v2281_v41 = vshll.u32 %v8097_v3, 16  ;;  %v8133_v6 = vsel %vm7768_vm6, %v2994_v33, %v2995_v49  ;;  %v7213_v49 = vld [vmem:[%s7445_s10 + $0x9c] sm:$0xff]  }
  0x8e   : > { %v2268_v42 = vor.u32 %v2267_v58, %v2264_v54  ;;  %v2286_v45 = vshrl.u32 %v5917_v48, 16  ;;  %v2289_v62 = vshll.u32 %v5917_v48, 16  ;;  %v2295_v16 = vshll.u32 %v8112_v26, 16  ;;  %v5920_v19 = vld [vmem:[%s7445_s10 + $0x3c] sm:$0xf] }
  0x8f   : > { %v2277_v22 = vrot.slane %v2275_v51, 4  ;;  %v2283_v24 = vrot.slane %v2281_v41, 5  ;;  %v2299_v43 = vshrl.u32 %v8112_v26, 16  ;;  %v2305_v44 = vshll.u32 %v8129_v59, 16  ;;  %v5921_v41 = vld [vmem:[%s7445_s10 + $0x40] sm:$0xf] }
  0x90   : > { %v2269_v35 = vrot.slane %v2268_v42, 4  ;;  %v2288_v12 = vrot.slane %v2286_v45, 4  ;;  %v2291_v50 = vrot.slane %v2289_v62, 5  ;;  %v2297_v46 = vrot.slane %v2295_v16, 5  ;;  %v7214_v16 = vld [vmem:[%s7445_s10 + $0xa8] sm:$0xff]  }
  0x91   : > { %v2278_v17 = vor.u32 %v2277_v22, %v2273_v5  ;;  %v2301_v31 = vrot.slane %v2299_v43, 4  ;;  %v6018_v9 = vrot.slane %v6002_v40, 9  ;;  %v2307_v54 = vrot.slane %v2305_v44, 5  ;;  %v5923_v22 = vld [vmem:[%s7445_s10 + $0x48] sm:$0xf] }
  0x92   : > { %6812 = vmatmul.mubr.msk.bf16.gmra.mxu0 %vm767_vm2, %v5805_v57  ;;  %v2274_v4 = vsel %vm7477_vm3, %v2269_v35, %v2273_v5  ;;  %v2292_v33 = vor.u32 %v2291_v50, %v2288_v12  ;;  %v2999_v48 = vrot.slane %v8080_v7, 5  ;;  %v3002_v61 = vrot.slane %v8097_v3, 5  ;;  %v8188_v50 = vld [vmem:[%s7445_s10 + $0x4c] sm:$0xf] }
  0x93   : > { %6815 = vmatprep.mubr.msk.bf16.mxu0 %vm767_vm2, %v5806_v52  ;;  %v2279_v58 = vrot.slane %v2278_v17, 4  ;;  %v2302_v51 = vor.u32 %v2301_v31, %v2297_v46  ;;  %v6019_v63 = vrot.slane %v6003_v10, 9  ;;  %v3006_v11 = vrot.slane %v8112_v26, 5  ;;  %v7217_v17 = vld [vmem:[%s7445_s10 + $0xb4] sm:$0xff]  }
  0x94   : > { %6856 = vmatmul.mubr.msk.bf16.gmra.mxu1 %vm767_vm2, %v7211_v15  ;;  %v2293_v57 = vrot.slane %v2292_v33, 4  ;;  %v8158_v7 = vsel %vm7768_vm6, %v6018_v9, %v2999_v48  ;;  %v3001_v5 = vrot.slane %v2999_v48, 4  ;;  %v6041_v47 = vcombine.low %v8121_v8, %v8133_v6  ;;  %v5922_v15 = vld [vmem:[%s7445_s10 + $0x44] sm:$0x1]  ;;  %v8194_v9 = vld [vmem:[%s7445_s10 + $0x50] sm:$0x1] }
  0x95   : > { %6859 = vmatprep.mubr.msk.bf16.mxu1 %vm767_vm2, %v7213_v49  ;;  %v2284_v52 = vsel %vm7477_vm3, %v2279_v58, %v2283_v24  ;;  %v2303_v3 = vrot.slane %v2302_v51, 4  ;;  %v2310_v42 = vshrl.u32 %v5920_v19, 16  ;;  %v3009_v40 = vrot.slane %v8129_v59, 5  ;;  %v6004_v51 = vld [vmem:[%s7445_s10 + $0x3c] sm:$0xe] }
  0x96   : > { %v8167_v45 = vcombine.low %v2274_v4, %v2284_v52  ;;  %v2298_v62 = vsel %vm7477_vm3, %v2293_v57, %v2297_v46  ;;  %v8173_v26 = vsel %vm7768_vm6, %v3001_v5, %v3002_v61  ;;  %v8185_v35 = vsel %vm7768_vm6, %v6019_v63, %v3006_v11  ;;  %v6005_v52 = vld [vmem:[%s7445_s10 + $0x48] sm:$0xe] }
  0x97   : > { %v2308_v24 = vsel %vm7477_vm3, %v2303_v3, %v2307_v54  ;;  %v6042_v43 = vcombine.low %v8158_v7, %v8173_v26  ;;  %v3008_v12 = vrot.slane %v3006_v11, 4  ;;  %v2312_v44 = vrot.slane %v2310_v42, 4  ;;  %v5926_v42 = vld [vmem:[%s7445_s10 + $0x54] sm:$0xf] }
  0x98   : > { %v2313_v59 = vshll.u32 %v5920_v19, 16  ;;  %v2319_v10 = vshll.u32 %v5921_v41, 16  ;;  %v2323_v49 = vshrl.u32 %v5921_v41, 16  ;;  %v8191_v46 = vcombine.low %v2298_v62, %v2308_v24  ;;  %v8323_v26 = vld [vmem:[%s7445_s10 + $0x74] sm:$0x1] }
  0x99   : > { %v2329_v31 = vshll.u32 %v5922_v15, 16  ;;  %v2334_v4 = vshrl.u32 %v5923_v22, 16  ;;  %v2337_v33 = vshll.u32 %v5923_v22, 16  ;;  %v8202_v54 = vsel %vm7768_vm6, %v3008_v12, %v3009_v40 }
  0x9a   : > { %6816 = vmatmul.mubr.msk.bf16.gmra.mxu0 %vm767_vm2, %v5807_v25  ;;  %v2315_v48 = vrot.slane %v2313_v59, 5  ;;  %v2321_v19 = vrot.slane %v2319_v10, 5  ;;  %v2325_v58 = vrot.slane %v2323_v49, 4  ;;  %v2343_v29 = vshll.u32 %v8188_v50, 16  ;;  %v7218_v10 = vld [vmem:[%s7445_s10 + $0xc0] sm:$0xff]  }
  0x9b   : > { %6819 = vmatprep.mubr.msk.bf16.mxu0 %vm767_vm2, %v5808_v27  ;;  %v2331_v61 = vrot.slane %v2329_v31, 5  ;;  %v2336_v63 = vrot.slane %v2334_v4, 4  ;;  %v2339_v36 = vrot.slane %v2337_v33, 5  ;;  %v2347_v5 = vshrl.u32 %v8188_v50, 16  ;;  %v8228_v4 = vld [vmem:[%s7445_s10 + $0x58] sm:$0xf] }
  0x9c   : > { %6860 = vmatmul.mubr.msk.bf16.gmra.mxu1 %vm767_vm2, %v7214_v16  ;;  %v2316_v25 = vor.u32 %v2315_v48, %v2312_v44  ;;  %v2326_v57 = vor.u32 %v2325_v58, %v2321_v19  ;;  %v2353_v11 = vshll.u32 %v8194_v9, 16  ;;  %v2345_v56 = vrot.slane %v2343_v29, 5  ;;  %v8238_v58 = vld [vmem:[%s7445_s10 + $0x5c] sm:$0x1]  ;;  %v5929_v29 = vld [vmem:[%s7445_s10 + $0x60] sm:$0xf] }
  0x9d   : > { %6863 = vmatprep.mubr.msk.bf16.mxu1 %vm767_vm2, %v7217_v17  ;;  %v2340_v32 = vor.u32 %v2339_v36, %v2336_v63  ;;  %v6020_v27 = vrot.slane %v6004_v51, 9  ;;  %v3013_v3 = vrot.slane %v5921_v41, 5  ;;  %v6043_v62 = vcombine.low %v8185_v35, %v8202_v54 }
  0x9e   : > { %v2317_v40 = vrot.slane %v2316_v25, 4  ;;  %v2327_v22 = vrot.slane %v2326_v57, 4  ;;  %v2349_v16 = vrot.slane %v2347_v5, 4  ;;  %v2355_v12 = vrot.slane %v2353_v11, 5 }
  0x9f   : > { %v2341_v24 = vrot.slane %v2340_v32, 4  ;;  %v3015_v44 = vrot.slane %v3013_v3, 4  ;;  %v3016_v59 = vrot.slane %v5922_v15, 5  ;;  %v8225_v31 = vsel %vm7768_vm6, %v6020_v27, %v3013_v3  ;;  %v8272_v32 = vld [vmem:[%s7445_s10 + $0x68] sm:$0x1] }
  0xa0   : > { %v2322_v49 = vsel %vm7477_vm3, %v2317_v40, %v2321_v19  ;;  %v2332_v17 = vsel %vm7477_vm3, %v2327_v22, %v2331_v61  ;;  %v2350_v41 = vor.u32 %v2349_v16, %v2345_v56  ;;  %v6021_v48 = vrot.slane %v6005_v52, 9 }
  0xa1   : > { %v8230_v33 = vcombine.low %v2322_v49, %v2332_v17  ;;  %v8234_v15 = vsel %vm7768_vm6, %v3015_v44, %v3016_v59  ;;  %v3020_v19 = vrot.slane %v8188_v50, 5  ;;  %v2346_v51 = vsel %vm7477_vm3, %v2341_v24, %v2345_v56  ;;  %v6006_v56 = vld [vmem:[%s7445_s10 + $0x54] sm:$0xe] }
  0xa2   : > { %6820 = vmatmul.mubr.msk.bf16.gmra.mxu0 %vm767_vm2, %v5809_v20  ;;  %v2351_v61 = vrot.slane %v2350_v41, 4  ;;  %v3023_v63 = vrot.slane %v8194_v9, 5  ;;  %v2358_v36 = vshrl.u32 %v5926_v42, 16  ;;  %v6044_v50 = vcombine.low %v8225_v31, %v8234_v15 }
  0xa3   : > { %6823 = vmatprep.mubr.msk.bf16.mxu0 %vm767_vm2, %v5810_v60  ;;  %v3022_v2 = vrot.slane %v3020_v19, 4  ;;  %v2361_v53 = vshll.u32 %v5926_v42, 16  ;;  %v2367_v20 = vshll.u32 %v8228_v4, 16  ;;  %v2371_v28 = vshrl.u32 %v8228_v4, 16  ;;  %v5930_v60 = vld [vmem:[%s7445_s10 + $0x64] sm:$0xf] }
  0xa4   : > { %6864 = vmatmul.mubr.msk.bf16.gmra.mxu1 %vm767_vm2, %v7218_v10  ;;  %v2356_v9 = vsel %vm7477_vm3, %v2351_v61, %v2355_v12  ;;  %v2360_v25 = vrot.slane %v2358_v36, 4  ;;  %v2377_v1 = vshll.u32 %v8238_v58, 16  ;;  %v8269_v5 = vsel %vm7768_vm6, %v6021_v48, %v3020_v19  ;;  %v7226_v10 = vld [vmem:[%s9731_s1 + $0xf0] sm:$0xff]   ;;  %v5932_v19 = vld [vmem:[%s7445_s10 + $0x6c] sm:$0xf] }
  0xa5   : > { %6915 = vmatprep.mubr.msk.bf16.mxu1 %vm767_vm2, %v6040_v23  ;;  %v8265_v57 = vcombine.low %v2346_v51, %v2356_v9  ;;  %v2363_v11 = vrot.slane %v2361_v53, 5  ;;  %v2369_v52 = vrot.slane %v2367_v20, 5  ;;  %v8277_v27 = vsel %vm7768_vm6, %v3022_v2, %v3023_v63  ;;  %v8296_v9 = vld [vmem:[%s7445_s10 + $0x70] sm:$0xf] }
  0xa6   : > { %v2373_v3 = vrot.slane %v2371_v28, 4  ;;  %v2379_v42 = vrot.slane %v2377_v1, 5  ;;  %v2382_v14 = vshrl.u32 %v5929_v29, 16  ;;  %v2385_v40 = vshll.u32 %v5929_v29, 16  ;;  %v7227_v28 = vld [vmem:[%s9731_s1 + $0xe8] sm:$0xff]  }
  0xa7   : > { %v2364_v23 = vor.u32 %v2363_v11, %v2360_v25  ;;  %v2391_v22 = vshll.u32 %v5930_v60, 16  ;;  %v2395_v16 = vshrl.u32 %v5930_v60, 16  ;;  %v2401_v44 = vshll.u32 %v8272_v32, 16 }
  0xa8   : > { %v2374_v24 = vor.u32 %v2373_v3, %v2369_v52  ;;  %v2384_v12 = vrot.slane %v2382_v14, 4  ;;  %v6022_v59 = vrot.slane %v6006_v56, 9  ;;  %v2387_v17 = vrot.slane %v2385_v40, 5  ;;  %v8341_v56 = vld [vmem:[%s7445_s10 + $0x7c] sm:$0xf] }
  0xa9   : > { %v2365_v49 = vrot.slane %v2364_v23, 4  ;;  %v2393_v41 = vrot.slane %v2391_v22, 5  ;;  %v2397_v48 = vrot.slane %v2395_v16, 4  ;;  %v2403_v61 = vrot.slane %v2401_v44, 5  ;;  %v8349_v23 = vld [vmem:[%s7445_s10 + $0x80] sm:$0x1] }
  0xaa   : > { %6824 = vmatmul.mubr.msk.bf16.gmra.mxu0 %vm767_vm2, %v5811_v0  ;;  %v2375_v51 = vrot.slane %v2374_v24, 4  ;;  %v3027_v63 = vrot.slane %v8228_v4, 5  ;;  %v3030_v36 = vrot.slane %v8238_v58, 5  ;;  %v2388_v53 = vor.u32 %v2387_v17, %v2384_v12  ;;  %v6008_v40 = vld [vmem:[%s7445_s10 + $0x6c] sm:$0xe]  ;;  %v7228_v44 = vld [vmem:[%s9731_s1 + $0xe0] sm:$0xff]  }
  0xab   : > { %6875 = vmatprep.mubr.msk.bf16.mxu0 %vm767_vm2, %v8104_v37  ;;  %v2370_v2 = vsel %vm7477_vm3, %v2365_v49, %v2369_v52  ;;  %v2398_v20 = vor.u32 %v2397_v48, %v2393_v41  ;;  %v6023_v29 = vrot.slane %v6007_v55, 9  ;;  %v6045_v21 = vcombine.low %v8269_v5, %v8277_v27  ;;  %v6009_v48 = vld [vmem:[%s7445_s10 + $0x78] sm:$0xe]  ;;  %v8445_v5 = vld [vmem:[%s7445_s10 + $0x98] sm:$0x1] }
  0xac   : > { %6916 = vmatmul.mubr.msk.bf16.vlgmr.msra.gmra.mxu1 %vm767_vm2, %v6041_v47  ;;  %v2380_v18 = vsel %vm7477_vm3, %v2375_v51, %v2379_v42  ;;  %v3029_v0 = vrot.slane %v3027_v63, 4  ;;  %v3034_v37 = vrot.slane %v5930_v60, 5  ;;  %v2389_v4 = vrot.slane %v2388_v53, 4 }
  0xad   : > { %6919 = vmatprep.mubr.msk.bf16.mxu1 %vm767_vm2, %v6042_v43  ;;  %v2399_v58 = vrot.slane %v2398_v20, 4  ;;  %v8312_v8 = vsel %vm7768_vm6, %v6022_v59, %v3027_v63  ;;  %v3037_v6 = vrot.slane %v8272_v32, 5  ;;  %6988 = vmatpush3.bf16.msra.mxu1 %v7944_v13  ;;  %v8316_v47 = vcombine.low %v2370_v2, %v2380_v18  ;;  %v7222_v13 = vld [vmem:[%s9731_s1 + $0xd0] sm:$0xff]   ;;  %v5935_v32 = vld [vmem:[%s7445_s10 + $0x78] sm:$0xf] }
  0xae   : > { %v8320_v25 = vsel %vm7768_vm6, %v3029_v0, %v3030_v36  ;;  %v3036_v7 = vrot.slane %v3034_v37, 4  ;;  %v2406_v43 = vshrl.u32 %v5932_v19, 16  ;;  %6989 = vmatprep.subr.bf16.mxu1 %v7226_v10  ;;  %v2394_v1 = vsel %vm7477_vm3, %v2389_v4, %v2393_v41  ;;  %v5938_v0 = vld [vmem:[%s7445_s10 + $0x84] sm:$0xf]  ;;  %v8387_v4 = vld [vmem:[%s7445_s10 + $0x88] sm:$0xf] }
  0xaf   : > { %v2404_v60 = vsel %vm7477_vm3, %v2399_v58, %v2403_v61  ;;  %v8337_v11 = vsel %vm7768_vm6, %v6023_v29, %v3034_v37  ;;  %v2409_v52 = vshll.u32 %v5932_v19, 16  ;;  %v6046_v42 = vcombine.low %v8312_v8, %v8320_v25  ;;  %v7223_v61 = vld [vmem:[%s9731_s1 + $0xc8] sm:$0xff]  }
  0xb0   : > { %v8343_v3 = vcombine.low %v2394_v1, %v2404_v60  ;;  %v2408_v14 = vrot.slane %v2406_v43, 4  ;;  %v2415_v55 = vshll.u32 %v8296_v9, 16  ;;  %v8354_v22 = vsel %vm7768_vm6, %v3036_v7, %v3037_v6  ;;  %v7224_v43 = vld [vmem:[%s9731_s1 + $0xc0] sm:$0xff]  }
  0xb1   : > { %v2411_v16 = vrot.slane %v2409_v52, 5  ;;  %v2419_v24 = vshrl.u32 %v8296_v9, 16  ;;  %v2425_v12 = vshll.u32 %v8323_v26, 16  ;;  %6990 = vmatpush3.bf16.msra.mxu1 %v7226_v10  ;;  %v2430_v49 = vshrl.u32 %v5935_v32, 16  ;;  %v5941_v52 = vld [vmem:[%s7445_s10 + $0x90] sm:$0xf] }
  0xb2   : > { %6876 = vmatmul.mubr.msk.bf16.vlgmr.msra.gmra.mxu0 %vm767_vm2, %v8124_v38  ;;  %v2417_v59 = vrot.slane %v2415_v55, 5  ;;  %v2433_v17 = vshll.u32 %v5935_v32, 16  ;;  %v2439_v41 = vshll.u32 %v8341_v56, 16  ;;  %6991 = vmatprep.subr.bf16.mxu1 %v7227_v28  ;;  %v2443_v38 = vshrl.u32 %v8341_v56, 16 }
  0xb3   : > { %6948 = vmatpush3.bf16.msra.mxu0 %v8008_v34  ;;  %6879 = vmatprep.mubr.msk.bf16.mxu0 %vm767_vm2, %v8167_v45  ;;  %v2412_v10 = vor.u32 %v2411_v16, %v2408_v14  ;;  %v2421_v19 = vrot.slane %v2419_v24, 4  ;;  %v2427_v51 = vrot.slane %v2425_v12, 5  ;;  %v2432_v34 = vrot.slane %v2430_v49, 4  ;;  %v8429_v16 = vld [vmem:[%s9731_s1 + $0x118] sm:$0xff]  }
  0xb4   : > { %6920 = vmatmul.mubr.msk.bf16.gmra.mxu1 %vm767_vm2, %v6043_v62  ;;  %6949 = vmatprep.subr.bf16.mxu0 %v7222_v13  ;;  %v2435_v63 = vrot.slane %v2433_v17, 5  ;;  %v2441_v36 = vrot.slane %v2439_v41, 5  ;;  %v2449_v45 = vshll.u32 %v8349_v23, 16  ;;  %v2445_v20 = vrot.slane %v2443_v38, 4 }
  0xb5   : > { %6923 = vmatprep.mubr.msk.bf16.mxu1 %vm767_vm2, %v6044_v50  ;;  %v2413_v2 = vrot.slane %v2412_v10, 4  ;;  %v2422_v53 = vor.u32 %v2421_v19, %v2417_v59  ;;  %v6024_v29 = vrot.slane %v6008_v40, 9  ;;  %6992 = vmatpush3.bf16.msra.mxu1 %v7227_v28  ;;  %v3041_v62 = vrot.slane %v8296_v9, 5  ;;  %v8415_v40 = vld [vmem:[%s7445_s10 + $0x94] sm:$0xf] }
  0xb6   : > { %v2436_v35 = vor.u32 %v2435_v63, %v2432_v34  ;;  %v2451_v54 = vrot.slane %v2449_v45, 5  ;;  %v3044_v18 = vrot.slane %v8323_v26, 5  ;;  %6993 = vmatprep.subr.bf16.mxu1 %v7228_v44  ;;  %v2446_v50 = vor.u32 %v2445_v20, %v2441_v36  ;;  %v8395_v26 = vld [vmem:[%s7445_s10 + $0x8c] sm:$0x1]  ;;  %v6010_v19 = vld [vmem:[%s7445_s10 + $0x84] sm:$0xe] }
  0xb7   : > { %6950 = vmatpush3.bf16.msra.mxu0 %v7222_v13  ;;  %v2418_v31 = vsel %vm7477_vm3, %v2413_v2, %v2417_v59  ;;  %v2423_v15 = vrot.slane %v2422_v53, 4  ;;  %v6025_v37 = vrot.slane %v6009_v48, 9  ;;  %v8391_v6 = vsel %vm7768_vm6, %v6024_v29, %v3041_v62  ;;  %v5944_v29 = vld [vmem:[%s7445_s10 + $0x9c] sm:$0xf] }
  0xb8   : > { %6951 = vmatprep.subr.bf16.mxu0 %v7223_v61  ;;  %v2437_v58 = vrot.slane %v2436_v35, 4  ;;  %v3043_v9 = vrot.slane %v3041_v62, 4  ;;  %v3048_v7 = vrot.slane %v8341_v56, 5  ;;  %v2447_v13 = vrot.slane %v2446_v50, 4 }
  0xb9   : > { %v2428_v28 = vsel %vm7477_vm3, %v2423_v15, %v2427_v51  ;;  %v3051_v1 = vrot.slane %v8349_v23, 5  ;;  %v2454_v60 = vshrl.u32 %v5938_v0, 16  ;;  %6994 = vmatpush3.bf16.msra.mxu1 %v7228_v44  ;;  %v6047_v32 = vcombine.low %v8337_v11, %v8354_v22 }
  0xba   : > { %6880 = vmatmul.mubr.msk.bf16.gmra.mxu0 %vm767_vm2, %v8191_v46  ;;  %v8408_v56 = vcombine.low %v2418_v31, %v2428_v28  ;;  %v2442_v14 = vsel %vm7477_vm3, %v2437_v58, %v2441_v36  ;;  %v3045_v55 = vsel %vm7768_vm6, %v3043_v9, %v3044_v18  ;;  %v2452_v46 = vsel %vm7477_vm3, %v2447_v13, %v2451_v54  ;;  %v6011_v36 = vld [vmem:[%s7445_s10 + $0x90] sm:$0xe] }
  0xbb   : > { %6883 = vmatprep.mubr.msk.bf16.mxu0 %vm767_vm2, %v8230_v33  ;;  %6952 = vmatpush3.bf16.msra.mxu0 %v7223_v61  ;;  %v6048_v11 = vcombine.low %v8391_v6, %v3045_v55  ;;  %v8424_v23 = vsel %vm7768_vm6, %v6025_v37, %v3048_v7  ;;  %v3050_v22 = vrot.slane %v3048_v7, 4  ;;  %v2456_v33 = vrot.slane %v2454_v60, 4 }
  0xbc   : > { %6924 = vmatmul.mubr.msk.bf16.gmra.mxu1 %vm767_vm2, %v6045_v21  ;;  %v2457_v24 = vshll.u32 %v5938_v0, 16  ;;  %v2463_v12 = vshll.u32 %v8387_v4, 16  ;;  %v2467_v44 = vshrl.u32 %v8387_v4, 16  ;;  %6953 = vmatprep.subr.bf16.mxu0 %v7224_v43  ;;  %v8441_v59 = vcombine.low %v2442_v14, %v2452_v46  ;;  %v8466_v0 = vld [vmem:[%s7445_s10 + $0xa0] sm:$0xf] }
  0xbd   : > { %6927 = vmatprep.mubr.msk.bf16.mxu1 %vm767_vm2, %v6046_v42  ;;  %v2473_v49 = vshll.u32 %v8395_v26, 16  ;;  %v2478_v27 = vshrl.u32 %v5941_v52, 16  ;;  %v2481_v21 = vshll.u32 %v5941_v52, 16  ;;  %v8449_v17 = vsel %vm7768_vm6, %v3050_v22, %v3051_v1  ;;  %v5947_v52 = vld [vmem:[%s7445_s10 + $0xa8] sm:$0xf] }
  0xbe   : > { %v2459_v41 = vrot.slane %v2457_v24, 5  ;;  %v2465_v48 = vrot.slane %v2463_v12, 5  ;;  %v2469_v10 = vrot.slane %v2467_v44, 4  ;;  %v2487_v51 = vshll.u32 %v8415_v40, 16  ;;  %v5948_v46 = vld [vmem:[%s7445_s10 + $0xac] sm:$0xf] }
  0xbf   : > { %v2475_v8 = vrot.slane %v2473_v49, 5  ;;  %v2480_v25 = vrot.slane %v2478_v27, 4  ;;  %v2483_v42 = vrot.slane %v2481_v21, 5  ;;  %6954 = vmatpush3.bf16.msra.mxu0 %v7224_v43  ;;  %v2491_v34 = vshrl.u32 %v8415_v40, 16  ;;  %v8490_v43 = vld [vmem:[%s7445_s10 + $0xa4] sm:$0x1] }
  0xc0   : > { %v2460_v61 = vor.u32 %v2459_v41, %v2456_v33  ;;  %v2470_v38 = vor.u32 %v2469_v10, %v2465_v48  ;;  %v2497_v63 = vshll.u32 %v8445_v5, 16  ;;  %7027 = vmatprep.subr.bf16.mxu0 %v8429_v16  ;;  %v8457_v2 = vrot.slane %v2487_v51, 5  ;;  %v5949_v24 = vld [vmem:[%s7445_s10 + $0xb0] sm:$0x1]  ;;  %v6012_v27 = vld [vmem:[%s7445_s10 + $0x9c] sm:$0xe] }
  0xc1   : > { %v2484_v45 = vor.u32 %v2483_v42, %v2480_v25  ;;  %v6026_v53 = vrot.slane %v6010_v19, 9  ;;  %v3055_v20 = vrot.slane %v8387_v4, 5  ;;  %v6049_v35 = vcombine.low %v8424_v23, %v8449_v17  ;;  %v6013_v10 = vld [vmem:[%s7445_s10 + $0xa8] sm:$0xe] }
  0xc2   : > { %6884 = vmatmul.mubr.msk.bf16.gmra.mxu0 %vm767_vm2, %v8265_v57  ;;  %v2461_v54 = vrot.slane %v2460_v61, 4  ;;  %v2471_v62 = vrot.slane %v2470_v38, 4  ;;  %v2493_v18 = vrot.slane %v2491_v34, 4  ;;  %v8472_v15 = vrot.slane %v2497_v63, 5 }
  0xc3   : > { %6887 = vmatprep.mubr.msk.bf16.mxu0 %vm767_vm2, %v8316_v47  ;;  %v8470_v31 = vrot.slane %v2484_v45, 4  ;;  %v3057_v50 = vrot.slane %v3055_v20, 4  ;;  %v3058_v37 = vrot.slane %v8395_v26, 5  ;;  %v6027_v6 = vrot.slane %v6011_v36, 9 }
  0xc4   : > { %6928 = vmatmul.mubr.msk.bf16.gmra.mxu1 %vm767_vm2, %v6047_v32  ;;  %v2466_v57 = vsel %vm7477_vm3, %v2461_v54, %v2465_v48  ;;  %v2476_v4 = vsel %vm7477_vm3, %v2471_v62, %v2475_v8  ;;  %v2494_v58 = vor.u32 %v2493_v18, %v8457_v2  ;;  %v3056_v9 = vsel %vm7768_vm6, %v6026_v53, %v3055_v20  ;;  %v5950_v18 = vld [vmem:[%s7445_s10 + $0xb4] sm:$0xf] }
  0xc5   : > { %6931 = vmatprep.mubr.msk.bf16.mxu1 %vm767_vm2, %v6048_v11  ;;  %v8482_v47 = vcombine.low %v2466_v57, %v2476_v4  ;;  %v3059_v7 = vsel %vm7768_vm6, %v3057_v50, %v3058_v37  ;;  %v3062_v26 = vrot.slane %v8415_v40, 5  ;;  %v2490_v28 = vsel %vm7477_vm3, %v8470_v31, %v8457_v2  ;;  %v8536_v37 = vld [vmem:[%s7445_s10 + $0xb8] sm:$0xf]  ;;  %v8539_v57 = vld [vmem:[%s7445_s10 + $0xbc] sm:$0x1] }
  0xc6   : > { %v2495_v13 = vrot.slane %v2494_v58, 4  ;;  %v3065_v1 = vrot.slane %v8445_v5, 5  ;;  %v2502_v60 = vshrl.u32 %v5944_v29, 16  ;;  %v2505_v55 = vshll.u32 %v5944_v29, 16 }
  0xc7   : > { %v8500_v32 = vsel %vm7768_vm6, %v6027_v6, %v3062_v26  ;;  %v3064_v14 = vrot.slane %v3062_v26, 4  ;;  %v2511_v40 = vshll.u32 %v8466_v0, 16  ;;  %v6050_v11 = vcombine.low %v3056_v9, %v3059_v7  ;;  %v5953_v7 = vld [vmem:[%s7445_s10 + $0xc0] sm:$0xf] }
  0xc8   : > { %v2504_v23 = vrot.slane %v2502_v60, 4  ;;  %v2515_v22 = vshrl.u32 %v8466_v0, 16  ;;  %v2521_v33 = vshll.u32 %v8490_v43, 16  ;;  %v2500_v12 = vsel %vm7477_vm3, %v2495_v13, %v8472_v15  ;;  %v8553_v60 = vld [vmem:[%s7445_s10 + $0xc4] sm:$0xf] }
  0xc9   : > { %v3066_v44 = vsel %vm7768_vm6, %v3064_v14, %v3065_v1  ;;  %v2507_v49 = vrot.slane %v2505_v55, 5  ;;  %v2513_v5 = vrot.slane %v2511_v40, 5  ;;  %v2526_v48 = vshrl.u32 %v5947_v52, 16 }
  0xca   : > { %6888 = vmatmul.mubr.msk.bf16.gmra.mxu0 %vm767_vm2, %v8343_v3  ;;  %v6051_v21 = vcombine.low %v8500_v32, %v3066_v44  ;;  %v2517_v17 = vrot.slane %v2515_v22, 4  ;;  %v2523_v41 = vrot.slane %v2521_v33, 5  ;;  %v2529_v8 = vshll.u32 %v5947_v52, 16  ;;  %v5955_v33 = vld [vmem:[%s7445_s10 + $0xc8] sm:$0x1] }
  0xcb   : > { %6891 = vmatprep.mubr.msk.bf16.mxu0 %vm767_vm2, %v8408_v56  ;;  %v2508_v19 = vor.u32 %v2507_v49, %v2504_v23  ;;  %v2535_v25 = vshll.u32 %v5948_v46, 16  ;;  %v2539_v42 = vshrl.u32 %v5948_v46, 16  ;;  %v2528_v61 = vrot.slane %v2526_v48, 4 }
  0xcc   : > { %6932 = vmatmul.mubr.msk.bf16.gmra.mxu1 %vm767_vm2, %v6049_v35  ;;  %v2518_v51 = vor.u32 %v2517_v17, %v2513_v5  ;;  %v2545_v38 = vshll.u32 %v5949_v24, 16  ;;  %v6028_v3 = vrot.slane %v6012_v27, 9  ;;  %v2531_v63 = vrot.slane %v2529_v8, 5 }
  0xcd   : > { %6935 = vmatprep.mubr.msk.bf16.mxu1 %vm767_vm2, %v6050_v11  ;;  %v2509_v34 = vrot.slane %v2508_v19, 4  ;;  %v8521_v36 = vrot.slane %v2535_v25, 5  ;;  %v2541_v56 = vrot.slane %v2539_v42, 4  ;;  %v3069_v53 = vrot.slane %v8466_v0, 5  ;;  %v6015_v25 = vld [vmem:[%s7445_s10 + $0xc0] sm:$0xe] }
  0xce   : > { %v2519_v45 = vrot.slane %v2518_v51, 4  ;;  %v8523_v2 = vrot.slane %v2545_v38, 5  ;;  %v3072_v20 = vrot.slane %v8490_v43, 5  ;;  %v2532_v35 = vor.u32 %v2531_v63, %v2528_v61 }
  0xcf   : > { %v2514_v29 = vsel %vm7477_vm3, %v2509_v34, %v2513_v5  ;;  %v2542_v54 = vor.u32 %v2541_v56, %v8521_v36  ;;  %v6029_v62 = vrot.slane %v6013_v10, 9  ;;  %v3070_v15 = vsel %vm7768_vm6, %v6028_v3, %v3069_v53  ;;  %v6014_v5 = vld [vmem:[%s7445_s10 + $0xb4] sm:$0xe]  ;;  %v6152_v3 = vld [vmem:[%s7445_s10 + $0x18] sm:$0xf] }
  0xd0   : > { %v2524_v31 = vsel %vm7477_vm3, %v2519_v45, %v2523_v41  ;;  %v3071_v50 = vrot.slane %v3069_v53, 4  ;;  %v3076_v0 = vrot.slane %v5948_v46, 5  ;;  %v5975_v4 = vcombine.low %v2490_v28, %v2500_v12 }
  0xd1   : > { %v8541_v58 = vrot.slane %v2532_v35, 4  ;;  %v8543_v6 = vrot.slane %v2542_v54, 4  ;;  %v3079_v9 = vrot.slane %v5949_v24, 5  ;;  %v2550_v1 = vshrl.u32 %v5950_v18, 16 }
  0xd2   : > { %6892 = vmatmul.mubr.msk.bf16.gmra.mxu0 %vm767_vm2, %v8441_v59  ;;  %v3073_v26 = vsel %vm7768_vm6, %v3071_v50, %v3072_v20  ;;  %v3077_v43 = vsel %vm7768_vm6, %v6029_v62, %v3076_v0  ;;  %v3078_v13 = vrot.slane %v3076_v0, 4  ;;  %v5976_v28 = vcombine.low %v2514_v29, %v2524_v31  ;;  %v8588_v29 = vld [vmem:[%s7445_s10 + $0x1c] sm:$0xf] }
  0xd3   : > { %6895 = vmatprep.mubr.msk.bf16.mxu0 %vm767_vm2, %v8482_v47  ;;  %v2538_v59 = vsel %vm7477_vm3, %v8541_v58, %v8521_v36  ;;  %v6052_v52 = vcombine.low %v3070_v15, %v3073_v26  ;;  %v2553_v32 = vshll.u32 %v5950_v18, 16  ;;  %v2548_v14 = vsel %vm7477_vm3, %v8543_v6, %v8523_v2  ;;  %v8602_v6 = vld [vmem:[%s7445_s10 + $0x20] sm:$0x1] }
  0xd4   : > { %6936 = vmatmul.mubr.msk.bf16.gmra.mxu1 %vm767_vm2, %v6051_v21  ;;  %v3080_v55 = vsel %vm7768_vm6, %v3078_v13, %v3079_v9  ;;  %v2552_v47 = vrot.slane %v2550_v1, 4  ;;  %v2559_v40 = vshll.u32 %v8536_v37, 16  ;;  %v2563_v23 = vshrl.u32 %v8536_v37, 16  ;;  %v6155_v9 = vld [vmem:[%s7445_s10 + $0x24] sm:$0xf] }
  0xd5   : > { %6939 = vmatprep.mubr.msk.bf16.mxu1 %vm767_vm2, %v6052_v52  ;;  %v6053_v46 = vcombine.low %v3077_v43, %v3080_v55  ;;  %v2555_v11 = vrot.slane %v2553_v32, 5  ;;  %v2569_v22 = vshll.u32 %v8539_v57, 16  ;;  %v2574_v12 = vshrl.u32 %v5953_v7, 16  ;;  %v8612_v52 = vld [vmem:[%s7445_s10 + $0x28] sm:$0xf] }
  0xd6   : > { %v2561_v24 = vrot.slane %v2559_v40, 5  ;;  %v2577_v44 = vshll.u32 %v5953_v7, 16  ;;  %v2583_v49 = vshll.u32 %v8553_v60, 16  ;;  %v2565_v21 = vrot.slane %v2563_v23, 4  ;;  %v8619_v55 = vld [vmem:[%s7445_s10 + $0x2c] sm:$0x1] }
  0xd7   : > { %v2556_v27 = vor.u32 %v2555_v11, %v2552_v47  ;;  %v2571_v17 = vrot.slane %v2569_v22, 5  ;;  %v2587_v41 = vshrl.u32 %v8553_v60, 16  ;;  %v2576_v48 = vrot.slane %v2574_v12, 4 }
  0xd8   : > { %v2579_v10 = vrot.slane %v2577_v44, 5  ;;  %v8576_v19 = vrot.slane %v2583_v49, 5  ;;  %v2593_v8 = vshll.u32 %v5955_v33, 16  ;;  %v2566_v51 = vor.u32 %v2565_v21, %v2561_v24 }
  0xd9   : > { %v2557_v42 = vrot.slane %v2556_v27, 4  ;;  %v2589_v61 = vrot.slane %v2587_v41, 4  ;;  %v6030_v38 = vrot.slane %v6014_v5, 9  ;;  %v3083_v36 = vrot.slane %v8536_v37, 5 }
  0xda   : > { %6896 = vmatmul.mubr.msk.bf16.gmra.mxu0 %vm767_vm2, %v5975_v4  ;;  %v2580_v34 = vor.u32 %v2579_v10, %v2576_v48  ;;  %v2595_v63 = vrot.slane %v2593_v8, 5  ;;  %v3086_v56 = vrot.slane %v8539_v57, 5  ;;  %v2567_v2 = vrot.slane %v2566_v51, 4 }
  0xdb   : > { %6899 = vmatprep.mubr.msk.bf16.mxu0 %vm767_vm2, %v5976_v28  ;;  %v2562_v45 = vsel %vm7477_vm3, %v2557_v42, %v2561_v24  ;;  %v2590_v53 = vor.u32 %v2589_v61, %v8576_v19  ;;  %v6031_v20 = vrot.slane %v6015_v25, 9  ;;  %v3084_v54 = vsel %vm7768_vm6, %v6030_v38, %v3083_v36  ;;  %v8624_v24 = vld [vmem:[%s7445_s10 + $0x34] sm:$0xf]  ;;  %v7229_v25 = vld [vmem:[%s7445_s10 + $0x18] sm:$0xff]  }
  0xdc   : > { %6940 = vmatmul.mubr.msk.bf16.gmra.mxu1 %vm767_vm2, %v6053_v46  ;;  %v2581_v35 = vrot.slane %v2580_v34, 4  ;;  %v3085_v62 = vrot.slane %v3083_v36, 4  ;;  %v3090_v18 = vrot.slane %v8553_v60, 5  ;;  %v2572_v31 = vsel %vm7477_vm3, %v2567_v2, %v2571_v17 }
  0xdd   : > { %v2591_v15 = vrot.slane %v2590_v53, 4  ;;  %v3093_v50 = vrot.slane %v5955_v33, 5  ;;  %v3856_v0 = vshrl.u32 %v6152_v3, 16  ;;  %v5977_v37 = vcombine.low %v2538_v59, %v2548_v14  ;;  %v6158_v33 = vld [vmem:[%s7445_s10 + $0x30] sm:$0xf] }
  0xde   : > { %v5978_v57 = vcombine.low %v2562_v45, %v2572_v31  ;;  %v2586_v4 = vsel %vm7477_vm3, %v2581_v35, %v8576_v19  ;;  %v3087_v58 = vsel %vm7768_vm6, %v3085_v62, %v3086_v56  ;;  %v3091_v43 = vsel %vm7768_vm6, %v6031_v20, %v3090_v18  ;;  %v8643_v62 = vld [vmem:[%s7445_s10 + $0x40] sm:$0xf] }
  0xdf   : > { %v2596_v7 = vsel %vm7477_vm3, %v2591_v15, %v2595_v63  ;;  %v6054_v26 = vcombine.low %v3084_v54, %v3087_v58  ;;  %v3092_v13 = vrot.slane %v3090_v18, 4  ;;  %v3858_v1 = vrot.slane %v3856_v0, 4  ;;  %v8633_v63 = vld [vmem:[%s7445_s10 + $0x38] sm:$0x1]  ;;  %v6161_v54 = vld [vmem:[%s7445_s10 + $0x3c] sm:$0xf] }
  0xe0   : > { %v3859_v60 = vshll.u32 %v6152_v3, 16  ;;  %v3865_v28 = vshll.u32 %v8588_v29, 16  ;;  %v3869_v59 = vshrl.u32 %v8588_v29, 16  ;;  %v3875_v14 = vshll.u32 %v8602_v6, 16 }
  0xe1   : > { %6943 = vmatprep.mubr.msk.bf16.mxu1 %vm767_vm2, %v6054_v26  ;;  %v3094_v32 = vsel %vm7768_vm6, %v3092_v13, %v3093_v50  ;;  %v3880_v47 = vshrl.u32 %v6155_v9, 16  ;;  %v3883_v40 = vshll.u32 %v6155_v9, 16  ;;  %v3889_v5 = vshll.u32 %v8612_v52, 16 }
  0xe2   : > { %6900 = vmatmul.mubr.msk.bf16.gmra.mxu0 %vm767_vm2, %v5977_v37  ;;  %v6055_v46 = vcombine.low %v3091_v43, %v3094_v32  ;;  %v3861_v11 = vrot.slane %v3859_v60, 5  ;;  %v3867_v23 = vrot.slane %v3865_v28, 5  ;;  %v3871_v22 = vrot.slane %v3869_v59, 4 }
  0xe3   : > { %6903 = vmatprep.mubr.msk.bf16.mxu0 %vm767_vm2, %v5978_v57  ;;  %v3877_v12 = vrot.slane %v3875_v14, 5  ;;  %v3882_v44 = vrot.slane %v3880_v47, 4  ;;  %v3885_v49 = vrot.slane %v3883_v40, 5  ;;  %v3893_v17 = vshrl.u32 %v8612_v52, 16  ;;  %v8657_v14 = vld [vmem:[%s7445_s10 + $0x44] sm:$0x1] }
  0xe4   : > { %6944 = vmatmul.mubr.msk.bf16.gmra.mxu1 %vm767_vm2, %v6055_v46  ;;  %v3862_v27 = vor.u32 %v3861_v11, %v3858_v1  ;;  %v3872_v21 = vor.u32 %v3871_v22, %v3867_v23  ;;  %v3899_v41 = vshll.u32 %v8619_v55, 16  ;;  %v5979_v48 = vcombine.low %v2586_v4, %v2596_v7 }
  0xe5   : > { %v3886_v19 = vor.u32 %v3885_v49, %v3882_v44  ;;  %v3891_v8 = vrot.slane %v3889_v5, 5  ;;  %v3895_v61 = vrot.slane %v3893_v17, 4  ;;  %v3904_v36 = vshrl.u32 %v6158_v33, 16  ;;  %v7232_v17 = vld [vmem:[%s7445_s10 + $0x30] sm:$0xff]  }
  0xe6   : > { %v6757_v10 = vpop.f32.mrf.mxu1  ;;  %v3863_v42 = vrot.slane %v3862_v27, 4  ;;  %v3873_v51 = vrot.slane %v3872_v21, 4  ;;  %v3901_v38 = vrot.slane %v3899_v41, 5  ;;  %v3907_v56 = vshll.u32 %v6158_v33, 16  ;;  %v6164_v33 = vld [vmem:[%s7445_s10 + $0x48] sm:$0xf] }
  0xe7   : > { %v3887_v34 = vrot.slane %v3886_v19, 4  ;;  %v3913_v45 = vshll.u32 %v8624_v24, 16  ;;  %v3896_v20 = vor.u32 %v3895_v61, %v3891_v8  ;;  %v3917_v35 = vshrl.u32 %v8624_v24, 16  ;;  %v7235_v61 = vld [vmem:[%s9731_s1 + $0x110] sm:$0xff]  }
  0xe8   : > { %v1163_v3 = vpop.f32.mrf.mxu1  ;;  %v3868_v2 = vsel %vm7477_vm3, %v3863_v42, %v3867_v23  ;;  %v3878_v53 = vsel %vm7477_vm3, %v3873_v51, %v3877_v12  ;;  %v3906_v50 = vrot.slane %v3904_v36, 4  ;;  %v3909_v0 = vrot.slane %v3907_v56, 5  ;;  %v7231_v12 = vld [vmem:[%s7445_s10 + $0x24] sm:$0xff]  }
  0xe9   : > { %v6208_v18 = vcombine.low %v3868_v2, %v3878_v53  ;;  %v3892_v31 = vsel %vm7477_vm3, %v3887_v34, %v3891_v8  ;;  %v3897_v37 = vrot.slane %v3896_v20, 4  ;;  %v3915_v57 = vrot.slane %v3913_v45, 5  ;;  %v8670_v8 = vld [vmem:[%s7445_s10 + $0x4c] sm:$0xf]  ;;  %v6167_v20 = vld [vmem:[%s7445_s10 + $0x54] sm:$0xf] }
  0xea   : > { %v6758_v15 = vpop.f32.mrf.mxu1  ;;  %6904 = vmatmul.mubr.msk.bf16.gmra.mxu0 %vm767_vm2, %v5979_v48  ;;  %v3919_v4 = vrot.slane %v3917_v35, 4  ;;  %v3923_v58 = vshll.u32 %v8633_v63, 16  ;;  %v3910_v26 = vor.u32 %v3909_v0, %v3906_v50  ;;  %v3928_v43 = vshrl.u32 %v6161_v54, 16 }
  0xeb   : > { %6955 = vmatprep.mubr.msk.bf16.mxu0 %vm767_vm2, %v7229_v25  ;;  %v6717_v9 = vpop.f32.mrf.mxu0  ;;  %6995 = vmatprep.mubr.msk.bf16.mxu1 %vm767_vm2, %v6208_v18  ;;  %v3931_v13 = vshll.u32 %v6161_v54, 16  ;;  %v3937_v1 = vshll.u32 %v8643_v62, 16  ;;  %v3902_v28 = vsel %vm7477_vm3, %v3897_v37, %v3901_v38  ;;  %v3941_v27 = vshrl.u32 %v8643_v62, 16  ;;  %v8680_v38 = vld [vmem:[%s7445_s10 + $0x50] sm:$0x1] }
  0xec   : > { %v1166_v7 = vpop.f32.mrf.mxu1  ;;  %v8652_v60 = vadd.f32 %v6757_v10, %v6717_v9  ;;  %v3920_v59 = vor.u32 %v3919_v4, %v3915_v57  ;;  %v3925_v32 = vrot.slane %v3923_v58, 5  ;;  %v6209_v40 = vcombine.low %v3892_v31, %v3902_v28  ;;  %v8697_v58 = vld [vmem:[%s7445_s10 + $0x5c] sm:$0x1]  ;;  %v7240_v9 = vld [vmem:[%s9731_s1 + $0x108] sm:$0xff]  }
  0xed   : > { %v850_v47 = vpop.f32.mrf.mxu0  ;;  %v3911_v11 = vrot.slane %v3910_v26, 4  ;;  %v3930_v23 = vrot.slane %v3928_v43, 4  ;;  %v3933_v22 = vrot.slane %v3931_v13, 5  ;;  %v3939_v5 = vrot.slane %v3937_v1, 5  ;;  %v6170_v1 = vld [vmem:[%s7445_s10 + $0x60] sm:$0xf] }
  0xee   : > { %v6761_v46 = vpop.f32.mrf.mxu1  ;;  %v8661_v44 = vadd.f32 %v1163_v3, %v850_v47  ;;  %v3921_v49 = vrot.slane %v3920_v59, 4  ;;  %6996 = vmatmul.mubr.msk.bf16.vlgmr.msra.gmra.mxu1 %vm767_vm2, %v6209_v40  ;;  %v3947_v19 = vshll.u32 %v8657_v14, 16  ;;  %v3943_v51 = vrot.slane %v3941_v27, 4  ;;  %v7234_v59 = vld [vmem:[%s7445_s10 + $0x48] sm:$0xff]   ;;  %v7245_v27 = vld [vmem:[%s9731_s1 + $0x100] sm:$0xff]  }
  0xef   : > { %v6718_v21 = vpop.f32.mrf.mxu0  ;;  %v3916_v41 = vsel %vm7477_vm3, %v3911_v11, %v3915_v57  ;;  %v3934_v10 = vor.u32 %v3933_v22, %v3930_v23  ;;  %v3952_v3 = vshrl.u32 %v6164_v33, 16  ;;  %v3955_v53 = vshll.u32 %v6164_v33, 16 }
  0xf0   : > { %v1179_v48 = vpop.f32.mrf.mxu1  ;;  %v8672_v25 = vadd.f32 %v6758_v15, %v6718_v21  ;;  %v3926_v42 = vsel %vm7477_vm3, %v3921_v49, %v3925_v32  ;;  %v3949_v45 = vrot.slane %v3947_v19, 5  ;;  %v3944_v54 = vor.u32 %v3943_v51, %v3939_v5  ;;  %v8688_v15 = vld [vmem:[%s7445_s10 + $0x58] sm:$0xf] }
  0xf1   : > { %v853_v34 = vpop.f32.mrf.mxu0  ;;  %v6210_v36 = vcombine.low %v3916_v41, %v3926_v42  ;;  %v3935_v56 = vrot.slane %v3934_v10, 4  ;;  %v3954_v18 = vrot.slane %v3952_v3, 4  ;;  %v3961_v31 = vshll.u32 %v8670_v8, 16 }
  0xf2   : > { %v6762_v2 = vpop.f32.mrf.mxu1  ;;  %6956 = vmatmul.mubr.msk.bf16.vlgmr.msra.gmra.mxu0 %vm767_vm2, %v7231_v12  ;;  %v8684_v35 = vadd.f32 %v1166_v7, %v853_v34  ;;  %v3957_v37 = vrot.slane %v3955_v53, 5  ;;  %v3965_v57 = vshrl.u32 %v8670_v8, 16  ;;  %v3971_v4 = vshll.u32 %v8680_v38, 16 }
  0xf3   : > { %7028 = vmatpush3.bf16.msra.mxu0 %v8429_v16  ;;  %6959 = vmatprep.mubr.msk.bf16.mxu0 %vm767_vm2, %v7232_v17  ;;  %v3940_v50 = vsel %vm7477_vm3, %v3935_v56, %v3939_v5  ;;  %v7233_v16 = vld [vmem:[%s7445_s10 + $0x3c] sm:$0xff]   ;;  %v3945_v7 = vrot.slane %v3944_v54, 4  ;;  %v3963_v26 = vrot.slane %v3961_v31, 5  ;;  %v3976_v43 = vshrl.u32 %v6167_v20, 16  ;;  %v8712_v5 = vld [vmem:[%s7445_s10 + $0x64] sm:$0xf] }
  0xf4   : > { %v1182_v0 = vpop.f32.mrf.mxu1  ;;  %6999 = vmatprep.mubr.msk.bf16.mxu1 %vm767_vm2, %v6210_v36  ;;  %7029 = vmatprep.subr.bf16.mxu0 %v7235_v61  ;;  %v3979_v13 = vshll.u32 %v6167_v20, 16  ;;  %v3958_v32 = vor.u32 %v3957_v37, %v3954_v18  ;;  %v3967_v47 = vrot.slane %v3965_v57, 4  ;;  %v3973_v40 = vrot.slane %v3971_v4, 5 }
  0xf5   : > { %v6721_v28 = vpop.f32.mrf.mxu0  ;;  %v3985_v11 = vshll.u32 %v8688_v15, 16  ;;  %v3950_v22 = vsel %vm7477_vm3, %v3945_v7, %v3949_v45  ;;  %v3978_v12 = vrot.slane %v3976_v43, 4  ;;  %v3989_v3 = vshrl.u32 %v8688_v15, 16  ;;  %v8725_v45 = vld [vmem:[%s7445_s10 + $0x68] sm:$0x1] }
  0xf6   : > { %v8707_v23 = vadd.f32 %v6761_v46, %v6721_v28  ;;  %v6765_v33 = vpop.f32.mrf.mxu1  ;;  %v3981_v49 = vrot.slane %v3979_v13, 5  ;;  %v6211_v17 = vcombine.low %v3940_v50, %v3950_v22  ;;  %v3959_v41 = vrot.slane %v3958_v32, 4  ;;  %v6173_v50 = vld [vmem:[%s7445_s10 + $0x6c] sm:$0xf]  ;;  %v8736_v43 = vld [vmem:[%s7445_s10 + $0x70] sm:$0xf] }
  0xf7   : > { %v866_v21 = vpop.f32.mrf.mxu0  ;;  %7030 = vmatpush3.bf16.msra.mxu0 %v7235_v61  ;;  %v3968_v10 = vor.u32 %v3967_v47, %v3963_v26  ;;  %v3987_v46 = vrot.slane %v3985_v11, 5  ;;  %v3995_v34 = vshll.u32 %v8697_v58, 16  ;;  %v3991_v54 = vrot.slane %v3989_v3, 4  ;;  %v7236_v22 = vld [vmem:[%s7445_s10 + $0x54] sm:$0xff]  }
  0xf8   : > { %v8717_v19 = vadd.f32 %v1179_v48, %v866_v21  ;;  %v1195_v42 = vpop.f32.mrf.mxu1  ;;  %v3982_v51 = vor.u32 %v3981_v49, %v3978_v12  ;;  %7031 = vmatprep.subr.bf16.mxu0 %v7240_v9  ;;  %7000 = vmatmul.mubr.msk.bf16.gmra.mxu1 %vm767_vm2, %v6211_v17  ;;  %v3964_v56 = vsel %vm7477_vm3, %v3959_v41, %v3963_v26  ;;  %v4000_v48 = vshrl.u32 %v6170_v1, 16  ;;  %v7237_v17 = vld [vmem:[%s7445_s10 + $0x60] sm:$0xff]  }
  0xf9   : > { %v6722_v36 = vpop.f32.mrf.mxu0  ;;  %v3969_v61 = vrot.slane %v3968_v10, 4  ;;  %v3997_v18 = vrot.slane %v3995_v34, 5  ;;  %v4003_v7 = vshll.u32 %v6170_v1, 16  ;;  %v4009_v26 = vshll.u32 %v8712_v5, 16 }
  0xfa   : > { %6960 = vmatmul.mubr.msk.bf16.gmra.mxu0 %vm767_vm2, %v7233_v16  ;;  %v8728_v53 = vadd.f32 %v6762_v2, %v6722_v36  ;;  %v3983_v20 = vrot.slane %v3982_v51, 4  ;;  %v6766_v31 = vpop.f32.mrf.mxu1  ;;  %v4002_v4 = vrot.slane %v4000_v48, 4  ;;  %v3992_v28 = vor.u32 %v3991_v54, %v3987_v46  ;;  %v8751_v51 = vld [vmem:[%s7445_s10 + $0x74] sm:$0x1]  ;;  %v6176_v48 = vld [vmem:[%s7445_s10 + $0x78] sm:$0xf] }
  0xfb   : > { %v869_v37 = vpop.f32.mrf.mxu0  ;;  %6963 = vmatprep.mubr.msk.bf16.mxu0 %vm767_vm2, %v7234_v59  ;;  %v3974_v57 = vsel %vm7477_vm3, %v3969_v61, %v3973_v40  ;;  %7032 = vmatpush3.bf16.msra.mxu0 %v7240_v9  ;;  %v4005_v32 = vrot.slane %v4003_v7, 5  ;;  %v4011_v47 = vrot.slane %v4009_v26, 5  ;;  %v4013_v1 = vshrl.u32 %v8712_v5, 16  ;;  %v8762_v26 = vld [vmem:[%s7445_s10 + $0x7c] sm:$0xf] }
  0xfc   : > { %v8738_v2 = vadd.f32 %v1182_v0, %v869_v37  ;;  %v6212_v16 = vcombine.low %v3964_v56, %v3974_v57  ;;  %v3988_v13 = vsel %vm7477_vm3, %v3983_v20, %v3987_v46  ;;  %v1198_v59 = vpop.f32.mrf.mxu1  ;;  %7033 = vmatprep.subr.bf16.mxu0 %v7245_v27  ;;  %v4019_v40 = vshll.u32 %v8725_v45, 16 }
  0xfd   : > { %v3993_v0 = vrot.slane %v3992_v28, 4  ;;  %v4024_v9 = vshrl.u32 %v6173_v50, 16  ;;  %v4027_v12 = vshll.u32 %v6173_v50, 16  ;;  %v4033_v49 = vshll.u32 %v8736_v43, 16 }
  0xfe   : > { %v6725_v11 = vpop.f32.mrf.mxu0  ;;  %7003 = vmatprep.mubr.msk.bf16.mxu1 %vm767_vm2, %v6212_v16  ;;  %v4006_v10 = vor.u32 %v4005_v32, %v4002_v4  ;;  %v4015_v46 = vrot.slane %v4013_v1, 4  ;;  %v4021_v36 = vrot.slane %v4019_v40, 5  ;;  %v4037_v7 = vshrl.u32 %v8736_v43, 16 }
  0xff   : > { %v8747_v21 = vadd.f32 %v6765_v33, %v6725_v11  ;;  %v6769_v41 = vpop.f32.mrf.mxu1  ;;  %7034 = vmatpush3.bf16.msra.mxu0 %v7245_v27  ;;  %v3998_v34 = vsel %vm7477_vm3, %v3993_v0, %v3997_v18  ;;  %v4026_v56 = vrot.slane %v4024_v9, 4  ;;  %v4029_v61 = vrot.slane %v4027_v12, 5  ;;  %v8771_v0 = vld [vmem:[%s7445_s10 + $0x80] sm:$0x1] }
 0x100   : > { %v882_v3 = vpop.f32.mrf.mxu0  ;;  %v6213_v33 = vcombine.low %v3988_v13, %v3998_v34  ;;  %v4007_v54 = vrot.slane %v4006_v10, 4  ;;  %v4016_v50 = vor.u32 %v4015_v46, %v4011_v47  ;;  %v4035_v27 = vrot.slane %v4033_v49, 5  ;;  %v6179_v10 = vld [vmem:[%s7445_s10 + $0x84] sm:$0xf] }
 0x101   : > { %v8756_v20 = vadd.f32 %v1195_v42, %v882_v3  ;;  %v1211_v37 = vpop.f32.mrf.mxu1  ;;  %v4030_v4 = vor.u32 %v4029_v61, %v4026_v56  ;;  %v4043_v18 = vshll.u32 %v8751_v51, 16  ;;  %v4048_v32 = vshrl.u32 %v6176_v48, 16  ;;  %v7238_v3 = vld [vmem:[%s7445_s10 + $0x6c] sm:$0xff]  }
 0x102   : > { %6964 = vmatmul.mubr.msk.bf16.gmra.mxu0 %vm767_vm2, %v7236_v22  ;;  %v6726_v57 = vpop.f32.mrf.mxu0  ;;  %7004 = vmatmul.mubr.msk.bf16.gmra.mxu1 %vm767_vm2, %v6213_v33  ;;  %v4012_v16 = vsel %vm7477_vm3, %v4007_v54, %v4011_v47  ;;  %v4017_v13 = vrot.slane %v4016_v50, 4  ;;  %v4039_v11 = vrot.slane %v4037_v7, 4  ;;  %v8783_v54 = vld [vmem:[%s7445_s10 + $0x88] sm:$0xf]  ;;  %v4061_v50 = vshrl.u32 %v8762_v26, 16 }
 0x103   : > { %v8765_v42 = vadd.f32 %v6766_v31, %v6726_v57  ;;  %6967 = vmatprep.mubr.msk.bf16.mxu0 %vm767_vm2, %v7237_v17  ;;  %v6770_v28 = vpop.f32.mrf.mxu1  ;;  %v4031_v40 = vrot.slane %v4030_v4, 4  ;;  %v4045_v22 = vrot.slane %v4043_v18, 5  ;;  %v4051_v31 = vshll.u32 %v6176_v48, 16  ;;  %v7239_v48 = vld [vmem:[%s7445_s10 + $0x78] sm:$0xff]  }
 0x104   : > { %v885_v1 = vpop.f32.mrf.mxu0  ;;  %v4022_v12 = vsel %vm7477_vm3, %v4017_v13, %v4021_v36  ;;  %v4050_v47 = vrot.slane %v4048_v32, 4  ;;  %v4057_v17 = vshll.u32 %v8762_v26, 16  ;;  %v4040_v61 = vor.u32 %v4039_v11, %v4035_v27 }
 0x105   : > { %v8773_v9 = vadd.f32 %v1198_v59, %v885_v1  ;;  %v1214_v49 = vpop.f32.mrf.mxu1  ;;  %v6214_v34 = vcombine.low %v4012_v16, %v4022_v12  ;;  %v4036_v56 = vsel %vm7477_vm3, %v4031_v40, %v4035_v27  ;;  %v4053_v33 = vrot.slane %v4051_v31, 5  ;;  %v8794_v40 = vld [vmem:[%s7445_s10 + $0x8c] sm:$0x1] }
 0x106   : > { %v6729_v46 = vpop.f32.mrf.mxu0  ;;  %v4059_v36 = vrot.slane %v4057_v17, 5  ;;  %v4067_v57 = vshll.u32 %v8771_v0, 16  ;;  %v4041_v7 = vrot.slane %v4040_v61, 4  ;;  %v4072_v27 = vshrl.u32 %v6179_v10, 16 }
 0x107   : > { %9750 = vst [vmem:[#allocation5_spill] sm:$0xff] %v8773_v9  ;;  %v8785_v59 = vadd.f32 %v6769_v41, %v6729_v46  ;;  %7007 = vmatprep.mubr.msk.bf16.mxu1 %vm767_vm2, %v6214_v34  ;;  %v4054_v16 = vor.u32 %v4053_v33, %v4050_v47  ;;  %v4075_v13 = vshll.u32 %v6179_v10, 16  ;;  %v4063_v1 = vrot.slane %v4061_v50, 4 }
 0x108   : > { %v898_v4 = vpop.f32.mrf.mxu0  ;;  %v6773_v18 = vpop.f32.mrf.mxu1  ;;  %v4069_v41 = vrot.slane %v4067_v57, 5  ;;  %v4081_v11 = vshll.u32 %v8783_v54, 16  ;;  %v4046_v31 = vsel %vm7477_vm3, %v4041_v7, %v4045_v22  ;;  %v4074_v47 = vrot.slane %v4072_v27, 4  ;;  %v8805_v57 = vld [vmem:[%s7445_s10 + $0x94] sm:$0xf] }
 0x109   : > { %9751 = vst [vmem:[#allocation6_spill] sm:$0xff] %v8785_v59  ;;  %v8791_v32 = vadd.f32 %v1211_v37, %v898_v4  ;;  %v4055_v17 = vrot.slane %v4054_v16, 4  ;;  %v4077_v34 = vrot.slane %v4075_v13, 5  ;;  %v6182_v37 = vld [vmem:[%s7445_s10 + $0x90] sm:$0xf]  ;;  %v6215_v10 = vcombine.low %v4036_v56, %v4046_v31 }
 0x10a   : > { %6968 = vmatmul.mubr.msk.bf16.gmra.mxu0 %vm767_vm2, %v7238_v3  ;;  %v6730_v12 = vpop.f32.mrf.mxu0  ;;  %v1227_v46 = vpop.f32.mrf.mxu1  ;;  %v4064_v33 = vor.u32 %v4063_v1, %v4059_v36  ;;  %v4083_v50 = vrot.slane %v4081_v11, 5  ;;  %v4085_v7 = vshrl.u32 %v8783_v54, 16  ;;  %v4091_v16 = vshll.u32 %v8794_v40, 16  ;;  %v8816_v13 = vld [vmem:[%s7445_s10 + $0x98] sm:$0x1] }
 0x10b   : > { %9752 = vst [vmem:[#allocation7_spill] sm:$0xff] %v8791_v32  ;;  %v8801_v61 = vadd.f32 %v6770_v28, %v6730_v12  ;;  %6971 = vmatprep.mubr.msk.bf16.mxu0 %vm767_vm2, %v7239_v48  ;;  %v4060_v22 = vsel %vm7477_vm3, %v4055_v17, %v4059_v36  ;;  %v4078_v4 = vor.u32 %v4077_v34, %v4074_v47  ;;  %v7241_v48 = vld [vmem:[%s7445_s10 + $0x84] sm:$0xff]   ;;  %v4096_v1 = vshrl.u32 %v6182_v37, 16  ;;  %v6185_v34 = vld [vmem:[%s7445_s10 + $0x9c] sm:$0xf] }
 0x10c   : > { %v901_v3 = vpop.f32.mrf.mxu0  ;;  %v6774_v56 = vpop.f32.mrf.mxu1  ;;  %7008 = vmatmul.mubr.msk.bf16.gmra.mxu1 %vm767_vm2, %v6215_v10  ;;  %v4065_v27 = vrot.slane %v4064_v33, 4  ;;  %v4099_v11 = vshll.u32 %v6182_v37, 16  ;;  %v4087_v31 = vrot.slane %v4085_v7, 4  ;;  %v4093_v12 = vrot.slane %v4091_v16, 5 }
 0x10d   : > { %9753 = vst [vmem:[#allocation8_spill] sm:$0xff] %v8801_v61  ;;  %v8812_v28 = vadd.f32 %v1214_v49, %v901_v3  ;;  %v4079_v36 = vrot.slane %v4078_v4, 4  ;;  %v4105_v47 = vshll.u32 %v8805_v57, 16  ;;  %v7242_v49 = vld [vmem:[%s7445_s10 + $0x90] sm:$0xff]   ;;  %v4098_v3 = vrot.slane %v4096_v1, 4 }
 0x10e   : > { %v8818_v17 = vpop.f32.mrf.mxu1  ;;  %v4070_v10 = vsel %vm7477_vm3, %v4065_v27, %v4069_v41  ;;  %v4109_v33 = vshrl.u32 %v8805_v57, 16  ;;  %v8827_v61 = vld [vmem:[%s7445_s10 + $0xa0] sm:$0xf]  ;;  %v4088_v7 = vor.u32 %v4087_v31, %v4083_v50  ;;  %v4115_v27 = vshll.u32 %v8816_v13, 16 }
 0x10f   : > { %9754 = vst [vmem:[#allocation9_spill] sm:$0xff] %v8812_v28  ;;  %9755 = vst [vmem:[#allocation10_spill] sm:$0xff] %v8818_v17  ;;  %v4101_v28 = vrot.slane %v4099_v11, 5  ;;  %v6216_v37 = vcombine.low %v4060_v22, %v4070_v10  ;;  %v4084_v4 = vsel %vm7477_vm3, %v4079_v36, %v4083_v50  ;;  %v4107_v16 = vrot.slane %v4105_v47, 5  ;;  %v8841_v10 = vld [vmem:[%s7445_s10 + $0xa4] sm:$0x1] }
 0x110   : > { %9756 = vst [vmem:[#allocation11_spill] sm:$0xff] %v8827_v61  ;;  %v6733_v32 = vpop.f32.mrf.mxu0  ;;  %v4111_v41 = vrot.slane %v4109_v33, 4  ;;  %v4089_v22 = vrot.slane %v4088_v7, 4  ;;  %v4120_v11 = vshrl.u32 %v6185_v34, 16  ;;  %v4123_v36 = vshll.u32 %v6185_v34, 16  ;;  %9759 = vst [vmem:[#allocation14_spill] sm:$0xff] %v8841_v10 }
 0x111   : > { %v8831_v17 = vadd.f32 %v6773_v18, %v6733_v32  ;;  %v6777_v59 = vpop.f32.mrf.mxu1  ;;  %v4102_v9 = vor.u32 %v4101_v28, %v4098_v3  ;;  %7011 = vmatprep.mubr.msk.bf16.mxu1 %vm767_vm2, %v6216_v37  ;;  %v4129_v50 = vshll.u32 %v8827_v61, 16  ;;  %v4117_v31 = vrot.slane %v4115_v27, 5 }
 0x112   : > { %6972 = vmatmul.mubr.msk.bf16.gmra.mxu0 %vm767_vm2, %v7241_v48  ;;  %v914_v1 = vpop.f32.mrf.mxu0  ;;  %v4112_v28 = vor.u32 %v4111_v41, %v4107_v16  ;;  %v6188_v48 = vld [vmem:[%s7445_s10 + $0xa8] sm:$0xf]  ;;  %v4094_v3 = vsel %vm7477_vm3, %v4089_v22, %v4093_v12  ;;  %v4122_v37 = vrot.slane %v4120_v11, 4  ;;  %v4125_v34 = vrot.slane %v4123_v36, 5  ;;  %v7243_v12 = vld [vmem:[%s7445_s10 + $0x9c] sm:$0xff]  }
 0x113   : > { %9757 = vst [vmem:[#allocation12_spill] sm:$0xff] %v8831_v17  ;;  %v8837_v18 = vadd.f32 %v1227_v46, %v914_v1  ;;  %6975 = vmatprep.mubr.msk.bf16.mxu0 %vm767_vm2, %v7242_v49  ;;  %v4103_v32 = vrot.slane %v4102_v9, 4  ;;  %v1243_v47 = vpop.f32.mrf.mxu1  ;;  %v8846_v7 = vrot.slane %v4129_v50, 5  ;;  %v8849_v46 = vld [vmem:[%s7445_s10 + $0xac] sm:$0xf]  ;;  %v6217_v9 = vcombine.low %v4084_v4, %v4094_v3 }
 0x114   : > { %v6734_v33 = vpop.f32.mrf.mxu0  ;;  %9760 = vst [vmem:[#allocation15_spill] sm:$0xff] %v8849_v46  ;;  %v4113_v27 = vrot.slane %v4112_v28, 4  ;;  %v4126_v22 = vor.u32 %v4125_v34, %v4122_v37  ;;  %v4133_v11 = vshrl.u32 %v8827_v61, 16  ;;  %v4139_v36 = vshll.u32 %v8841_v10, 16  ;;  %v6191_v17 = vld [vmem:[%s7445_s10 + $0xb4] sm:$0xf] }
 0x115   : > { %9758 = vst [vmem:[#allocation13_spill] sm:$0xff] %v8837_v18  ;;  %v8851_v49 = vadd.f32 %v6774_v56, %v6734_v33  ;;  %v4108_v41 = vsel %vm7477_vm3, %v4103_v32, %v4107_v16  ;;  %v6778_v1 = vpop.f32.mrf.mxu1  ;;  %v4144_v50 = vshrl.u32 %v6188_v48, 16  ;;  %7012 = vmatmul.mubr.msk.bf16.gmra.mxu1 %vm767_vm2, %v6217_v9  ;;  %v7244_v16 = vld [vmem:[%s7445_s10 + $0xa8] sm:$0xff]   ;;  %v8867_v32 = vld [vmem:[%s7445_s10 + $0xb0] sm:$0x1]  ;;  %v4147_v28 = vshll.u32 %v6188_v48, 16 }
 0x116   : > { %v8855_v18 = vpop.f32.mrf.mxu0  ;;  %v4118_v56 = vsel %vm7477_vm3, %v4113_v27, %v4117_v31  ;;  %9764 = vst [vmem:[#allocation19_spill] sm:$0xff] %v8867_v32  ;;  %v4153_v3 = vshll.u32 %v8849_v46, 16  ;;  %v4127_v34 = vrot.slane %v4126_v22, 4  ;;  %v8874_v27 = vld [vmem:[%s7445_s10 + $0xb8] sm:$0xf]  ;;  %v4648_v30 = vrot.slane %v8643_v62, 5 }
 0x117   : > { %9761 = vst [vmem:[#allocation16_spill] sm:$0xff] %v8851_v49  ;;  %9762 = vst [vmem:[#allocation17_spill] sm:$0xff] %v8855_v18  ;;  %v8863_v4 = vpop.f32.mrf.mxu1  ;;  %v6218_v37 = vcombine.low %v4108_v41, %v4118_v56  ;;  %v4135_v49 = vrot.slane %v4133_v11, 4  ;;  %v4141_v18 = vrot.slane %v4139_v36, 5  ;;  %v4146_v9 = vrot.slane %v4144_v50, 4 }
 0x118   : > { %9763 = vst [vmem:[#allocation18_spill] sm:$0xff] %v8863_v4  ;;  %v6737_v33 = vpop.f32.mrf.mxu0  ;;  %v4149_v61 = vrot.slane %v4147_v28, 5  ;;  %v4155_v31 = vrot.slane %v4153_v3, 5  ;;  %9766 = vst [vmem:[#allocation21_spill] sm:$0xff] %v8874_v27  ;;  %v4132_v41 = vsel %vm7477_vm3, %v4127_v34, %v8846_v7  ;;  %v4163_v36 = vshll.u32 %v8867_v32, 16 }
 0x119   : > { %v8871_v10 = vadd.f32 %v6777_v59, %v6737_v33  ;;  %7015 = vmatprep.mubr.msk.bf16.mxu1 %vm767_vm2, %v6218_v37  ;;  %v4136_v22 = vor.u32 %v4135_v49, %v8846_v7  ;;  %v4157_v59 = vshrl.u32 %v8849_v46, 16  ;;  %v4168_v56 = vshrl.u32 %v6191_v17, 16  ;;  %v8888_v49 = vld [vmem:[%s7445_s10 + $0xbc] sm:$0x1]  ;;  %v8901_v46 = vld [vmem:[%s7445_s10 + $0xc4] sm:$0xf] }
 0x11a   : > { %6976 = vmatmul.mubr.msk.bf16.gmra.mxu0 %vm767_vm2, %v7243_v12  ;;  %v930_v48 = vpop.f32.mrf.mxu0  ;;  %v6781_v11 = vpop.f32.mrf.mxu1  ;;  %v4150_v12 = vor.u32 %v4149_v61, %v4146_v9  ;;  %v4171_v28 = vshll.u32 %v6191_v17, 16  ;;  %v4165_v34 = vrot.slane %v4163_v36, 5  ;;  %9768 = vst [vmem:[#allocation23_spill] sm:$0xff] %v8888_v49  ;;  %v4177_v4 = vshll.u32 %v8874_v27, 16  ;;  %v6194_v61 = vld [vmem:[%s7445_s10 + $0xc0] sm:$0xf] }
 0x11b   : > { %9765 = vst [vmem:[#allocation20_spill] sm:$0xff] %v8871_v10  ;;  %v8884_v50 = vadd.f32 %v1243_v47, %v930_v48  ;;  %6979 = vmatprep.mubr.msk.bf16.mxu0 %vm767_vm2, %v7244_v16  ;;  %v4137_v3 = vrot.slane %v4136_v22, 4  ;;  %v4159_v37 = vrot.slane %v4157_v59, 4  ;;  %v4170_v48 = vrot.slane %v4168_v56, 4  ;;  %v7246_v22 = vld [vmem:[%s7445_s10 + $0xb4] sm:$0xff]   ;;  %9771 = vst [vmem:[#allocation26_spill] sm:$0xff] %v8901_v46 }
 0x11c   : > { %v6738_v33 = vpop.f32.mrf.mxu0  ;;  %v1259_v7 = vpop.f32.mrf.mxu1  ;;  %v4151_v47 = vrot.slane %v4150_v12, 4  ;;  %v4173_v16 = vrot.slane %v4171_v28, 5  ;;  %v4179_v36 = vrot.slane %v4177_v4, 5 }
 0x11d   : > { %9767 = vst [vmem:[#allocation22_spill] sm:$0xff] %v8884_v50  ;;  %v8891_v10 = vadd.f32 %v6778_v1, %v6738_v33  ;;  %v4142_v17 = vsel %vm7477_vm3, %v4137_v3, %v4141_v18  ;;  %v4160_v59 = vor.u32 %v4159_v37, %v4155_v31  ;;  %v4181_v50 = vshrl.u32 %v8874_v27, 16  ;;  %v7247_v33 = vld [vmem:[%s7445_s10 + $0xc0] sm:$0xff]   ;;  %v8912_v27 = vld [vmem:[%s7445_s10 + $0xc8] sm:$0x1] }
 0x11e   : > { %v8896_v9 = vpop.f32.mrf.mxu0  ;;  %v6782_v32 = vpop.f32.mrf.mxu1  ;;  %v6219_v12 = vcombine.low %v4132_v41, %v4142_v17  ;;  %v4156_v56 = vsel %vm7477_vm3, %v4151_v47, %v4155_v31  ;;  %v4174_v28 = vor.u32 %v4173_v16, %v4170_v48  ;;  %v4187_v37 = vshll.u32 %v8888_v49, 16  ;;  %9773 = vst [vmem:[#allocation28_spill] sm:$0xff] %v8912_v27 }
 0x11f   : > { %9769 = vst [vmem:[#allocation24_spill] sm:$0xff] %v8891_v10  ;;  %9770 = vst [vmem:[#allocation25_spill] sm:$0xff] %v8896_v9  ;;  %v4161_v18 = vrot.slane %v4160_v59, 4  ;;  %v4183_v3 = vrot.slane %v4181_v50, 4  ;;  %v4192_v10 = vshrl.u32 %v6194_v61, 16  ;;  %v4195_v1 = vshll.u32 %v6194_v61, 16 }
 0x120   : > { %v8908_v4 = vpop.f32.mrf.mxu1  ;;  %7016 = vmatmul.mubr.msk.bf16.gmra.mxu1 %vm767_vm2, %v6219_v12  ;;  %v4175_v9 = vrot.slane %v4174_v28, 4  ;;  %v4201_v41 = vshll.u32 %v8901_v46, 16  ;;  %v4205_v31 = vshrl.u32 %v8901_v46, 16  ;;  %v4189_v16 = vrot.slane %v4187_v37, 5  ;;  %v6197_v59 = vld [vmem:[%s7445_s10 + $0xcc] sm:$0xf] }
 0x121   : > { %9772 = vst [vmem:[#allocation27_spill] sm:$0xff] %v8908_v4  ;;  %v4166_v50 = vsel %vm7477_vm3, %v4161_v18, %v4165_v34  ;;  %v4184_v48 = vor.u32 %v4183_v3, %v4179_v36  ;;  %v4194_v17 = vrot.slane %v4192_v10, 4  ;;  %v4197_v49 = vrot.slane %v4195_v1, 5  ;;  %v8926_v46 = vld [vmem:[%s7445_s10 + $0xd0] sm:$0xf] }
 0x122   : > { %v6741_v47 = vpop.f32.mrf.mxu0  ;;  %6980 = vmatmul.mubr.msk.bf16.gmra.mxu0 %vm767_vm2, %v7246_v22  ;;  %v6220_v28 = vcombine.low %v4156_v56, %v4166_v50  ;;  %v4180_v61 = vsel %vm7477_vm3, %v4175_v9, %v4179_v36  ;;  %v4203_v18 = vrot.slane %v4201_v41, 5  ;;  %v4207_v10 = vrot.slane %v4205_v31, 4  ;;  %v7248_v56 = vld [vmem:[%s7445_s10 + $0xcc] sm:$0xff]   ;;  %v8936_v41 = vld [vmem:[%s7445_s10 + $0xd4] sm:$0x1] }
 0x123   : > { %v8920_v12 = vadd.f32 %v6781_v11, %v6741_v47  ;;  %6983 = vmatprep.mubr.msk.bf16.mxu0 %vm767_vm2, %v7247_v33  ;;  %v6785_v4 = vpop.f32.mrf.mxu1  ;;  %v4185_v34 = vrot.slane %v4184_v48, 4  ;;  %v4211_v3 = vshll.u32 %v8912_v27, 16  ;;  %v4198_v9 = vor.u32 %v4197_v49, %v4194_v17 }
 0x124   : > { %v946_v22 = vpop.f32.mrf.mxu0  ;;  %7019 = vmatprep.mubr.msk.bf16.mxu1 %vm767_vm2, %v6220_v28  ;;  %v4216_v33 = vshrl.u32 %v6197_v59, 16  ;;  %v4219_v37 = vshll.u32 %v6197_v59, 16  ;;  %v4208_v50 = vor.u32 %v4207_v10, %v4203_v18  ;;  %v4225_v31 = vshll.u32 %v8926_v46, 16 }
 0x125   : > { %9774 = vst [vmem:[#allocation29_spill] sm:$0xff] %v8920_v12  ;;  %v8930_v11 = vadd.f32 %v1259_v7, %v946_v22  ;;  %v1275_v36 = vpop.f32.mrf.mxu1  ;;  %v4190_v1 = vsel %vm7477_vm3, %v4185_v34, %v4189_v16  ;;  %v4213_v48 = vrot.slane %v4211_v3, 5  ;;  %v6244_v12 = vld [vmem:[%s7445_s10 + $0x18] sm:$0xe]  ;;  %v4199_v7 = vrot.slane %v4198_v9, 4 }
 0x126   : > { %v6742_v47 = vpop.f32.mrf.mxu0  ;;  %v6221_v27 = vcombine.low %v4180_v61, %v4190_v1  ;;  %v4218_v22 = vrot.slane %v4216_v33, 4  ;;  %v4209_v59 = vrot.slane %v4208_v50, 4  ;;  %v4227_v16 = vrot.slane %v4225_v31, 5  ;;  %v6245_v50 = vld [vmem:[%s7445_s10 + $0x24] sm:$0xe] }
 0x127   : > { %9775 = vst [vmem:[#allocation30_spill] sm:$0xff] %v8930_v11  ;;  %v8940_v28 = vadd.f32 %v6782_v32, %v6742_v47  ;;  %v6786_v49 = vpop.f32.mrf.mxu1  ;;  %v4221_v11 = vrot.slane %v4219_v37, 5  ;;  %v4229_v34 = vshrl.u32 %v8926_v46, 16  ;;  %v4637_v10 = vrot.slane %v8619_v55, 5 }
 0x128   : > { %v8942_v17 = vpop.f32.mrf.mxu0  ;;  %7020 = vmatmul.mubr.msk.bf16.gmra.mxu1 %vm767_vm2, %v6221_v27  ;;  %v4204_v32 = vsel %vm7477_vm3, %v4199_v7, %v4203_v18  ;;  %v4235_v61 = vshll.u32 %v8936_v41, 16  ;;  %v6260_v9 = vrot.slane %v6244_v12, 9  ;;  %v4214_v37 = vsel %vm7477_vm3, %v4209_v59, %v4213_v48  ;;  %v6246_v27 = vld [vmem:[%s7445_s10 + $0x30] sm:$0xe] }
 0x129   : > { %9776 = vst [vmem:[#allocation31_spill] sm:$0xff] %v8940_v28  ;;  %9777 = vst [vmem:[#allocation32_spill] sm:$0xff] %v8942_v17  ;;  %v8950_v3 = vpop.f32.mrf.mxu1  ;;  %v4222_v1 = vor.u32 %v4221_v11, %v4218_v22  ;;  %v4231_v47 = vrot.slane %v4229_v34, 4  ;;  %v4627_v55 = vrot.slane %v8588_v29, 5  ;;  %v6222_v18 = vcombine.low %v4204_v32, %v4214_v37 }
 0x12a   : > { %9778 = vst [vmem:[#allocation33_spill] sm:$0xff] %v8950_v3  ;;  %v6745_v33 = vpop.f32.mrf.mxu0  ;;  %6984 = vmatmul.mubr.msk.bf16.gmra.mxu0 %vm767_vm2, %v7248_v56  ;;  %v4237_v7 = vrot.slane %v4235_v61, 5  ;;  %v4630_v28 = vrot.slane %v8602_v6, 5  ;;  %v9779_v22 = vrot.slane %v8612_v52, 5  ;;  %v6262_v6 = vrot.slane %v6246_v27, 9 }
 0x12b   : > { %v8958_v31 = vadd.f32 %v6785_v4, %v6745_v33  ;;  %v6837_v3 = vpop.f32.mrf.mxu1  ;;  %v4223_v17 = vrot.slane %v4222_v1, 4  ;;  %v4232_v56 = vor.u32 %v4231_v47, %v4227_v16  ;;  %v4628_v48 = vsel %vm7768_vm6, %v6260_v9, %v4627_v55  ;;  %7023 = vmatprep.mubr.msk.bf16.mxu1 %vm767_vm2, %v6222_v18  ;;  %v6248_v27 = vld [vmem:[%s7445_s10 + $0x48] sm:$0xe] }
 0x12c   : > { %v962_v12 = vpop.f32.mrf.mxu0  ;;  %v4629_v11 = vrot.slane %v4627_v55, 4  ;;  %v6261_v4 = vrot.slane %v6245_v50, 9  ;;  %v4636_v59 = vrot.slane %v9779_v22, 4  ;;  %v4641_v37 = vrot.slane %v8624_v24, 5 }
 0x12d   : > { %v8964_v29 = vadd.f32 %v1275_v36, %v962_v12  ;;  %v2006_v34 = vpop.f32.mrf.mxu1  ;;  %v4228_v32 = vsel %vm7477_vm3, %v4223_v17, %v4227_v16  ;;  %v4233_v61 = vrot.slane %v4232_v56, 4  ;;  %v6247_v36 = vld [vmem:[%s7445_s10 + $0x3c] sm:$0xe]  ;;  %v9780_v55 = vmov %v9779_v22  ;;  %v6249_v56 = vld [vmem:[%s7445_s10 + $0x54] sm:$0xe] }
 0x12e   : > { %v6746_v33 = vpop.f32.mrf.mxu0  ;;  %v4631_v9 = vsel %vm7768_vm6, %v4629_v11, %v4630_v28  ;;  %v4635_v50 = vsel %vm7768_vm6, %v6261_v4, %v9780_v55  ;;  %v4638_v17 = vsel %vm7768_vm6, %v4636_v59, %v4637_v10  ;;  %v4651_v18 = vrot.slane %v8657_v14, 5 }
 0x12f   : > { %v8974_v1 = vadd.f32 %v6786_v49, %v6746_v33  ;;  %v6284_v47 = vcombine.low %v4628_v48, %v4631_v9  ;;  %v6838_v16 = vpop.f32.mrf.mxu1  ;;  %v4238_v28 = vsel %vm7477_vm3, %v4233_v61, %v4237_v7  ;;  %v6285_v49 = vcombine.low %v4635_v50, %v4638_v17  ;;  %v6250_v50 = vld [vmem:[%s7445_s10 + $0x60] sm:$0xe] }
 0x130   : > { %v8986_v24 = vpop.f32.mrf.mxu0  ;;  %v4643_v12 = vrot.slane %v4641_v37, 4  ;;  %v6223_v48 = vcombine.low %v4228_v32, %v4238_v28  ;;  %v4642_v52 = vsel %vm7768_vm6, %v6262_v6, %v4641_v37  ;;  %v4644_v10 = vrot.slane %v8633_v63, 5 }
 0x131   : > { %7035 = vmatprep.mubr.msk.bf16.mxu0 %vm767_vm2, %v6284_v47  ;;  %v8993_v11 = vpop.f32.mrf.mxu1  ;;  %v6263_v4 = vrot.slane %v6247_v36, 9  ;;  %v6264_v7 = vrot.slane %v6248_v27, 9  ;;  %v4655_v22 = vrot.slane %v8670_v8, 5  ;;  %v4658_v59 = vrot.slane %v8680_v38, 5 }
 0x132   : > { %v6797_v14 = vpop.f32.mrf.mxu0  ;;  %7036 = vmatmul.mubr.msk.bf16.vlgmr.msra.gmra.mxu0 %vm767_vm2, %v6285_v49  ;;  %7024 = vmatmul.mubr.msk.bf16.gmra.mxu1 %vm767_vm2, %v6223_v48  ;;  %v4645_v63 = vsel %vm7768_vm6, %v4643_v12, %v4644_v10  ;;  %v6265_v32 = vrot.slane %v6249_v56, 9  ;;  %v4662_v61 = vrot.slane %v8688_v15, 5  ;;  %v4665_v33 = vrot.slane %v8697_v58, 5 }
 0x133   : > { %v1745_v6 = vadd.f32 %v6797_v14, %v8652_v60  ;;  %v6286_v62 = vcombine.low %v4642_v52, %v4645_v63  ;;  %v4649_v8 = vsel %vm7768_vm6, %v6263_v4, %v4648_v30  ;;  %v4650_v37 = vrot.slane %v4648_v30, 4 }
 0x134   : > { %v1616_v9 = vpop.f32.mrf.mxu0  ;;  %v6841_v38 = vpop.f32.mrf.mxu1  ;;  %v4656_v60 = vsel %vm7768_vm6, %v6264_v7, %v4655_v22  ;;  %v4657_v55 = vrot.slane %v4655_v22, 4  ;;  %v4663_v27 = vsel %vm7768_vm6, %v6265_v32, %v4662_v61  ;;  %v4664_v28 = vrot.slane %v4662_v61, 4 }
 0x135   : > { %v1743_v36 = vadd.f32 %v1616_v9, %v8661_v44  ;;  %v9008_v47 = vadd.f32 %v6837_v3, %v1745_v6  ;;  %7039 = vmatprep.mubr.msk.bf16.mxu0 %vm767_vm2, %v6286_v62  ;;  %v4652_v15 = vsel %vm7768_vm6, %v4650_v37, %v4651_v18  ;;  %v4669_v44 = vrot.slane %v8712_v5, 5  ;;  %v6251_v6 = vld [vmem:[%s7445_s10 + $0x6c] sm:$0xe] }
 0x136   : > { %v6798_v17 = vpop.f32.mrf.mxu0  ;;  %v2022_v58 = vpop.f32.mrf.mxu1  ;;  %v6287_v12 = vcombine.low %v4649_v8, %v4652_v15  ;;  %v4659_v56 = vsel %vm7768_vm6, %v4657_v55, %v4658_v59  ;;  %v4666_v18 = vsel %vm7768_vm6, %v4664_v28, %v4665_v33  ;;  %v6266_v4 = vrot.slane %v6250_v50, 9 }
 0x137   : > { %v1746_v3 = vadd.f32 %v6798_v17, %v8672_v25  ;;  %v9020_v49 = vadd.f32 %v2006_v34, %v1743_v36  ;;  %v6288_v10 = vcombine.low %v4656_v60, %v4659_v56  ;;  %v4671_v14 = vrot.slane %v4669_v44, 4 }
 0x138   : > { %v1619_v48 = vpop.f32.mrf.mxu0  ;;  %v6842_v52 = vpop.f32.mrf.mxu1  ;;  %v6289_v25 = vcombine.low %v4663_v27, %v4666_v18  ;;  %v4672_v34 = vrot.slane %v8725_v45, 5  ;;  %v4676_v63 = vrot.slane %v8736_v43, 5  ;;  %v4683_v61 = vrot.slane %v8762_v26, 5 }
 0x139   : > { %v9027_v30 = vadd.f32 %v1619_v48, %v8684_v35  ;;  %v9029_v5 = vadd.f32 %v6838_v16, %v1746_v3  ;;  %v4670_v16 = vsel %vm7768_vm6, %v6266_v4, %v4669_v44  ;;  %v4679_v62 = vrot.slane %v8751_v51, 5  ;;  %v6253_v3 = vld [vmem:[%s7445_s10 + $0x84] sm:$0xe] }
 0x13a   : > { %v6801_v7 = vpop.f32.mrf.mxu0  ;;  %7040 = vmatmul.mubr.msk.bf16.gmra.mxu0 %vm767_vm2, %v6287_v12  ;;  %v9033_v22 = vpop.f32.mrf.mxu1  ;;  %v4673_v45 = vsel %vm7768_vm6, %v4671_v14, %v4672_v34  ;;  %v6267_v43 = vrot.slane %v6251_v6, 9  ;;  %v4678_v50 = vrot.slane %v4676_v63, 4  ;;  %v4685_v27 = vrot.slane %v4683_v61, 4  ;;  %v6254_v14 = vld [vmem:[%s7445_s10 + $0x90] sm:$0xe] }
 0x13b   : > { %v1749_v59 = vadd.f32 %v6801_v7, %v8707_v23  ;;  %7043 = vmatprep.mubr.msk.bf16.mxu0 %vm767_vm2, %v6288_v10  ;;  %v6252_v23 = vld [vmem:[%s7445_s10 + $0x78] sm:$0xe]  ;;  %v6290_v55 = vcombine.low %v4670_v16, %v4673_v45  ;;  %v4690_v12 = vrot.slane %v8783_v54, 5  ;;  %v4697_v10 = vrot.slane %v8805_v57, 5 }
 0x13c   : > { %v1632_v35 = vpop.f32.mrf.mxu0  ;;  %v6845_v32 = vpop.f32.mrf.mxu1  ;;  %v6268_v26 = vrot.slane %v6252_v23, 9  ;;  %v6269_v7 = vrot.slane %v6253_v3, 9 }
 0x13d   : > { %v1747_v33 = vadd.f32 %v1632_v35, %v8717_v19  ;;  %v9045_v9 = vadd.f32 %v6841_v38, %v1749_v59  ;;  %v4686_v19 = vrot.slane %v8771_v0, 5  ;;  %v4680_v0 = vsel %vm7768_vm6, %v4678_v50, %v4679_v62 }
 0x13e   : > { %v6802_v8 = vpop.f32.mrf.mxu0  ;;  %v2038_v37 = vpop.f32.mrf.mxu1  ;;  %v4693_v59 = vrot.slane %v8794_v40, 5  ;;  %v4692_v16 = vrot.slane %v4690_v12, 4  ;;  %v9782_v40 = vld [vmem:[#allocation6_spill] sm:$0xff] }
 0x13f   : > { %v1750_v36 = vadd.f32 %v6802_v8, %v8728_v53  ;;  %v9050_v60 = vadd.f32 %v2022_v58, %v1747_v33  ;;  %v7249_v53 = vld [vmem:[%s9733_s3 + $0x18] sm:$0xff]   ;;  %v9781_v33 = vld [vmem:[#allocation5_spill] sm:$0xff] }
 0x140   : > { %v1635_v17 = vpop.f32.mrf.mxu0  ;;  %v6846_v15 = vpop.f32.mrf.mxu1  ;;  %7067 = vmatprep.subr.bf16.mxu1 %v7249_v53 }
 0x141   : > { %v9054_v38 = vadd.f32 %v1635_v17, %v8738_v2  ;;  %v9056_v51 = vadd.f32 %v6842_v52, %v1750_v36  ;;  %v4677_v2 = vsel %vm7768_vm6, %v6267_v43, %v4676_v63  ;;  %v4684_v52 = vsel %vm7768_vm6, %v6268_v26, %v4683_v61  ;;  %7068 = vmatpush3.bf16.msra.mxu1 %v7249_v53  ;;  %v6255_v36 = vld [vmem:[%s7445_s10 + $0x9c] sm:$0xe] }
 0x142   : > { %v6805_v58 = vpop.f32.mrf.mxu0  ;;  %7044 = vmatmul.mubr.msk.bf16.gmra.mxu0 %vm767_vm2, %v6289_v25  ;;  %v9062_v28 = vpop.f32.mrf.mxu1  ;;  %v6291_v34 = vcombine.low %v4677_v2, %v4680_v0  ;;  %v6270_v61 = vrot.slane %v6254_v14, 9  ;;  %v4691_v43 = vsel %vm7768_vm6, %v6269_v7, %v4690_v12  ;;  %v6256_v0 = vld [vmem:[%s7445_s10 + $0xa8] sm:$0xe]  ;;  %v9787_v14 = vld [vmem:[#allocation8_spill] sm:$0xff] }
 0x143   : > { %v1753_v44 = vadd.f32 %v6805_v58, %v8747_v21  ;;  %7047 = vmatprep.mubr.msk.bf16.mxu0 %vm767_vm2, %v6290_v55  ;;  %v4687_v21 = vsel %vm7768_vm6, %v4685_v27, %v4686_v19  ;;  %v9783_v55 = vld [vmem:[#allocation11_spill] sm:$0xff] }
 0x144   : > { %v1648_v56 = vpop.f32.mrf.mxu0  ;;  %v6849_v48 = vpop.f32.mrf.mxu1  ;;  %v6292_v35 = vcombine.low %v4684_v52, %v4687_v21  ;;  %v4704_v50 = vrot.slane %v9783_v55, 5  ;;  %v4698_v26 = vsel %vm7768_vm6, %v6270_v61, %v4697_v10  ;;  %v9784_v19 = vld [vmem:[#allocation15_spill] sm:$0xff]  ;;  %v6271_v52 = vrot.slane %v6255_v36, 9  ;;  %v9786_v21 = vld [vmem:[#allocation14_spill] sm:$0xff]  ;;  %v9789_v61 = vld [vmem:[#allocation9_spill] sm:$0xff] }
 0x145   : > { %v1751_v18 = vadd.f32 %v1648_v56, %v8756_v20  ;;  %v9078_v4 = vadd.f32 %v6845_v32, %v1753_v44  ;;  %v4699_v20 = vrot.slane %v4697_v10, 4  ;;  %v4700_v32 = vrot.slane %v8816_v13, 5  ;;  %v9785_v58 = vld [vmem:[#allocation7_spill] sm:$0xff] }
 0x146   : > { %v6806_v25 = vpop.f32.mrf.mxu0  ;;  %v2054_v54 = vpop.f32.mrf.mxu1  ;;  %v4694_v13 = vsel %vm7768_vm6, %v4692_v16, %v4693_v59  ;;  %v4711_v53 = vrot.slane %v9784_v19, 5  ;;  %v4706_v7 = vrot.slane %v4704_v50, 4  ;;  %v4705_v36 = vsel %vm7768_vm6, %v6271_v52, %v4704_v50  ;;  %v6257_v55 = vld [vmem:[%s7445_s10 + $0xb4] sm:$0xe]  ;;  %v6258_v50 = vld [vmem:[%s7445_s10 + $0xc0] sm:$0xe] }
 0x147   : > { %v1754_v6 = vadd.f32 %v6806_v25, %v8765_v42  ;;  %v9083_v63 = vadd.f32 %v2038_v37, %v1751_v18  ;;  %v4701_v27 = vsel %vm7768_vm6, %v4699_v20, %v4700_v32  ;;  %v6293_v12 = vcombine.low %v4691_v43, %v4694_v13  ;;  %v9791_v43 = vld [vmem:[#allocation12_spill] sm:$0xff]  ;;  %v9794_v52 = vld [vmem:[#allocation17_spill] sm:$0xff] }
 0x148   : > { %v1651_v57 = vpop.f32.mrf.mxu0  ;;  %v6850_v45 = vpop.f32.mrf.mxu1  ;;  %v4707_v18 = vrot.slane %v9786_v21, 5  ;;  %v6294_v10 = vcombine.low %v4698_v26, %v4701_v27  ;;  %v4713_v16 = vrot.slane %v4711_v53, 4  ;;  %v9795_v21 = vld [vmem:[#allocation10_spill] sm:$0xff] }
 0x149   : > { %v9087_v23 = vadd.f32 %v1651_v57, %v9781_v33  ;;  %v9089_v62 = vadd.f32 %v6846_v15, %v1754_v6 }
 0x14a   : > { %v6809_v8 = vpop.f32.mrf.mxu0  ;;  %7048 = vmatmul.mubr.msk.bf16.gmra.mxu0 %vm767_vm2, %v6291_v34  ;;  %v9092_v42 = vpop.f32.mrf.mxu1 }
 0x14b   : > { %v1757_v37 = vadd.f32 %v6809_v8, %v9782_v40  ;;  %7051 = vmatprep.mubr.msk.bf16.mxu0 %vm767_vm2, %v6292_v35  ;;  %v6272_v35 = vrot.slane %v6256_v0, 9  ;;  %v9793_v0 = vld [vmem:[#allocation13_spill] sm:$0xff] }
 0x14c   : > { %v1664_v17 = vpop.f32.mrf.mxu0  ;;  %v6853_v15 = vpop.f32.mrf.mxu1 }
 0x14d   : > { %v1755_v44 = vadd.f32 %v1664_v17, %v9785_v58  ;;  %v9108_v2 = vadd.f32 %v6849_v48, %v1757_v37  ;;  %v9788_v48 = vld [vmem:[#allocation19_spill] sm:$0xff]  ;;  %v4712_v27 = vsel %vm7768_vm6, %v6272_v35, %v4711_v53  ;;  %v9792_v58 = vld [vmem:[#allocation26_spill] sm:$0xff] }
 0x14e   : > { %v6810_v3 = vpop.f32.mrf.mxu0  ;;  %v2070_v56 = vpop.f32.mrf.mxu1  ;;  %v4714_v57 = vrot.slane %v9788_v48, 5  ;;  %v7250_v37 = vld [vmem:[%s9733_s3 + $0x10] sm:$0xff]  }
 0x14f   : > { %v1758_v25 = vadd.f32 %v6810_v3, %v9787_v14  ;;  %v9113_v34 = vadd.f32 %v2054_v54, %v1755_v44  ;;  %v9790_v54 = vld [vmem:[#allocation21_spill] sm:$0xff]  ;;  %v4725_v44 = vrot.slane %v9792_v58, 5  ;;  %7069 = vmatprep.subr.bf16.mxu1 %v7250_v37 }
 0x150   : > { %v1667_v59 = vpop.f32.mrf.mxu0  ;;  %v6854_v6 = vpop.f32.mrf.mxu1  ;;  %v4718_v40 = vrot.slane %v9790_v54, 5  ;;  %v4715_v19 = vsel %vm7768_vm6, %v4713_v16, %v4714_v57  ;;  %7070 = vmatpush3.bf16.msra.mxu1 %v7250_v37  ;;  %v9797_v57 = vld [vmem:[#allocation23_spill] sm:$0xff]  ;;  %v6274_v54 = vrot.slane %v6258_v50, 9 }
 0x151   : > { %v9117_v20 = vadd.f32 %v1667_v59, %v9789_v61  ;;  %v9119_v32 = vadd.f32 %v6850_v45, %v1758_v25  ;;  %v4708_v45 = vsel %vm7768_vm6, %v4706_v7, %v4707_v18  ;;  %v1231_v18 = vadd.f32 %v9795_v21, %v9794_v52  ;;  %v9796_v59 = vld [vmem:[#allocation16_spill] sm:$0xff] }
 0x152   : > { %v6813_v33 = vpop.f32.mrf.mxu0  ;;  %7052 = vmatmul.mubr.msk.bf16.gmra.mxu0 %vm767_vm2, %v6293_v12  ;;  %v2073_v8 = vpop.f32.mrf.mxu1  ;;  %v6295_v25 = vcombine.low %v4705_v36, %v4708_v45  ;;  %v6273_v7 = vrot.slane %v6257_v55, 9  ;;  %v4720_v53 = vrot.slane %v4718_v40, 4  ;;  %v6296_v48 = vcombine.low %v4712_v27, %v4715_v19  ;;  %v9799_v55 = vld [vmem:[#allocation20_spill] sm:$0xff] }
 0x153   : > { %v1761_v13 = vadd.f32 %v6813_v33, %v9791_v43  ;;  %7055 = vmatprep.mubr.msk.bf16.mxu0 %vm767_vm2, %v6294_v10  ;;  %v4721_v61 = vrot.slane %v9797_v57, 5  ;;  %v4727_v37 = vrot.slane %v4725_v44, 4  ;;  %v9798_v43 = vld [vmem:[#allocation28_spill] sm:$0xff]  ;;  %v4726_v21 = vsel %vm7768_vm6, %v6274_v54, %v4725_v44 }
 0x154   : > { %v1680_v17 = vpop.f32.mrf.mxu0  ;;  %v6857_v26 = vpop.f32.mrf.mxu1 }
 0x155   : > { %v1759_v3 = vadd.f32 %v1680_v17, %v9793_v0  ;;  %v9139_v12 = vadd.f32 %v6853_v15, %v1761_v13  ;;  %v4728_v13 = vrot.slane %v9798_v43, 5  ;;  %v4722_v0 = vsel %vm7768_vm6, %v4720_v53, %v4721_v61  ;;  %v9803_v61 = vld [vmem:[#allocation24_spill] sm:$0xff] }
 0x156   : > { %v6814_v14 = vpop.f32.mrf.mxu0  ;;  %v2086_v10 = vpop.f32.mrf.mxu1 }
 0x157   : > { %v1762_v35 = vadd.f32 %v6814_v14, %v9796_v59  ;;  %v9145_v16 = vadd.f32 %v2070_v56, %v1759_v3  ;;  %v4719_v56 = vsel %vm7768_vm6, %v6273_v7, %v4718_v40  ;;  %v6259_v3 = vld [vmem:[%s7445_s10 + $0xcc] sm:$0xe]  ;;  %v4729_v40 = vsel %vm7768_vm6, %v4727_v37, %v4728_v13  ;;  %s9677_s10 = scalar_lea.hbm %s9735_s5, %s6411_s13 }
 0x158   : > { %v1683_v15 = vpop.f32.mrf.mxu0  ;;  %v6858_v33 = vpop.f32.mrf.mxu1  ;;  %v9802_v7 = vld [vmem:[#allocation18_spill] sm:$0xff]  ;;  %v6297_v53 = vcombine.low %v4719_v56, %v4722_v0  ;;  %v6275_v57 = vrot.slane %v6259_v3, 9  ;;  %v6298_v44 = vcombine.low %v4726_v21, %v4729_v40  ;;  %v9804_v56 = vld [vmem:[#allocation29_spill] sm:$0xff] }
 0x159   : > { %v1760_v17 = vadd.f32 %v1683_v15, %v1231_v18  ;;  %v9149_v58 = vadd.f32 %v6854_v6, %v1762_v35  ;;  %v4732_v6 = vrot.slane %v8926_v46, 5  ;;  %v9800_v18 = vld [vmem:[#allocation22_spill] sm:$0xff]  ;;  %v4735_v46 = vrot.slane %v8936_v41, 5 }
 0x15a   : > { %v6817_v36 = vpop.f32.mrf.mxu0  ;;  %7056 = vmatmul.mubr.msk.bf16.gmra.mxu0 %vm767_vm2, %v6295_v25  ;;  %v2089_v45 = vpop.f32.mrf.mxu1  ;;  %v9801_v25 = vld [vmem:[#allocation25_spill] sm:$0xff] }
 0x15b   : > { %v1765_v27 = vadd.f32 %v6817_v36, %v9799_v55  ;;  %v9155_v19 = vadd.f32 %v2073_v8, %v1760_v17  ;;  %7059 = vmatprep.mubr.msk.bf16.mxu0 %vm767_vm2, %v6296_v48  ;;  %v1247_v59 = vadd.f32 %v9802_v7, %v9801_v25  ;;  %v4734_v54 = vrot.slane %v4732_v6, 4  ;;  %v9806_v7 = vld [vmem:[#allocation32_spill] sm:$0xff] }
 0x15c   : > { %v1696_v50 = vpop.f32.mrf.mxu0  ;;  %v6861_v52 = vpop.f32.mrf.mxu1  ;;  %v4733_v41 = vsel %vm7768_vm6, %v6275_v57, %v4732_v6  ;;  %v9808_v6 = vld [vmem:[#allocation31_spill] sm:$0xff] }
 0x15d   : > { %v1763_v14 = vadd.f32 %v1696_v50, %v9800_v18  ;;  %v9167_v8 = vadd.f32 %v6857_v26, %v1765_v27 }
 0x15e   : > { %v6818_v35 = vpop.f32.mrf.mxu0  ;;  %v2102_v48 = vpop.f32.mrf.mxu1 }
 0x15f   : > { %v1766_v15 = vadd.f32 %v6818_v35, %v9803_v61  ;;  %v9173_v43 = vadd.f32 %v2086_v10, %v1763_v14  ;;  %v4736_v10 = vsel %vm7768_vm6, %v4734_v54, %v4735_v46 }
 0x160   : > { %v1699_v37 = vpop.f32.mrf.mxu0  ;;  %v6862_v13 = vpop.f32.mrf.mxu1  ;;  %v6299_v14 = vcombine.low %v4733_v41, %v4736_v10 }
 0x161   : > { %v1764_v17 = vadd.f32 %v1699_v37, %v1247_v59  ;;  %v9175_v26 = vadd.f32 %v6858_v33, %v1766_v15  ;;  %v9805_v33 = vld [vmem:[#allocation30_spill] sm:$0xff]  ;;  %v9807_v59 = vld [vmem:[#allocation27_spill] sm:$0xff] }
 0x162   : > { %v6821_v36 = vpop.f32.mrf.mxu0  ;;  %7060 = vmatmul.mubr.msk.bf16.gmra.mxu0 %vm767_vm2, %v6297_v53  ;;  %v2105_v55 = vpop.f32.mrf.mxu1  ;;  %v1263_v35 = vadd.f32 %v9807_v59, %v9806_v7 }
 0x163   : > { %v1769_v27 = vadd.f32 %v6821_v36, %v9804_v56  ;;  %v9179_v0 = vadd.f32 %v2089_v45, %v1764_v17  ;;  %7063 = vmatprep.mubr.msk.bf16.mxu0 %vm767_vm2, %v6298_v44  ;;  %v7251_v45 = vld [vmem:[%s9733_s3 + $0x8] sm:$0xff]  }
 0x164   : > { %v1712_v3 = vpop.f32.mrf.mxu0  ;;  %v6865_v50 = vpop.f32.mrf.mxu1  ;;  %7071 = vmatprep.subr.bf16.mxu1 %v7251_v45 }
 0x165   : > { %v1767_v21 = vadd.f32 %v1712_v3, %v9805_v33  ;;  %v9187_v40 = vadd.f32 %v6861_v52, %v1769_v27  ;;  %7072 = vmatpush3.bf16.msra.mxu1 %v7251_v45 }
 0x166   : > { %v6822_v18 = vpop.f32.mrf.mxu0  ;;  %v2118_v25 = vpop.f32.mrf.mxu1 }
 0x167   : > { %v1770_v53 = vadd.f32 %v6822_v18, %v9808_v6  ;;  %v9195_v39 = vadd.f32 %v2102_v48, %v1767_v21  ;;  %v2134_v6 = vadd.f32 %v8993_v11, %v9027_v30 }
 0x168   : > { %v1715_v57 = vpop.f32.mrf.mxu0  ;;  %v6866_v46 = vpop.f32.mrf.mxu1 }
 0x169   : > { %v1768_v61 = vadd.f32 %v1715_v57, %v1263_v35  ;;  %v9197_v52 = vadd.f32 %v6862_v13, %v1770_v53  ;;  %v9809_v13 = vld [vmem:[#allocation33_spill] sm:$0xff] }
 0x16a   : > { %v6825_v15 = vpop.f32.mrf.mxu0  ;;  %7064 = vmatmul.mubr.msk.bf16.gmra.mxu0 %vm767_vm2, %v6299_v14  ;;  %v2121_v44 = vpop.f32.mrf.mxu1  ;;  %v1279_v10 = vadd.f32 %v9809_v13, %v8986_v24 }
 0x16b   : > { %v1773_v54 = vadd.f32 %v6825_v15, %v8958_v31  ;;  %v9201_v37 = vadd.f32 %v2105_v55, %v1768_v61 }
 0x16c   : > { %v1728_v17 = vpop.f32.mrf.mxu0  ;;  %v6917_v36 = vpop.f32.mrf.mxu1 }
 0x16d   : > { %v1771_v48 = vadd.f32 %v1728_v17, %v8964_v29  ;;  %v9204_v56 = vadd.f32 %v6865_v50, %v1773_v54 }
 0x16e   : > { %v6826_v27 = vpop.f32.mrf.mxu0  ;;  %v3258_v41 = vpop.f32.mrf.mxu1 }
 0x16f   : > { %v1774_v3 = vadd.f32 %v6826_v27, %v8974_v1  ;;  %v9209_v33 = vadd.f32 %v2118_v25, %v1771_v48  ;;  %v2138_v27 = vadd.f32 %v9033_v22, %v9054_v38 }
 0x170   : > { %v1731_v21 = vpop.f32.mrf.mxu0  ;;  %v9211_v18 = vpop.f32.mrf.mxu1 }
 0x171   : > { %v1772_v31 = vadd.f32 %v1731_v21, %v1279_v10  ;;  %v9213_v55 = vadd.f32 %v6866_v46, %v1774_v3 }
 0x172   : > { %v6877_v14 = vpop.f32.mrf.mxu0  ;;  %v9215_v45 = vpop.f32.mrf.mxu1 }
 0x173   : > { %v9217_v29 = vadd.f32 %v2121_v44, %v1772_v31  ;;  %v2889_v50 = vadd.f32 %v6877_v14, %v9008_v47  ;;  %v7252_v47 = vld [vmem:[%s9733_s3] sm:$0xff]  }
 0x174   : > { %v2760_v7 = vpop.f32.mrf.mxu0  ;;  %v6921_v59 = vpop.f32.mrf.mxu1  ;;  %7073 = vmatprep.subr.bf16.mxu1 %v7252_v47 }
 0x175   : > { %v2887_v24 = vadd.f32 %v2760_v7, %v9020_v49  ;;  %v9221_v1 = vadd.f32 %v6917_v36, %v2889_v50  ;;  %7074 = vmatpush3.bf16.msra.mxu1 %v7252_v47 }
 0x176   : > { %v6878_v25 = vpop.f32.mrf.mxu0  ;;  %v3274_v35 = vpop.f32.mrf.mxu1 }
 0x177   : > { %v9226_v53 = vadd.f32 %v6878_v25, %v9029_v5  ;;  %v9228_v57 = vadd.f32 %v3258_v41, %v2887_v24 }
 0x178   : > { %v2763_v46 = vpop.f32.mrf.mxu0  ;;  %v9230_v61 = vpop.f32.mrf.mxu1 }
 0x179   : > { %v9235_v49 = vadd.f32 %v2763_v46, %v2134_v6 }
 0x17a   : > { %v6881_v15 = vpop.f32.mrf.mxu0  ;;  %v9237_v44 = vpop.f32.mrf.mxu1 }
 0x17b   : > { %v2893_v11 = vadd.f32 %v6881_v15, %v9045_v9 }
 0x17c   : > { %v2776_v30 = vpop.f32.mrf.mxu0  ;;  %v6925_v5 = vpop.f32.mrf.mxu1 }
 0x17d   : > { %v2891_v54 = vadd.f32 %v2776_v30, %v9050_v60  ;;  %v9241_v17 = vadd.f32 %v6921_v59, %v2893_v11  ;;  %v2142_v59 = vadd.f32 %v9062_v28, %v9087_v23 }
 0x17e   : > { %v6882_v36 = vpop.f32.mrf.mxu0  ;;  %v3290_v48 = vpop.f32.mrf.mxu1 }
 0x17f   : > { %v9246_v41 = vadd.f32 %v6882_v36, %v9056_v51  ;;  %v9248_v13 = vadd.f32 %v3274_v35, %v2891_v54 }
 0x180   : > { %v2779_v10 = vpop.f32.mrf.mxu0  ;;  %v9250_v3 = vpop.f32.mrf.mxu1 }
 0x181   : > { %v9252_v9 = vadd.f32 %v2779_v10, %v2138_v27 }
 0x182   : > { %v6885_v21 = vpop.f32.mrf.mxu0  ;;  %v9254_v31 = vpop.f32.mrf.mxu1 }
 0x183   : > { %v2897_v60 = vadd.f32 %v6885_v21, %v9078_v4 }
 0x184   : > { %v2792_v14 = vpop.f32.mrf.mxu0  ;;  %v6929_v50 = vpop.f32.mrf.mxu1 }
 0x185   : > { %v2895_v7 = vadd.f32 %v2792_v14, %v9083_v63  ;;  %v9258_v22 = vadd.f32 %v6925_v5, %v2897_v60  ;;  %v2146_v5 = vadd.f32 %v9092_v42, %v9117_v20 }
 0x186   : > { %v6886_v38 = vpop.f32.mrf.mxu0  ;;  %v3306_v51 = vpop.f32.mrf.mxu1 }
 0x187   : > { %v9263_v24 = vadd.f32 %v6886_v38, %v9089_v62  ;;  %v9265_v25 = vadd.f32 %v3290_v48, %v2895_v7 }
 0x188   : > { %v2795_v35 = vpop.f32.mrf.mxu0  ;;  %v9267_v6 = vpop.f32.mrf.mxu1 }
 0x189   : > { %v9269_v4 = vadd.f32 %v2795_v35, %v2142_v59 }
 0x18a   : > { %v6889_v46 = vpop.f32.mrf.mxu0  ;;  %v9271_v47 = vpop.f32.mrf.mxu1 }
 0x18b   : > { %v2901_v63 = vadd.f32 %v6889_v46, %v9108_v2 }
 0x18c   : > { %v2808_v15 = vpop.f32.mrf.mxu0  ;;  %v6933_v11 = vpop.f32.mrf.mxu1 }
 0x18d   : > { %v2899_v30 = vadd.f32 %v2808_v15, %v9113_v34  ;;  %v9275_v28 = vadd.f32 %v6929_v50, %v2901_v63 }
 0x18e   : > { %v6890_v23 = vpop.f32.mrf.mxu0  ;;  %v3322_v62 = vpop.f32.mrf.mxu1 }
 0x18f   : > { %v9280_v54 = vadd.f32 %v6890_v23, %v9119_v32  ;;  %v9282_v36 = vadd.f32 %v3306_v51, %v2899_v30 }
 0x190   : > { %v2811_v48 = vpop.f32.mrf.mxu0  ;;  %v9284_v27 = vpop.f32.mrf.mxu1 }
 0x191   : > { %v9286_v2 = vadd.f32 %v2811_v48, %v2146_v5 }
 0x192   : > { %v6893_v10 = vpop.f32.mrf.mxu0  ;;  %v9288_v21 = vpop.f32.mrf.mxu1 }
 0x193   : > { %v2905_v34 = vadd.f32 %v6893_v10, %v9139_v12 }
 0x194   : > { %v2824_v60 = vpop.f32.mrf.mxu0  ;;  %v6937_v14 = vpop.f32.mrf.mxu1 }
 0x195   : > { %v2903_v50 = vadd.f32 %v2824_v60, %v9145_v16  ;;  %v9292_v42 = vadd.f32 %v6933_v11, %v2905_v34 }
 0x196   : > { %v6894_v20 = vpop.f32.mrf.mxu0  ;;  %v3338_v32 = vpop.f32.mrf.mxu1 }
 0x197   : > { %v9295_v7 = vadd.f32 %v6894_v20, %v9149_v58  ;;  %v9297_v38 = vadd.f32 %v3322_v62, %v2903_v50 }
 0x198   : > { %v2827_v51 = vpop.f32.mrf.mxu0  ;;  %v9299_v59 = vpop.f32.mrf.mxu1 }
 0x199   : > { %9810 = vst [vmem:[#allocation5_spill] sm:$0xff] %v9299_v59  ;;  %v9302_v35 = vadd.f32 %v2827_v51, %v9155_v19 }
 0x19a   : > { %v6897_v12 = vpop.f32.mrf.mxu0  ;;  %v9304_v46 = vpop.f32.mrf.mxu1 }
 0x19b   : > { %9811 = vst [vmem:[#allocation6_spill] sm:$0xff] %v9304_v46  ;;  %v2909_v16 = vadd.f32 %v6897_v12, %v9167_v8 }
 0x19c   : > { %v2840_v63 = vpop.f32.mrf.mxu0  ;;  %v6941_v15 = vpop.f32.mrf.mxu1 }
 0x19d   : > { %v2907_v11 = vadd.f32 %v2840_v63, %v9173_v43  ;;  %v9308_v30 = vadd.f32 %v6937_v14, %v2909_v16 }
 0x19e   : > { %v6898_v58 = vpop.f32.mrf.mxu0  ;;  %v3354_v23 = vpop.f32.mrf.mxu1 }
 0x19f   : > { %v9311_v62 = vadd.f32 %v6898_v58, %v9175_v26  ;;  %v9313_v5 = vadd.f32 %v3338_v32, %v2907_v11 }
 0x1a0   : > { %v2843_v19 = vpop.f32.mrf.mxu0  ;;  %v9315_v48 = vpop.f32.mrf.mxu1 }
 0x1a1   : > { %9812 = vst [vmem:[#allocation11_spill] sm:$0xff] %v9311_v62  ;;  %9813 = vst [vmem:[#allocation15_spill] sm:$0xff] %v9315_v48  ;;  %v9318_v10 = vadd.f32 %v2843_v19, %v9179_v0 }
 0x1a2   : > { %v6901_v8 = vpop.f32.mrf.mxu0  ;;  %v9320_v34 = vpop.f32.mrf.mxu1 }
 0x1a3   : > { %9814 = vst [vmem:[#allocation7_spill] sm:$0xff] %v9318_v10  ;;  %9815 = vst [vmem:[#allocation14_spill] sm:$0xff] %v9320_v34  ;;  %v2913_v43 = vadd.f32 %v6901_v8, %v9187_v40 }
 0x1a4   : > { %v2856_v60 = vpop.f32.mrf.mxu0  ;;  %v6945_v14 = vpop.f32.mrf.mxu1 }
 0x1a5   : > { %v2911_v50 = vadd.f32 %v2856_v60, %v9195_v39  ;;  %v9324_v20 = vadd.f32 %v6941_v15, %v2913_v43 }
 0x1a6   : > { %v6902_v26 = vpop.f32.mrf.mxu0  ;;  %v3370_v32 = vpop.f32.mrf.mxu1 }
 0x1a7   : > { %v9327_v51 = vadd.f32 %v6902_v26, %v9197_v52  ;;  %v9329_v12 = vadd.f32 %v3354_v23, %v2911_v50 }
 0x1a8   : > { %v2859_v0 = vpop.f32.mrf.mxu0  ;;  %v9331_v16 = vpop.f32.mrf.mxu1 }
 0x1a9   : > { %9816 = vst [vmem:[#allocation8_spill] sm:$0xff] %v9327_v51  ;;  %9817 = vst [vmem:[#allocation19_spill] sm:$0xff] %v9331_v16  ;;  %v9334_v63 = vadd.f32 %v2859_v0, %v9201_v37 }
 0x1aa   : > { %v6905_v40 = vpop.f32.mrf.mxu0  ;;  %v9337_v39 = vpop.f32.mrf.mxu1 }
 0x1ab   : > { %9818 = vst [vmem:[#allocation9_spill] sm:$0xff] %v9334_v63  ;;  %v2917_v11 = vadd.f32 %v6905_v40, %v9204_v56  ;;  %9819 = vst [vmem:[#allocation21_spill] sm:$0xff] %v9337_v39 }
 0x1ac   : > { %v2872_v58 = vpop.f32.mrf.mxu0 }
 0x1ad   : > { %v2915_v15 = vadd.f32 %v2872_v58, %v9209_v33  ;;  %v9340_v19 = vadd.f32 %v6945_v14, %v2917_v11 }
 0x1ae   : > { %v6906_v52 = vpop.f32.mrf.mxu0  ;;  %v9347_v60 = vpop.f32.mrf.mxu1 }
 0x1af   : > { %v9343_v23 = vadd.f32 %v6906_v52, %v9213_v55  ;;  %v9345_v8 = vadd.f32 %v3370_v32, %v2915_v15 }
 0x1b0   : > { %v2875_v43 = vpop.f32.mrf.mxu0  ;;  %v9355_v33 = vpop.f32.mrf.mxu1 }
 0x1b1   : > { %9820 = vst [vmem:[#allocation12_spill] sm:$0xff] %v9343_v23  ;;  %v9350_v37 = vadd.f32 %v2875_v43, %v9217_v29 }
 0x1b2   : > { %v6957_v56 = vpop.f32.mrf.mxu0  ;;  %v9362_v32 = vpop.f32.mrf.mxu1 }
 0x1b3   : > { %9821 = vst [vmem:[#allocation26_spill] sm:$0xff] %v9350_v37  ;;  %v9353_v50 = vadd.f32 %v6957_v56, %v9221_v1 }
 0x1b4   : > { %v3648_v26 = vpop.f32.mrf.mxu0  ;;  %v9367_v29 = vpop.f32.mrf.mxu1 }
 0x1b5   : > { %v9358_v14 = vadd.f32 %v3648_v26, %v9228_v57 }
 0x1b6   : > { %v6958_v55 = vpop.f32.mrf.mxu0 }
 0x1b8   : > { %v9360_v0 = vpop.f32.mrf.mxu0  ;;  %v9374_v52 = vpop.f32.mrf.mxu1 }
 0x1ba   : > { %v6961_v40 = vpop.f32.mrf.mxu0  ;;  %v9381_v26 = vpop.f32.mrf.mxu1 }
 0x1bb   : > { %v9365_v11 = vadd.f32 %v6961_v40, %v9241_v17 }
 0x1bc   : > { %v3664_v58 = vpop.f32.mrf.mxu0 }
 0x1bd   : > { %v9370_v1 = vadd.f32 %v3664_v58, %v9248_v13  ;;  %v9388_v13 = vpop.f32.mrf.mxu1 }
 0x1be   : > { %v9372_v15 = vpop.f32.mrf.mxu0 }
 0x1bf   : > { %v9395_v23 = vpop.f32.mrf.mxu1 }
 0x1c0   : > { %v9376_v57 = vpop.f32.mrf.mxu0 }
 0x1c2   : > { %v6965_v43 = vpop.f32.mrf.mxu0 }
 0x1c3   : > { %v9379_v56 = vadd.f32 %v6965_v43, %v9258_v22 }
 0x1c4   : > { %v3680_v17 = vpop.f32.mrf.mxu0 }
 0x1c5   : > { %v9384_v40 = vadd.f32 %v3680_v17, %v9265_v25  ;;  %v9402_v25 = vpop.f32.mrf.mxu1 }
 0x1c6   : > { %v9386_v39 = vpop.f32.mrf.mxu0 }
 0x1c7   : > { %v9409_v51 = vpop.f32.mrf.mxu1 }
 0x1c8   : > { %v9390_v58 = vpop.f32.mrf.mxu0 }
 0x1ca   : > { %v6969_v37 = vpop.f32.mrf.mxu0 }
 0x1cb   : > { %v9393_v16 = vadd.f32 %v6969_v37, %v9275_v28 }
 0x1cc   : > { %v3696_v22 = vpop.f32.mrf.mxu0 }
 0x1cd   : > { %v9398_v43 = vadd.f32 %v3696_v22, %v9282_v36  ;;  %v9416_v36 = vpop.f32.mrf.mxu1 }
 0x1ce   : > { %v9400_v34 = vpop.f32.mrf.mxu0 }
 0x1cf   : > { %v9423_v62 = vpop.f32.mrf.mxu1 }
 0x1d0   : > { %v9404_v17 = vpop.f32.mrf.mxu0 }
 0x1d2   : > { %v6973_v63 = vpop.f32.mrf.mxu0 }
 0x1d3   : > { %v9407_v48 = vadd.f32 %v6973_v63, %v9292_v42 }
 0x1d4   : > { %v3712_v28 = vpop.f32.mrf.mxu0 }
 0x1d5   : > { %9822 = vst [vmem:[#allocation13_spill] sm:$0xff] %v9407_v48  ;;  %v9412_v37 = vadd.f32 %v3712_v28, %v9297_v38  ;;  %v9430_v38 = vpop.f32.mrf.mxu1 }
 0x1d6   : > { %v9414_v46 = vpop.f32.mrf.mxu0 }
 0x1d7   : > { %9823 = vst [vmem:[#allocation17_spill] sm:$0xff] %v9412_v37  ;;  %9824 = vst [vmem:[#allocation10_spill] sm:$0xff] %v9414_v46 }
 0x1d8   : > { %v9418_v22 = vpop.f32.mrf.mxu0 }
 0x1d9   : > { %9825 = vst [vmem:[#allocation16_spill] sm:$0xff] %v9418_v22  ;;  %v9437_v22 = vpop.f32.mrf.mxu1 }
 0x1da   : > { %v6977_v10 = vpop.f32.mrf.mxu0 }
 0x1db   : > { %v9421_v59 = vadd.f32 %v6977_v10, %v9308_v30 }
 0x1dc   : > { %v3728_v42 = vpop.f32.mrf.mxu0 }
 0x1dd   : > { %9826 = vst [vmem:[#allocation23_spill] sm:$0xff] %v9421_v59  ;;  %v9426_v63 = vadd.f32 %v3728_v42, %v9313_v5  ;;  %v9444_v5 = vpop.f32.mrf.mxu1 }
 0x1de   : > { %v9428_v48 = vpop.f32.mrf.mxu0 }
 0x1df   : > { %9827 = vst [vmem:[#allocation28_spill] sm:$0xff] %v9426_v63  ;;  %9828 = vst [vmem:[#allocation20_spill] sm:$0xff] %v9428_v48 }
 0x1e0   : > { %v9432_v28 = vpop.f32.mrf.mxu0 }
 0x1e1   : > { %9829 = vst [vmem:[#allocation22_spill] sm:$0xff] %v9432_v28  ;;  %v9451_v28 = vpop.f32.mrf.mxu1 }
 0x1e2   : > { %v6981_v37 = vpop.f32.mrf.mxu0 }
 0x1e3   : > { %v9435_v46 = vadd.f32 %v6981_v37, %v9324_v20 }
 0x1e4   : > { %v3744_v30 = vpop.f32.mrf.mxu0 }
 0x1e5   : > { %9830 = vst [vmem:[#allocation25_spill] sm:$0xff] %v9435_v46  ;;  %v9440_v10 = vadd.f32 %v3744_v30, %v9329_v12  ;;  %v3388_v12 = vadd.f32 %v9211_v18, %v9226_v53  ;;  %v9460_v30 = vpop.f32.mrf.mxu1  ;;  %v9476_v18 = vld [vmem:[%s9732_s2] ss:$0 sm:$0xff] }
 0x1e6   : > { %v9442_v59 = vpop.f32.mrf.mxu0 }
 0x1e7   : > { %9831 = vst [vmem:[#allocation18_spill] sm:$0xff] %v9440_v10 }
 0x1e8   : > { %v9446_v42 = vpop.f32.mrf.mxu0 }
 0x1e9   : > { %9832 = vst [vmem:[#allocation24_spill] sm:$0xff] %v9446_v42  ;;  %v3386_v42 = vadd.f32 %v9215_v45, %v9235_v49 }
 0x1ea   : > { %v6985_v63 = vpop.f32.mrf.mxu0 }
 0x1eb   : > { %v9449_v48 = vadd.f32 %v6985_v63, %v9340_v19  ;;  %v4531_v19 = vadd.f32 %v9347_v60, %v9353_v50  ;;  %v3778_v63 = vadd.f32 %v6958_v55, %v3388_v12  ;;  %v3392_v60 = vadd.f32 %v9230_v61, %v9246_v41 }
 0x1ec   : > { %v3760_v20 = vpop.f32.mrf.mxu0  ;;  %v3390_v55 = vadd.f32 %v9237_v44, %v9252_v9 }
 0x1ed   : > { %9833 = vst [vmem:[#allocation29_spill] sm:$0xff] %v9449_v48  ;;  %v9454_v37 = vadd.f32 %v3760_v20, %v9345_v8  ;;  %v4529_v8 = vadd.f32 %v9355_v33, %v9358_v14  ;;  %v3776_v20 = vadd.f32 %v9360_v0, %v3386_v42  ;;  %v4532_v45 = vadd.f32 %v9362_v32, %v3778_v63 }
 0x1ee   : > { %v9456_v46 = vpop.f32.mrf.mxu0  ;;  %v3782_v0 = vadd.f32 %v9372_v15, %v3392_v60  ;;  %v4535_v32 = vadd.f32 %v9374_v52, %v9365_v11 }
 0x1ef   : > { %9834 = vst [vmem:[#allocation30_spill] sm:$0xff] %v9454_v37  ;;  %9835 = vst [vmem:[#allocation32_spill] sm:$0xff] %v9456_v46  ;;  %v9471_v46 = vpop.f32.mrf.mxu1  ;;  %v4530_v33 = vadd.f32 %v9367_v29, %v3776_v20  ;;  %v4533_v29 = vadd.f32 %v9381_v26, %v9370_v1  ;;  %v3396_v1 = vadd.f32 %v9250_v3, %v9263_v24 }
 0x1f0   : > { %v9462_v10 = vpop.f32.mrf.mxu0  ;;  %v4536_v20 = vadd.f32 %v9388_v13, %v3782_v0  ;;  %v3394_v13 = vadd.f32 %v9254_v31, %v9269_v4 }
 0x1f1   : > { %v9486_v42 = vpop.f32.mrf.mxu1 }
 0x1f2   : > { %v7037_v48 = vpop.f32.mrf.mxu0  ;;  %v3784_v31 = vadd.f32 %v9390_v58, %v3394_v13 }
 0x1f3   : > { %v5029_v37 = vadd.f32 %v7037_v48, %v4531_v19 }
 0x1f4   : > { %v4900_v53 = vpop.f32.mrf.mxu0  ;;  %v4538_v58 = vadd.f32 %v9423_v62, %v3784_v31 }
 0x1f5   : > { %v5027_v49 = vadd.f32 %v4900_v53, %v4529_v8  ;;  %v5068_v14 = vadd.f32 %v9476_v18, %v5029_v37  ;;  %v3780_v37 = vadd.f32 %v9376_v57, %v3390_v55  ;;  %v9497_v53 = vpop.f32.mrf.mxu1 }
 0x1f6   : > { %v7038_v50 = vpop.f32.mrf.mxu0 }
 0x1f7   : > { %v5030_v48 = vadd.f32 %v7038_v50, %v4532_v45  ;;  %v5066_v19 = vadd.f32 %v9476_v18, %v5027_v49  ;;  %v5100_v44 = vmax.f32 %v5068_v14, 0.0  ;;  %v4534_v57 = vadd.f32 %v9395_v23, %v3780_v37  ;;  %v9506_v55 = vpop.f32.mrf.mxu1 }
 0x1f8   : > { %v4903_v12 = vpop.f32.mrf.mxu0 }
 0x1f9   : > { %v5069_v61 = vadd.f32 %v9476_v18, %v5030_v48  ;;  %v5028_v41 = vadd.f32 %v4903_v12, %v4530_v33  ;;  %v5098_v52 = vmax.f32 %v5066_v19, 0.0  ;;  %v3786_v48 = vadd.f32 %v9386_v39, %v3396_v1 }
 0x1fa   : > { %v7041_v63 = vpop.f32.mrf.mxu0  ;;  %v4539_v12 = vadd.f32 %v9402_v25, %v9379_v56 }
 0x1fb   : > { %v5101_v9 = vmax.f32 %v5069_v61, 0.0  ;;  %v5067_v15 = vadd.f32 %v9476_v18, %v5028_v41  ;;  %v5033_v8 = vadd.f32 %v7041_v63, %v4535_v32  ;;  %v4537_v32 = vadd.f32 %v9409_v51, %v9384_v40  ;;  %v9519_v41 = vpop.f32.mrf.mxu1 }
 0x1fc   : > { %v4916_v11 = vpop.f32.mrf.mxu0  ;;  %v4540_v25 = vadd.f32 %v9416_v36, %v3786_v48  ;;  %v3400_v51 = vadd.f32 %v9267_v6, %v9280_v54  ;;  %v3398_v36 = vadd.f32 %v9271_v47, %v9286_v2 }
 0x1fd   : > { %v5131_v45 = vpack.c.bf16 %v5101_v9, %v5100_v44  ;;  %v5099_v49 = vmax.f32 %v5067_v15, 0.0  ;;  %v5031_v60 = vadd.f32 %v4916_v11, %v4533_v29  ;;  %v5072_v33 = vadd.f32 %v9476_v18, %v5033_v8 }
 0x1fe   : > { %v7042_v26 = vpop.f32.mrf.mxu0  ;;  %v3790_v11 = vadd.f32 %v9400_v34, %v3400_v51  ;;  %v3788_v47 = vadd.f32 %v9404_v17, %v3398_v36 }
 0x1ff   : > { %v5130_v50 = vpack.c.bf16 %v5099_v49, %v5098_v52  ;;  %v5034_v14 = vadd.f32 %v7042_v26, %v4536_v20  ;;  %v5070_v3 = vadd.f32 %v9476_v18, %v5031_v60  ;;  %v5104_v39 = vmax.f32 %v5072_v33, 0.0  ;;  %v9528_v52 = vpop.f32.mrf.mxu1 }
 0x200   : > { %v4919_v0 = vpop.f32.mrf.mxu0  ;;  %v4543_v49 = vadd.f32 %v9430_v38, %v9393_v16  ;;  %v4541_v60 = vadd.f32 %v9437_v22, %v9398_v43  ;;  %v4544_v38 = vadd.f32 %v9444_v5, %v3790_v11  ;;  %v3404_v43 = vadd.f32 %v9284_v27, %v9295_v7 }
 0x201   : > { %v5073_v24 = vadd.f32 %v9476_v18, %v5034_v14  ;;  %v5032_v23 = vadd.f32 %v4919_v0, %v4534_v57  ;;  %7075 = vmatprep.mubr.msk.bf16.mxu1 %vm767_vm2, %v5130_v50  ;;  %v5102_v37 = vmax.f32 %v5070_v3, 0.0  ;;  %v9541_v57 = vpop.f32.mrf.mxu1  ;;  %v4542_v22 = vadd.f32 %v9451_v28, %v3788_v47  ;;  %v9838_v28 = vld [vmem:[#allocation17_spill] sm:$0xff] }
 0x202   : > { %v7045_v4 = vpop.f32.mrf.mxu0  ;;  %7076 = vmatmul.mubr.msk.bf16.vlgmr.msra.gmra.mxu1 %vm767_vm2, %v5131_v45  ;;  %v3402_v5 = vadd.f32 %v9288_v21, %v9302_v35 }
 0x203   : > { %v5105_v19 = vmax.f32 %v5073_v24, 0.0  ;;  %v5071_v61 = vadd.f32 %v9476_v18, %v5032_v23  ;;  %v5037_v56 = vadd.f32 %v7045_v4, %v4539_v12  ;;  %v9836_v24 = vld [vmem:[#allocation10_spill] sm:$0xff]  ;;  %v9837_v4 = vld [vmem:[#allocation13_spill] sm:$0xff] }
 0x204   : > { %v4932_v29 = vpop.f32.mrf.mxu0  ;;  %v3794_v23 = vadd.f32 %v9836_v24, %v3404_v43 }
 0x205   : > { %v5133_v63 = vpack.c.bf16 %v5105_v19, %v5104_v39  ;;  %v5103_v44 = vmax.f32 %v5071_v61, 0.0  ;;  %v5035_v9 = vadd.f32 %v4932_v29, %v4537_v32  ;;  %v5076_v8 = vadd.f32 %v9476_v18, %v5037_v56  ;;  %v7021_v32 = vpop.f32.mrf.mxu1  ;;  %v9839_v56 = vld [vmem:[#allocation16_spill] sm:$0xff] }
 0x206   : > { %v7046_v40 = vpop.f32.mrf.mxu0  ;;  %v4547_v39 = vadd.f32 %v9460_v30, %v9837_v4  ;;  %v4545_v61 = vadd.f32 %v9471_v46, %v9838_v28  ;;  %v9841_v46 = vld [vmem:[#allocation5_spill] sm:$0xff]  ;;  %v9848_v4 = vld [vmem:[#allocation8_spill] sm:$0xff] }
 0x207   : > { %v5132_v15 = vpack.c.bf16 %v5103_v44, %v5102_v37  ;;  %v5038_v20 = vadd.f32 %v7046_v40, %v4540_v25  ;;  %v5074_v6 = vadd.f32 %v9476_v18, %v5035_v9  ;;  %v5108_v34 = vmax.f32 %v5076_v8, 0.0  ;;  %v4498_v44 = vpop.f32.mrf.mxu1  ;;  %v9840_v8 = vld [vmem:[#allocation11_spill] sm:$0xff] }
 0x208   : > { %v4935_v45 = vpop.f32.mrf.mxu0  ;;  %v3792_v25 = vadd.f32 %v9839_v56, %v3402_v5  ;;  %v9850_v56 = vld [vmem:[#allocation9_spill] sm:$0xff] }
 0x209   : > { %v5077_v54 = vadd.f32 %v9476_v18, %v5038_v20  ;;  %v5036_v62 = vadd.f32 %v4935_v45, %v4538_v58  ;;  %7079 = vmatprep.mubr.msk.bf16.mxu1 %vm767_vm2, %v5132_v15  ;;  %v5106_v33 = vmax.f32 %v5074_v6, 0.0  ;;  %v3408_v20 = vadd.f32 %v9841_v46, %v9840_v8 }
 0x20a   : > { %v7049_v2 = vpop.f32.mrf.mxu0  ;;  %7080 = vmatmul.mubr.msk.bf16.gmra.mxu1 %vm767_vm2, %v5133_v63  ;;  %v4548_v63 = vadd.f32 %v9486_v42, %v3794_v23  ;;  %v4546_v11 = vadd.f32 %v9497_v53, %v3792_v25  ;;  %v9844_v42 = vld [vmem:[#allocation20_spill] sm:$0xff]  ;;  %v9851_v25 = vld [vmem:[#allocation14_spill] sm:$0xff] }
 0x20b   : > { %v5109_v1 = vmax.f32 %v5077_v54, 0.0  ;;  %v5075_v26 = vadd.f32 %v9476_v18, %v5036_v62  ;;  %v5041_v16 = vadd.f32 %v7049_v2, %v4543_v49  ;;  %v9842_v54 = vld [vmem:[#allocation7_spill] sm:$0xff]  ;;  %v9843_v62 = vld [vmem:[#allocation6_spill] sm:$0xff]  ;;  %v3798_v47 = vadd.f32 %v9844_v42, %v3408_v20  ;;  %v7022_v2 = vpop.f32.mrf.mxu1  ;;  %v9846_v53 = vld [vmem:[#allocation28_spill] sm:$0xff] }
 0x20c   : > { %v4948_v50 = vpop.f32.mrf.mxu0  ;;  %v9856_v42 = vld [vmem:[#allocation19_spill] sm:$0xff] }
 0x20d   : > { %v5135_v14 = vpack.c.bf16 %v5109_v1, %v5108_v34  ;;  %v5107_v13 = vmax.f32 %v5075_v26, 0.0  ;;  %v5039_v48 = vadd.f32 %v4948_v50, %v4541_v60  ;;  %v5080_v12 = vadd.f32 %v9476_v18, %v5041_v16  ;;  %v9845_v1 = vld [vmem:[#allocation23_spill] sm:$0xff] }
 0x20e   : > { %v7050_v17 = vpop.f32.mrf.mxu0  ;;  %v3406_v60 = vadd.f32 %v9843_v62, %v9842_v54  ;;  %v4551_v26 = vadd.f32 %v9506_v55, %v9845_v1 }
 0x20f   : > { %v5134_v0 = vpack.c.bf16 %v5107_v13, %v5106_v33  ;;  %v5042_v3 = vadd.f32 %v7050_v17, %v4544_v38  ;;  %v5078_v19 = vadd.f32 %v9476_v18, %v5039_v48  ;;  %v5112_v35 = vmax.f32 %v5080_v12, 0.0  ;;  %v4501_v12 = vpop.f32.mrf.mxu1 }
 0x210   : > { %v4951_v31 = vpop.f32.mrf.mxu0  ;;  %v4549_v33 = vadd.f32 %v9519_v41, %v9846_v53  ;;  %v9849_v41 = vld [vmem:[#allocation15_spill] sm:$0xff] }
 0x211   : > { %v5081_v27 = vadd.f32 %v9476_v18, %v5042_v3  ;;  %v5040_v7 = vadd.f32 %v4951_v31, %v4542_v22  ;;  %7083 = vmatprep.mubr.msk.bf16.mxu1 %vm767_vm2, %v5134_v0  ;;  %v5110_v51 = vmax.f32 %v5078_v19, 0.0  ;;  %v4552_v0 = vadd.f32 %v9528_v52, %v3798_v47 }
 0x212   : > { %v7053_v21 = vpop.f32.mrf.mxu0  ;;  %7084 = vmatmul.mubr.msk.bf16.gmra.mxu1 %vm767_vm2, %v5135_v14  ;;  %v9847_v14 = vld [vmem:[#allocation22_spill] sm:$0xff] }
 0x213   : > { %v5113_v29 = vmax.f32 %v5081_v27, 0.0  ;;  %v5079_v37 = vadd.f32 %v9476_v18, %v5040_v7  ;;  %v5045_v30 = vadd.f32 %v7053_v21, %v4547_v39  ;;  %v3796_v13 = vadd.f32 %v9847_v14, %v3406_v60  ;;  %v9855_v60 = vld [vmem:[#allocation12_spill] sm:$0xff] }
 0x214   : > { %v4964_v9 = vpop.f32.mrf.mxu0  ;;  %v3412_v39 = vadd.f32 %v9849_v41, %v9848_v4  ;;  %v3410_v21 = vadd.f32 %v9851_v25, %v9850_v56 }
 0x215   : > { %v5137_v40 = vpack.c.bf16 %v5113_v29, %v5112_v35  ;;  %v5111_v58 = vmax.f32 %v5079_v37, 0.0  ;;  %v5043_v15 = vadd.f32 %v4964_v9, %v4545_v61  ;;  %v5084_v49 = vadd.f32 %v9476_v18, %v5045_v30  ;;  %v7025_v35 = vpop.f32.mrf.mxu1  ;;  %v9852_v37 = vld [vmem:[#allocation25_spill] sm:$0xff] }
 0x216   : > { %v7054_v36 = vpop.f32.mrf.mxu0  ;;  %v4550_v27 = vadd.f32 %v9541_v57, %v3796_v13  ;;  %v3802_v52 = vadd.f32 %v9442_v59, %v3412_v39  ;;  %v4555_v30 = vadd.f32 %v7021_v32, %v9852_v37  ;;  %v9853_v57 = vld [vmem:[#allocation18_spill] sm:$0xff] }
 0x217   : > { %v5136_v45 = vpack.c.bf16 %v5111_v58, %v5110_v51  ;;  %v5046_v6 = vadd.f32 %v7054_v36, %v4548_v63  ;;  %v5082_v16 = vadd.f32 %v9476_v18, %v5043_v15  ;;  %v5116_v43 = vmax.f32 %v5084_v49, 0.0  ;;  %v9854_v58 = vld [vmem:[#allocation24_spill] sm:$0xff] }
 0x218   : > { %v4967_v34 = vpop.f32.mrf.mxu0  ;;  %v3800_v15 = vadd.f32 %v9854_v58, %v3410_v21  ;;  %v4556_v32 = vadd.f32 %v7022_v2, %v3802_v52 }
 0x219   : > { %v5085_v38 = vadd.f32 %v9476_v18, %v5046_v6  ;;  %v5044_v50 = vadd.f32 %v4967_v34, %v4546_v11  ;;  %7087 = vmatprep.mubr.msk.bf16.mxu1 %vm767_vm2, %v5136_v45  ;;  %v5114_v5 = vmax.f32 %v5082_v16, 0.0  ;;  %v4514_v11 = vpop.f32.mrf.mxu1 }
 0x21a   : > { %v7057_v48 = vpop.f32.mrf.mxu0  ;;  %7088 = vmatmul.mubr.msk.bf16.gmra.mxu1 %vm767_vm2, %v5137_v40  ;;  %v4553_v40 = vadd.f32 %v4498_v44, %v9853_v57  ;;  %v3416_v44 = vadd.f32 %v9856_v42, %v9855_v60  ;;  %v4554_v34 = vadd.f32 %v4501_v12, %v3800_v15 }
 0x21b   : > { %v5117_v17 = vmax.f32 %v5085_v38, 0.0  ;;  %v5083_v22 = vadd.f32 %v9476_v18, %v5044_v50  ;;  %v5049_v55 = vadd.f32 %v7057_v48, %v4551_v26  ;;  %v9857_v38 = vld [vmem:[#allocation26_spill] sm:$0xff]  ;;  %v9858_v50 = vld [vmem:[#allocation21_spill] sm:$0xff]  ;;  %v7026_v14 = vpop.f32.mrf.mxu1 }
 0x21c   : > { %v4980_v3 = vpop.f32.mrf.mxu0  ;;  %v3414_v53 = vadd.f32 %v9858_v50, %v9857_v38  ;;  %v9860_v48 = vld [vmem:[#allocation29_spill] sm:$0xff] }
 0x21d   : > { %v5139_v24 = vpack.c.bf16 %v5117_v17, %v5116_v43  ;;  %v5115_v23 = vmax.f32 %v5083_v22, 0.0  ;;  %v5047_v31 = vadd.f32 %v4980_v3, %v4549_v33  ;;  %v5088_v28 = vadd.f32 %v9476_v18, %v5049_v55  ;;  %v9859_v33 = vld [vmem:[#allocation32_spill] sm:$0xff]  ;;  %v4517_v39 = vpop.f32.mrf.mxu1 }
 0x21e   : > { %v7058_v19 = vpop.f32.mrf.mxu0  ;;  %v3806_v2 = vadd.f32 %v9859_v33, %v3416_v44  ;;  %v4559_v43 = vadd.f32 %v7025_v35, %v9860_v48  ;;  %v3804_v3 = vadd.f32 %v9462_v10, %v3414_v53 }
 0x21f   : > { %v5138_v7 = vpack.c.bf16 %v5115_v23, %v5114_v5  ;;  %v5050_v61 = vadd.f32 %v7058_v19, %v4552_v0  ;;  %v5086_v63 = vadd.f32 %v9476_v18, %v5047_v31  ;;  %v5120_v46 = vmax.f32 %v5088_v28, 0.0  ;;  %v9861_v0 = vld [vmem:[#allocation30_spill] sm:$0xff] }
 0x220   : > { %v4983_v29 = vpop.f32.mrf.mxu0  ;;  %v4557_v12 = vadd.f32 %v4514_v11, %v9861_v0  ;;  %v4560_v41 = vadd.f32 %v7026_v14, %v3806_v2  ;;  %v4558_v25 = vadd.f32 %v4517_v39, %v3804_v3 }
 0x221   : > { %v5089_v9 = vadd.f32 %v9476_v18, %v5050_v61  ;;  %v5048_v51 = vadd.f32 %v4983_v29, %v4550_v27  ;;  %7091 = vmatprep.mubr.msk.bf16.mxu1 %vm767_vm2, %v5138_v7  ;;  %v5118_v49 = vmax.f32 %v5086_v63, 0.0 }
 0x222   : > { %v7061_v8 = vpop.f32.mrf.mxu0  ;;  %7092 = vmatmul.mubr.msk.bf16.gmra.mxu1 %vm767_vm2, %v5139_v24 }
 0x223   : > { %v5121_v59 = vmax.f32 %v5089_v9, 0.0  ;;  %v5087_v20 = vadd.f32 %v9476_v18, %v5048_v51  ;;  %v5053_v36 = vadd.f32 %v7061_v8, %v4555_v30 }
 0x224   : > { %v4996_v45 = vpop.f32.mrf.mxu0 }
 0x225   : > { %v5141_v6 = vpack.c.bf16 %v5121_v59, %v5120_v46  ;;  %v5119_v54 = vmax.f32 %v5087_v20, 0.0  ;;  %v5051_v62 = vadd.f32 %v4996_v45, %v4553_v40  ;;  %v5092_v26 = vadd.f32 %v9476_v18, %v5053_v36  ;;  %v9619_v46 = vld [vmem:[%s9734_s4] ss:$0 sm:$0xff] }
 0x226   : > { %v7062_v47 = vpop.f32.mrf.mxu0 }
 0x227   : > { %v5140_v1 = vpack.c.bf16 %v5119_v54, %v5118_v49  ;;  %v5054_v16 = vadd.f32 %v7062_v47, %v4556_v32  ;;  %v5090_v17 = vadd.f32 %v9476_v18, %v5051_v62  ;;  %v5124_v24 = vmax.f32 %v5092_v26, 0.0 }
 0x228   : > { %v4999_v13 = vpop.f32.mrf.mxu0 }
 0x229   : > { %v5093_v22 = vadd.f32 %v9476_v18, %v5054_v16  ;;  %v5052_v55 = vadd.f32 %v4999_v13, %v4554_v34  ;;  %7095 = vmatprep.mubr.msk.bf16.mxu1 %vm767_vm2, %v5140_v1  ;;  %v5122_v27 = vmax.f32 %v5090_v17, 0.0 }
 0x22a   : > { %v7065_v5 = vpop.f32.mrf.mxu0  ;;  %7096 = vmatmul.mubr.msk.bf16.gmra.mxu1 %vm767_vm2, %v5141_v6 }
 0x22b   : > { %v5125_v23 = vmax.f32 %v5093_v22, 0.0  ;;  %v5091_v31 = vadd.f32 %v9476_v18, %v5052_v55  ;;  %v5057_v4 = vadd.f32 %v7065_v5, %v4559_v43 }
 0x22c   : > { %v5012_v19 = vpop.f32.mrf.mxu0 }
 0x22d   : > { %v5143_v7 = vpack.c.bf16 %v5125_v23, %v5124_v24  ;;  %v5123_v28 = vmax.f32 %v5091_v31, 0.0  ;;  %v5055_v61 = vadd.f32 %v5012_v19, %v4557_v12  ;;  %v5096_v10 = vadd.f32 %v9476_v18, %v5057_v4 }
 0x22e   : > { %v7066_v56 = vpop.f32.mrf.mxu0 }
 0x22f   : > { %v5142_v21 = vpack.c.bf16 %v5123_v28, %v5122_v27  ;;  %v5058_v52 = vadd.f32 %v7066_v56, %v4560_v41  ;;  %v5094_v29 = vadd.f32 %v9476_v18, %v5055_v61  ;;  %v5128_v63 = vmax.f32 %v5096_v10, 0.0 }
 0x230   : > { %v5015_v35 = vpop.f32.mrf.mxu0 }
 0x231   : > { %v5097_v37 = vadd.f32 %v9476_v18, %v5058_v52  ;;  %v5056_v30 = vadd.f32 %v5015_v35, %v4558_v25  ;;  %7099 = vmatprep.mubr.msk.bf16.mxu1 %vm767_vm2, %v5142_v21  ;;  %v5126_v57 = vmax.f32 %v5094_v29, 0.0 }
 0x232   : > { %7100 = vmatmul.mubr.msk.bf16.gmra.mxu1 %vm767_vm2, %v5143_v7 }
 0x233   : > { %v5129_v9 = vmax.f32 %v5097_v37, 0.0  ;;  %v5095_v51 = vadd.f32 %v9476_v18, %v5056_v30 }
 0x235   : > { %v5145_v40 = vpack.c.bf16 %v5129_v9, %v5128_v63  ;;  %v5127_v58 = vmax.f32 %v5095_v51, 0.0 }
 0x237   : > { %v5144_v15 = vpack.c.bf16 %v5127_v58, %v5126_v57 }
 0x239   : > { %7103 = vmatprep.mubr.msk.bf16.mxu1 %vm767_vm2, %v5144_v15 }
 0x23a   : > { %7104 = vmatmul.mubr.msk.bf16.gmra.mxu1 %vm767_vm2, %v5145_v40 }
 0x2c2   : > { %v7077_v8 = vpop.f32.mrf.mxu1 }
 0x2c3   : > { %v5276_v20 = vadd.f32 %v7077_v8, %v9619_v46 }
 0x2c4   : > { %v5267_v59 = vpop.f32.mrf.mxu1 }
 0x2c5   : > { %v5268_v18 = vadd.f32 %v9619_v46, %v5267_v59  ;;  %v5396_v45 = vmax.f32 %v5276_v20, 0.0 }
 0x2c6   : > { %v7078_v36 = vpop.f32.mrf.mxu1 }
 0x2c7   : > { %v5279_v32 = vadd.f32 %v7078_v36, %v9619_v46  ;;  %v5394_v62 = vmax.f32 %v5268_v18, 0.0 }
 0x2c8   : > { %v5270_v11 = vpop.f32.mrf.mxu1 }
 0x2c9   : > { %v5397_v49 = vmax.f32 %v5279_v32, 0.0  ;;  %v5271_v6 = vadd.f32 %v9619_v46, %v5270_v11 }
 0x2ca   : > { %v7081_v54 = vpop.f32.mrf.mxu1 }
 0x2cb   : > { %v6420_v60 = vpack.c.bf16 %v5397_v49, %v5396_v45  ;;  %v5395_v42 = vmax.f32 %v5271_v6, 0.0  ;;  %v5292_v34 = vadd.f32 %v7081_v54, %v9619_v46 }
 0x2cc   : > { %v5283_v44 = vpop.f32.mrf.mxu1 }
 0x2cd   : > { %6492 = vst [vmem:[%s9628_s12 + $0x8] sm:$0xff] %v6420_v60   ;;  %v6415_v47 = vpack.c.bf16 %v5395_v42, %v5394_v62  ;;  %v5284_v26 = vadd.f32 %v9619_v46, %v5283_v44  ;;  %v5400_v50 = vmax.f32 %v5292_v34, 0.0 }
 0x2ce   : > { %v7082_v1 = vpop.f32.mrf.mxu1 }
 0x2cf   : > { %6416 = vst [vmem:[%s9628_s12] sm:$0xff] %v6415_v47   ;;  %v5295_v16 = vadd.f32 %v7082_v1, %v9619_v46  ;;  %v5398_v14 = vmax.f32 %v5284_v26, 0.0 }
 0x2d0   : > { %v5286_v38 = vpop.f32.mrf.mxu1 }
 0x2d1   : > { %v5401_v53 = vmax.f32 %v5295_v16, 0.0  ;;  %v5287_v33 = vadd.f32 %v9619_v46, %v5286_v38 }
 0x2d2   : > { %v7085_v2 = vpop.f32.mrf.mxu1 }
 0x2d3   : > { %v6430_v13 = vpack.c.bf16 %v5401_v53, %v5400_v50  ;;  %v5399_v48 = vmax.f32 %v5287_v33, 0.0  ;;  %v5308_v22 = vadd.f32 %v7085_v2, %v9619_v46 }
 0x2d4   : > { %v5299_v43 = vpop.f32.mrf.mxu1 }
 0x2d5   : > { %6494 = vst [vmem:[%s9628_s12 + $0x18] sm:$0xff] %v6430_v13   ;;  %v6425_v17 = vpack.c.bf16 %v5399_v48, %v5398_v14  ;;  %v5300_v0 = vadd.f32 %v9619_v46, %v5299_v43  ;;  %v5404_v5 = vmax.f32 %v5308_v22, 0.0 }
 0x2d6   : > { %v7086_v55 = vpop.f32.mrf.mxu1 }
 0x2d7   : > { %6493 = vst [vmem:[%s9628_s12 + $0x10] sm:$0xff] %v6425_v17   ;;  %v5311_v12 = vadd.f32 %v7086_v55, %v9619_v46  ;;  %v5402_v4 = vmax.f32 %v5300_v0, 0.0 }
 0x2d8   : > { %v5302_v3 = vpop.f32.mrf.mxu1 }
 0x2d9   : > { %v5405_v24 = vmax.f32 %v5311_v12, 0.0  ;;  %v5303_v23 = vadd.f32 %v9619_v46, %v5302_v3 }
 0x2da   : > { %v7089_v31 = vpop.f32.mrf.mxu1 }
 0x2db   : > { %v6440_v41 = vpack.c.bf16 %v5405_v24, %v5404_v5  ;;  %v5403_v39 = vmax.f32 %v5303_v23, 0.0  ;;  %v5324_v7 = vadd.f32 %v7089_v31, %v9619_v46 }
 0x2dc   : > { %v5315_v19 = vpop.f32.mrf.mxu1 }
 0x2dd   : > { %6496 = vst [vmem:[%s9628_s12 + $0x28] sm:$0xff] %v6440_v41   ;;  %v6435_v27 = vpack.c.bf16 %v5403_v39, %v5402_v4  ;;  %v5316_v61 = vadd.f32 %v9619_v46, %v5315_v19  ;;  %v5408_v21 = vmax.f32 %v5324_v7, 0.0 }
 0x2de   : > { %v7090_v28 = vpop.f32.mrf.mxu1 }
 0x2df   : > { %6495 = vst [vmem:[%s9628_s12 + $0x20] sm:$0xff] %v6435_v27   ;;  %v5327_v56 = vadd.f32 %v7090_v28, %v9619_v46  ;;  %v5406_v29 = vmax.f32 %v5316_v61, 0.0 }
 0x2e0   : > { %v5318_v25 = vpop.f32.mrf.mxu1 }
 0x2e1   : > { %v5409_v10 = vmax.f32 %v5327_v56, 0.0  ;;  %v5319_v52 = vadd.f32 %v9619_v46, %v5318_v25 }
 0x2e2   : > { %v7093_v35 = vpop.f32.mrf.mxu1 }
 0x2e3   : > { %v6450_v37 = vpack.c.bf16 %v5409_v10, %v5408_v21  ;;  %v5407_v30 = vmax.f32 %v5319_v52, 0.0  ;;  %v5340_v51 = vadd.f32 %v7093_v35, %v9619_v46 }
 0x2e4   : > { %v5331_v63 = vpop.f32.mrf.mxu1 }
 0x2e5   : > { %6498 = vst [vmem:[%s9628_s12 + $0x38] sm:$0xff] %v6450_v37   ;;  %v6445_v9 = vpack.c.bf16 %v5407_v30, %v5406_v29  ;;  %v5332_v40 = vadd.f32 %v9619_v46, %v5331_v63  ;;  %v5412_v8 = vmax.f32 %v5340_v51, 0.0 }
 0x2e6   : > { %v7094_v57 = vpop.f32.mrf.mxu1 }
 0x2e7   : > { %6497 = vst [vmem:[%s9628_s12 + $0x30] sm:$0xff] %v6445_v9   ;;  %v5343_v58 = vadd.f32 %v7094_v57, %v9619_v46  ;;  %v5410_v18 = vmax.f32 %v5332_v40, 0.0 }
 0x2e8   : > { %v5334_v15 = vpop.f32.mrf.mxu1 }
 0x2e9   : > { %v5413_v59 = vmax.f32 %v5343_v58, 0.0  ;;  %v5335_v20 = vadd.f32 %v9619_v46, %v5334_v15 }
 0x2ea   : > { %v7097_v36 = vpop.f32.mrf.mxu1 }
 0x2eb   : > { %v6460_v32 = vpack.c.bf16 %v5413_v59, %v5412_v8  ;;  %v5411_v11 = vmax.f32 %v5335_v20, 0.0  ;;  %v5356_v6 = vadd.f32 %v7097_v36, %v9619_v46 }
 0x2ec   : > { %v5347_v45 = vpop.f32.mrf.mxu1 }
 0x2ed   : > { %6500 = vst [vmem:[%s9628_s12 + $0x48] sm:$0xff] %v6460_v32   ;;  %v6455_v49 = vpack.c.bf16 %v5411_v11, %v5410_v18  ;;  %v5348_v62 = vadd.f32 %v9619_v46, %v5347_v45  ;;  %v5416_v44 = vmax.f32 %v5356_v6, 0.0 }
 0x2ee   : > { %v7098_v54 = vpop.f32.mrf.mxu1 }
 0x2ef   : > { %6499 = vst [vmem:[%s9628_s12 + $0x40] sm:$0xff] %v6455_v49   ;;  %v5359_v60 = vadd.f32 %v7098_v54, %v9619_v46  ;;  %v5414_v26 = vmax.f32 %v5348_v62, 0.0 }
 0x2f0   : > { %v5350_v42 = vpop.f32.mrf.mxu1 }
 0x2f1   : > { %v5417_v47 = vmax.f32 %v5359_v60, 0.0  ;;  %v5351_v34 = vadd.f32 %v9619_v46, %v5350_v42 }
 0x2f2   : > { %v7101_v1 = vpop.f32.mrf.mxu1 }
 0x2f3   : > { %v6470_v16 = vpack.c.bf16 %v5417_v47, %v5416_v44  ;;  %v5415_v38 = vmax.f32 %v5351_v34, 0.0  ;;  %v5372_v33 = vadd.f32 %v7101_v1, %v9619_v46 }
 0x2f4   : > { %v5363_v50 = vpop.f32.mrf.mxu1 }
 0x2f5   : > { %6502 = vst [vmem:[%s9628_s12 + $0x58] sm:$0xff] %v6470_v16   ;;  %v6465_v53 = vpack.c.bf16 %v5415_v38, %v5414_v26  ;;  %v5364_v14 = vadd.f32 %v9619_v46, %v5363_v50  ;;  %v5420_v43 = vmax.f32 %v5372_v33, 0.0 }
 0x2f6   : > { %v7102_v2 = vpop.f32.mrf.mxu1 }
 0x2f7   : > { %6501 = vst [vmem:[%s9628_s12 + $0x50] sm:$0xff] %v6465_v53   ;;  %v5375_v13 = vadd.f32 %v7102_v2, %v9619_v46  ;;  %v5418_v0 = vmax.f32 %v5364_v14, 0.0 }
 0x2f8   : > { %v5366_v48 = vpop.f32.mrf.mxu1 }
 0x2f9   : > { %v5421_v17 = vmax.f32 %v5375_v13, 0.0  ;;  %v5367_v22 = vadd.f32 %v9619_v46, %v5366_v48 }
 0x2fa   : > { %v7105_v55 = vpop.f32.mrf.mxu1 }
 0x2fb   : > { %v6480_v12 = vpack.c.bf16 %v5421_v17, %v5420_v43  ;;  %v5419_v3 = vmax.f32 %v5367_v22, 0.0  ;;  %v5388_v23 = vadd.f32 %v7105_v55, %v9619_v46 }
 0x2fc   : > { %v5379_v5 = vpop.f32.mrf.mxu1 }
 0x2fd   : > { %6504 = vst [vmem:[%s9628_s12 + $0x68] sm:$0xff] %v6480_v12   ;;  %v6475_v24 = vpack.c.bf16 %v5419_v3, %v5418_v0  ;;  %v5380_v4 = vadd.f32 %v9619_v46, %v5379_v5  ;;  %v5424_v19 = vmax.f32 %v5388_v23, 0.0 }
 0x2fe   : > { %v7106_v31 = vpop.f32.mrf.mxu1 }
 0x2ff   : > { %6503 = vst [vmem:[%s9628_s12 + $0x60] sm:$0xff] %v6475_v24   ;;  %v5391_v41 = vadd.f32 %v7106_v31, %v9619_v46  ;;  %v5422_v28 = vmax.f32 %v5380_v4, 0.0 }
 0x300   : > { %v5382_v39 = vpop.f32.mrf.mxu1 }
 0x301   : > { %v5425_v27 = vmax.f32 %v5391_v41, 0.0  ;;  %v5383_v7 = vadd.f32 %v9619_v46, %v5382_v39 }
 0x303   : > { %v6490_v61 = vpack.c.bf16 %v5425_v27, %v5424_v19  ;;  %v5423_v56 = vmax.f32 %v5383_v7, 0.0 }
 0x305   : > { %6506 = vst [vmem:[%s9628_s12 + $0x78] sm:$0xff] %v6490_v61   ;;  %v6485_v25 = vpack.c.bf16 %v5423_v56, %v5422_v28 }
 0x307   : > { %6505 = vst [vmem:[%s9628_s12 + $0x70] sm:$0xff] %v6485_v25  }
 0x308   : > { %7266 = shalt.err (!%p7263_p5)
}
 0x309   : > { %s7267_s29 = scalar_lea.hbm %s9677_s10, 2048  ;;  %s7271_s9 = scalar_lea.hbm %s9735_s5, 4096 }
 0x30a   : > { %p7268_p6 = scmp.ne.s32.totalorder %s9677_s10, %s7267_s29  ;;  %p7272_p10 = scmp.lt.s32.totalorder %s9677_s10, %s9735_s5 }
 0x30b   : > { %p7273_p11 = scmp.lt.s32.totalorder %s7271_s9, %s7267_s29 }
 0x30c   : > { %p7269_p7 = pnand %p7268_p6, %p7404_p4 }
 0x30d   : > { %p7274_p12 = por %p7273_p11, %p7272_p10 }
 0x30e   : > { %p7270_p9 = pneg %p7269_p7 }
 0x310   : > { %p7275_p13 = pnand %p7274_p12, %p7270_p9 }
 0x312   : > { %7278 = shalt.err (!%p7275_p13)
}
 0x313   : > { %s7332_s13 = smov 64   ;;  %s7333_s15 = smov 4  }
 0x314   : > { %7108 = dma.vmem_to_hbm [thread:$0]  (%p7404_p4), %s9679_s14, 2048, %s9677_s10, %s9685_s17, %s7332_s13, %s7332_s13, %s7333_s15  }
 0x315 PF: > { %p7114_p0 = scmp.ge.s32.totalorder %s7329_s23, 2  ;;  %s5617_s16 = sand.u32 1, %s7309_s18  }
 0x316   : > { %s5618_s21 = scalar_lea.sflag [#allocation3], %s5617_s16 }
 0x317   : > { %p7111_p1 = pnand %p7114_p0, %p7411_p8 }
 0x319   : > { %p7112_p2 = pneg %p7111_p1 }
 0x31b   : > { %7304 = dma.done.wait (%p7112_p2), %s5618_s21, 2048  }
 0x31c   : > { %7306 = vsyncadd (%p7112_p2), %s5618_s21, 4294965248  ;;  %s18_s23 = sadd.s32 1, %s7329_s23   ;;  %s9862_s18 = smov %s7313_s19 }
 0x31d   : > { %p15_p3 = scmp.ge.s32.totalorder %s18_s23, 4   ;;  %s9863_s19 = smov %s7317_s20 }
 0x31e   : > { %s9864_s20 = smov %s7417_s6  ;;  %s9865_s21 = smov %s7325_s22 }
 0x31f   : > { %s9866_s22 = smov %s9868_s26  ;;  %17 = sbr.rel (!%p15_p3) target bundleno = 4 (0x4), region = 86 }
 0x324   :  { %5623 = vsyncpa [#allocation3], 1 }
 0x325   :  { %5625 = vsyncpa [#allocation3 + $0x1], 1 }

</bundles_post_ra>
